<compile_context>
chip_gen: v5e
topology: v5e:2x2
jax: 0.10.0
libtpu: 0.0.40
codegen_flags: <defaults>
</compile_context>

<pallas_src>
import functools

import jax
import jax.numpy as jnp
from jax.experimental import pallas as pl
from jax.experimental.pallas import tpu as pltpu

EPS = 1e-5
LANE = 128
VMEM_LIMIT = 48 * 1024 * 1024      # v7x-safe scoped-VMEM budget


def _round_up(x, m=LANE):
    return ((x + m - 1) // m) * m


def _pick_row_block(H, W, target_rows=512):
    """Largest divisor of H giving ~target_rows rows of W pixels per matmul."""
    rb = max(1, min(H, target_rows // max(W, 1)))
    while H % rb != 0:
        rb -= 1
    return rb


# --------------------------------------------------------------------------
# Kernel 1 & 2: 3x3 conv (im2col, single matmul per row block) + BN partial
# statistics.  Optionally applies a per-channel affine + ReLU to its *input*
# (the previous block's fused bias+BN+ReLU).
# --------------------------------------------------------------------------
def _conv_bn_stats_kernel(*refs, H, W, Cin_p, Cout_p, RB, apply_affine,
                          pad_out, mm_dtype):
    if apply_affine:
        x_ref, w_ref, sc_ref, sh_ref, y_ref, st_ref = refs
    else:
        x_ref, w_ref, y_ref, st_ref = refs
        sc_ref = sh_ref = None

    Hp, Wp = H + 2, W + 2
    nb = H // RB
    w = w_ref[...].astype(mm_dtype)                 # (9*Cin_p, Cout_p)

    if apply_affine:
        # Hoisted out of the row-block loop (broadcast is not CSE'd by JAX).
        sc = sc_ref[...].reshape(1, 1, Cin_p)       # BN scale of previous block
        sh = sh_ref[...].reshape(1, 1, Cin_p)       # BN shift of previous block

    if pad_out:
        # Zero only the 1-pixel border of the padded output (written once); the
        # interior is written directly by the row-block loop (no read-back).
        zrow = jnp.zeros((1, Wp, Cout_p), jnp.float32)
        zcol = jnp.zeros((Hp, 1, Cout_p), jnp.float32)
        y_ref[0, 0:1, :, :] = zrow
        y_ref[0, Hp - 1:Hp, :, :] = zrow
        y_ref[0, :, 0:1, :] = zcol
        y_ref[0, :, Wp - 1:Wp, :] = zcol

    def body(i, carry):
        s_sum, s_sq = carry
        r0 = pl.multiple_of(i * RB, RB)
        # Input slab with a 1-row halo on each side: (RB+2, Wp, Cin_p).
        slab = x_ref[0, pl.ds(r0, RB + 2), :, :]
        if apply_affine:
            act = jnp.maximum(slab * sc + sh, 0.0)  # fused BN + ReLU
            # The zero padding border must stay zero (affine maps 0 -> shift).
            row = jax.lax.broadcasted_iota(jnp.int32, (RB + 2, Wp, Cin_p), 0) + r0
            col = jax.lax.broadcasted_iota(jnp.int32, (RB + 2, Wp, Cin_p), 1)
            border = (row == 0) | (row == Hp - 1) | (col == 0) | (col == Wp - 1)
            slab = jnp.where(border, 0.0, act)

        # im2col: fold the 3x3 taps into the contraction dim -> ONE matmul.
        cols = []
        for kh in range(3):
            for kw in range(3):
                cols.append(
                    slab[kh:kh + RB, kw:kw + W, :].reshape(RB * W, Cin_p))
        patch = jnp.concatenate(cols, axis=-1).astype(mm_dtype)  # (RB*W, 9*Cin_p)
        acc = jnp.dot(patch, w, preferred_element_type=jnp.float32)

        # Single-pass BN partial statistics of the raw conv output
        # (conv bias cancels under batch-stat BN, so it is not added here).
        s_sum = s_sum + jnp.sum(acc, axis=0, keepdims=True)
        s_sq = s_sq + jnp.sum(acc * acc, axis=0, keepdims=True)

        blk = acc.reshape(RB, W, Cout_p)
        if pad_out:
            y_ref[0, pl.ds(r0 + 1, RB), 1:1 + W, :] = blk
        else:
            y_ref[0, pl.ds(r0, RB), :, :] = blk
        return s_sum, s_sq

    init = (jnp.zeros((1, Cout_p), jnp.float32),
            jnp.zeros((1, Cout_p), jnp.float32))
    s_sum, s_sq = jax.lax.fori_loop(0, nb, body, init, unroll=(nb <= 4))
    st_ref[...] = jnp.concatenate([s_sum, s_sq], axis=0)[None]  # (1, 2, Cout_p)


def _conv_block(x_pad, w_mat, in_affine, *, H, W, Cin_p, Cout_p, pad_out,
                mm_dtype=jnp.float32):
    """x_pad:  (B, H+2, W+2, Cin_p) zero-bordered NHWC.
       w_mat:  (9*Cin_p, Cout_p) tap-major conv weights.
       in_affine: None or (scale, shift), each (1, Cin_p): affine + ReLU applied
                  to the input on the fly (fused BN+ReLU of the previous block).
       Returns (raw conv output, per-image [sum, sumsq] stats)."""
    B = x_pad.shape[0]
    Hp, Wp = H + 2, W + 2
    RB = _pick_row_block(H, W)
    apply_affine = in_affine is not None

    kernel = functools.partial(
        _conv_bn_stats_kernel, H=H, W=W, Cin_p=Cin_p, Cout_p=Cout_p, RB=RB,
        apply_affine=apply_affine, pad_out=pad_out, mm_dtype=mm_dtype)

    in_specs = [
        pl.BlockSpec((1, Hp, Wp, Cin_p), lambda b: (b, 0, 0, 0)),
        pl.BlockSpec((9 * Cin_p, Cout_p), lambda b: (0, 0)),
    ]
    inputs = [x_pad, w_mat]
    if apply_affine:
        in_specs += [pl.BlockSpec((1, Cin_p), lambda b: (0, 0))] * 2
        inputs += [in_affine[0], in_affine[1]]

    if pad_out:
        y_shape = (B, Hp, Wp, Cout_p)
        y_spec = pl.BlockSpec((1, Hp, Wp, Cout_p), lambda b: (b, 0, 0, 0))
    else:
        y_shape = (B, H, W, Cout_p)
        y_spec = pl.BlockSpec((1, H, W, Cout_p), lambda b: (b, 0, 0, 0))

    return pl.pallas_call(
        kernel,
        grid=(B,),
        in_specs=in_specs,
        out_specs=(y_spec, pl.BlockSpec((1, 2, Cout_p), lambda b: (b, 0, 0))),
        out_shape=(jax.ShapeDtypeStruct(y_shape, jnp.float32),
                   jax.ShapeDtypeStruct((B, 2, Cout_p), jnp.float32)),
        compiler_params=pltpu.CompilerParams(
            dimension_semantics=("parallel",),
            vmem_limit_bytes=VMEM_LIMIT),
    )(*inputs)


# --------------------------------------------------------------------------
# Kernel 3: final fused (bias+)BN affine + ReLU, gridded over (batch, rows).
# --------------------------------------------------------------------------
def _affine_relu_kernel(y_ref, sc_ref, sh_ref, o_ref):
    sc = sc_ref[...].reshape(1, 1, 1, -1)
    sh = sh_ref[...].reshape(1, 1, 1, -1)
    o_ref[...] = jnp.maximum(y_ref[...] * sc + sh, 0.0)


def _affine_relu(y, scale, shift):
    B, H, W, Cp = y.shape
    RB = _pick_row_block(H, W, target_rows=1024)
    blk = pl.BlockSpec((1, RB, W, Cp), lambda b, r: (b, r, 0, 0))
    return pl.pallas_call(
        _affine_relu_kernel,
        grid=(B, H // RB),
        in_specs=[blk,
                  pl.BlockSpec((1, Cp), lambda b, r: (0, 0)),
                  pl.BlockSpec((1, Cp), lambda b, r: (0, 0))],
        out_specs=blk,
        out_shape=jax.ShapeDtypeStruct((B, H, W, Cp), jnp.float32),
        compiler_params=pltpu.CompilerParams(
            dimension_semantics=("parallel", "parallel"),
            vmem_limit_bytes=VMEM_LIMIT),
    )(y, scale, shift)


# --------------------------------------------------------------------------
# Host-side glue
# --------------------------------------------------------------------------
def _bn_scale_shift(stats, gamma_p, beta_p, count):
    """Fold BatchNorm (batch stats, biased var) into per-channel scale/shift.
    The conv bias cancels exactly under batch-statistics BN."""
    s = jnp.sum(stats[:, 0, :], axis=0)
    sq = jnp.sum(stats[:, 1, :], axis=0)
    mean = s / count
    var = jnp.maximum(sq / count - mean * mean, 0.0)
    scale = gamma_p.reshape(-1) * jax.lax.rsqrt(var + EPS)
    shift = beta_p.reshape(-1) - mean * scale
    return scale.reshape(1, -1), shift.reshape(1, -1)


def _pad_last(a, target):
    pad = target - a.shape[-1]
    if pad == 0:
        return a
    return jnp.pad(a, [(0, 0)] * (a.ndim - 1) + [(0, pad)])


def double_conv(x_nchw, params, mm_dtype=jnp.float32):
    """x_nchw: (B, Cin, H, W) float32 (PyTorch layout)."""
    w1, b1, g1, be1, w2, b2, g2, be2 = params
    del b1, b2  # conv biases cancel exactly under batch-statistics BatchNorm
    B, Cin, H, W = x_nchw.shape
    Cmid, Cout = w1.shape[3], w2.shape[3]
    Cin_p, Cmid_p, Cout_p = _round_up(Cin), _round_up(Cmid), _round_up(Cout)

    # NCHW -> NHWC, 1-px spatial zero pad, lane-pad channels (one fused XLA
    # pass over the small Cin tensor).
    x = jnp.transpose(x_nchw, (0, 2, 3, 1))
    x = jnp.pad(x, ((0, 0), (1, 1), (1, 1), (0, Cin_p - Cin)))

    # HWIO weights -> (9*Cin_p, Cout_p) matrices (tap-major, matches im2col).
    w1_mat = jnp.pad(
        w1, ((0, 0), (0, 0), (0, Cin_p - Cin), (0, Cmid_p - Cmid))
    ).reshape(9 * Cin_p, Cmid_p)
    w2_mat = jnp.pad(
        w2, ((0, 0), (0, 0), (0, Cmid_p - Cmid), (0, Cout_p - Cout))
    ).reshape(9 * Cmid_p, Cout_p)
    g1_p, be1_p = _pad_last(g1, Cmid_p), _pad_last(be1, Cmid_p)
    g2_p, be2_p = _pad_last(g2, Cout_p), _pad_last(be2, Cout_p)

    count = jnp.float32(B * H * W)

    # conv1 -> raw output in a zero-bordered buffer (the halo conv2 needs)
    y1_raw, st1 = _conv_block(x, w1_mat, None, H=H, W=W, Cin_p=Cin_p,
                              Cout_p=Cmid_p, pad_out=True, mm_dtype=mm_dtype)
    scale1, shift1 = _bn_scale_shift(st1, g1_p, be1_p, count)

    # conv2, with BN1 affine + ReLU fused into its input read
    y2_raw, st2 = _conv_block(y1_raw, w2_mat, (scale1, shift1), H=H, W=W,
                              Cin_p=Cmid_p, Cout_p=Cout_p, pad_out=False,
                              mm_dtype=mm_dtype)
    scale2, shift2 = _bn_scale_shift(st2, g2_p, be2_p, count)

    out = _affine_relu(y2_raw, scale2, shift2)          # (B, H, W, Cout_p)
    return jnp.transpose(out[..., :Cout], (0, 3, 1, 2))  # back to NCHW


# --------------------------------------------------------------------------
# Params / reference / self-test
# --------------------------------------------------------------------------
def init_params(key, in_channels, out_channels, mid_channels=None):
    """PyTorch-default-style init (uniform +-1/sqrt(fan_in); BN gamma=1, beta=0)."""
    if not mid_channels:
        mid_channels = out_channels
    k1, k2, k3, k4 = jax.random.split(key, 4)

    def conv_init(kw_, kb_, cin, cout):
        bound = 1.0 / jnp.sqrt(jnp.float32(cin * 9))
        w = jax.random.uniform(kw_, (3, 3, cin, cout), jnp.float32, -bound, bound)
        b = jax.random.uniform(kb_, (1, cout), jnp.float32, -bound, bound)
        return w, b

    w1, b1 = conv_init(k1, k2, in_channels, mid_channels)
    w2, b2 = conv_init(k3, k4, mid_channels, out_channels)
    g1 = jnp.ones((1, mid_channels), jnp.float32)
    be1 = jnp.zeros((1, mid_channels), jnp.float32)
    g2 = jnp.ones((1, out_channels), jnp.float32)
    be2 = jnp.zeros((1, out_channels), jnp.float32)
    return (w1, b1, g1, be1, w2, b2, g2, be2)


def ref_double_conv(x_nchw, params):
    """Pure-JAX reference (lax.conv) with identical semantics."""
    w1, b1, g1, be1, w2, b2, g2, be2 = params

    def block(x, w, b, g, be):
        y = jax.lax.conv_general_dilated(
            x, w, window_strides=(1, 1), padding=((1, 1), (1, 1)),
            dimension_numbers=("NCHW", "HWIO", "NCHW"))
        y = y + b.reshape(1, -1, 1, 1)
        mean = y.mean(axis=(0, 2, 3), keepdims=True)
        var = ((y - mean) ** 2).mean(axis=(0, 2, 3), keepdims=True)
        y = (y - mean) * jax.lax.rsqrt(var + EPS)
        y = y * g.reshape(1, -1, 1, 1) + be.reshape(1, -1, 1, 1)
        return jnp.maximum(y, 0.0)

    return block(block(x_nchw, w1, b1, g1, be1), w2, b2, g2, be2)


if __name__ == "__main__":
    key = jax.random.PRNGKey(0)
    kx, kp = jax.random.split(key)

    B, Cin, Cout, H, W = 2, 4, 8, 16, 16
    x = jax.random.normal(kx, (B, Cin, H, W), jnp.float32)
    params = init_params(kp, Cin, Cout)

    fwd = jax.jit(double_conv)
    out = jax.block_until_ready(fwd(x, params))

    ref = ref_double_conv(x, params)
    assert out.shape == (B, Cout, H, W), out.shape
    err = float(jnp.max(jnp.abs(out - ref)))
    assert err < 1e-3, f"max abs err {err}"

    print("KERNEL_OK")
</pallas_src>

<mosaic_0001>
module attributes {stable_mosaic.version = 11 : i64} {
  func.func @_conv_bn_stats_kernel(%arg0: i32, %arg1: memref<1x18x18x128xf32, #tpu.memory_space<vmem>>, %arg2: memref<1152x128xf32, #tpu.memory_space<vmem>>, %arg3: memref<1x18x18x128xf32, #tpu.memory_space<vmem>>, %arg4: memref<1x2x128xf32, #tpu.memory_space<vmem>>) attributes {dimension_semantics = [#tpu.dimension_semantics<parallel>], iteration_bounds = array<i64: 2>, scalar_prefetch = 0 : i64, scratch_operands = 0 : i64, tpu.core_type = #tpu.core_type<tc>, window_params = [{transform_indices = @transform_0, window_bounds = array<i64: 1, 18, 18, 128>}, {pipeline_mode = #tpu.pipeline_mode<synchronous>, transform_indices = @transform_1, window_bounds = array<i64: 1152, 128>}, {transform_indices = @transform_2, window_bounds = array<i64: 1, 18, 18, 128>}, {transform_indices = @transform_3, window_bounds = array<i64: 1, 2, 128>}]} {
    %c0 = arith.constant 0 : index
    %c0_0 = arith.constant 0 : index
    %0 = vector.load %arg2[%c0, %c0_0] : memref<1152x128xf32, #tpu.memory_space<vmem>>, vector<1152x128xf32>
    %cst = arith.constant 0.000000e+00 : f32
    %1 = vector.broadcast %cst : f32 to vector<1x18x128xf32>
    %cst_1 = arith.constant 0.000000e+00 : f32
    %2 = vector.broadcast %cst_1 : f32 to vector<18x1x128xf32>
    %c0_2 = arith.constant 0 : index
    %c0_3 = arith.constant 0 : index
    %c0_4 = arith.constant 0 : index
    %c0_5 = arith.constant 0 : index
    %3 = vector.load %arg3[%c0_2, %c0_3, %c0_4, %c0_5] : memref<1x18x18x128xf32, #tpu.memory_space<vmem>>, vector<1x1x18x128xf32>
    %4 = vector.shape_cast %3 : vector<1x1x18x128xf32> to vector<1x18x128xf32>
    %5 = vector.shape_cast %1 : vector<1x18x128xf32> to vector<1x1x18x128xf32>
    tpu.vector_store %arg3[%c0_2, %c0_3, %c0_4, %c0_5], %5 {strides = array<i32>} : memref<1x18x18x128xf32, #tpu.memory_space<vmem>>, vector<1x1x18x128xf32>,
    %c0_6 = arith.constant 0 : index
    %c17 = arith.constant 17 : index
    %c0_7 = arith.constant 0 : index
    %c0_8 = arith.constant 0 : index
    %6 = vector.load %arg3[%c0_6, %c17, %c0_7, %c0_8] : memref<1x18x18x128xf32, #tpu.memory_space<vmem>>, vector<1x1x18x128xf32>
    %7 = vector.shape_cast %6 : vector<1x1x18x128xf32> to vector<1x18x128xf32>
    %8 = vector.shape_cast %1 : vector<1x18x128xf32> to vector<1x1x18x128xf32>
    tpu.vector_store %arg3[%c0_6, %c17, %c0_7, %c0_8], %8 {strides = array<i32>} : memref<1x18x18x128xf32, #tpu.memory_space<vmem>>, vector<1x1x18x128xf32>,
    %c0_9 = arith.constant 0 : index
    %c0_10 = arith.constant 0 : index
    %c0_11 = arith.constant 0 : index
    %c0_12 = arith.constant 0 : index
    %9 = vector.load %arg3[%c0_9, %c0_10, %c0_11, %c0_12] : memref<1x18x18x128xf32, #tpu.memory_space<vmem>>, vector<1x18x1x128xf32>
    %10 = vector.shape_cast %9 : vector<1x18x1x128xf32> to vector<18x1x128xf32>
    %11 = vector.shape_cast %2 : vector<18x1x128xf32> to vector<1x18x1x128xf32>
    tpu.vector_store %arg3[%c0_9, %c0_10, %c0_11, %c0_12], %11 {strides = array<i32>} : memref<1x18x18x128xf32, #tpu.memory_space<vmem>>, vector<1x18x1x128xf32>,
    %c0_13 = arith.constant 0 : index
    %c0_14 = arith.constant 0 : index
    %c17_15 = arith.constant 17 : index
    %c0_16 = arith.constant 0 : index
    %12 = vector.load %arg3[%c0_13, %c0_14, %c17_15, %c0_16] : memref<1x18x18x128xf32, #tpu.memory_space<vmem>>, vector<1x18x1x128xf32>
    %13 = vector.shape_cast %12 : vector<1x18x1x128xf32> to vector<18x1x128xf32>
    %14 = vector.shape_cast %2 : vector<18x1x128xf32> to vector<1x18x1x128xf32>
    tpu.vector_store %arg3[%c0_13, %c0_14, %c17_15, %c0_16], %14 {strides = array<i32>} : memref<1x18x18x128xf32, #tpu.memory_space<vmem>>, vector<1x18x1x128xf32>,
    %cst_17 = arith.constant 0.000000e+00 : f32
    %15 = vector.broadcast %cst_17 : f32 to vector<1x128xf32>
    %cst_18 = arith.constant 0.000000e+00 : f32
    %16 = vector.broadcast %cst_18 : f32 to vector<1x128xf32>
    %c0_i32 = arith.constant 0 : i32
    %c16_i32 = arith.constant 16 : i32
    %17 = arith.muli %c0_i32, %c16_i32 : i32
    %18 = tpu.assume_multiple %17, 16 : i32
    %c0_19 = arith.constant 0 : index
    %19 = arith.index_cast %18 : i32 to index
    %c0_20 = arith.constant 0 : index
    %c0_21 = arith.constant 0 : index
    %20 = vector.load %arg1[%c0_19, %19, %c0_20, %c0_21] : memref<1x18x18x128xf32, #tpu.memory_space<vmem>>, vector<1x18x18x128xf32>
    %21 = vector.shape_cast %20 : vector<1x18x18x128xf32> to vector<18x18x128xf32>
    %22 = vector.extract_strided_slice %21 {offsets = [0, 0, 0], sizes = [16, 16, 128], strides = [1, 1, 1]} : vector<18x18x128xf32> to vector<16x16x128xf32>
    %23 = vector.shape_cast %22 : vector<16x16x128xf32> to vector<256x128xf32>
    %24 = vector.extract_strided_slice %21 {offsets = [0, 1, 0], sizes = [16, 16, 128], strides = [1, 1, 1]} : vector<18x18x128xf32> to vector<16x16x128xf32>
    %25 = vector.shape_cast %24 : vector<16x16x128xf32> to vector<256x128xf32>
    %26 = vector.extract_strided_slice %21 {offsets = [0, 2, 0], sizes = [16, 16, 128], strides = [1, 1, 1]} : vector<18x18x128xf32> to vector<16x16x128xf32>
    %27 = vector.shape_cast %26 : vector<16x16x128xf32> to vector<256x128xf32>
    %28 = vector.extract_strided_slice %21 {offsets = [1, 0, 0], sizes = [16, 16, 128], strides = [1, 1, 1]} : vector<18x18x128xf32> to vector<16x16x128xf32>
    %29 = vector.shape_cast %28 : vector<16x16x128xf32> to vector<256x128xf32>
    %30 = vector.extract_strided_slice %21 {offsets = [1, 1, 0], sizes = [16, 16, 128], strides = [1, 1, 1]} : vector<18x18x128xf32> to vector<16x16x128xf32>
    %31 = vector.shape_cast %30 : vector<16x16x128xf32> to vector<256x128xf32>
    %32 = vector.extract_strided_slice %21 {offsets = [1, 2, 0], sizes = [16, 16, 128], strides = [1, 1, 1]} : vector<18x18x128xf32> to vector<16x16x128xf32>
    %33 = vector.shape_cast %32 : vector<16x16x128xf32> to vector<256x128xf32>
    %34 = vector.extract_strided_slice %21 {offsets = [2, 0, 0], sizes = [16, 16, 128], strides = [1, 1, 1]} : vector<18x18x128xf32> to vector<16x16x128xf32>
    %35 = vector.shape_cast %34 : vector<16x16x128xf32> to vector<256x128xf32>
    %36 = vector.extract_strided_slice %21 {offsets = [2, 1, 0], sizes = [16, 16, 128], strides = [1, 1, 1]} : vector<18x18x128xf32> to vector<16x16x128xf32>
    %37 = vector.shape_cast %36 : vector<16x16x128xf32> to vector<256x128xf32>
    %38 = vector.extract_strided_slice %21 {offsets = [2, 2, 0], sizes = [16, 16, 128], strides = [1, 1, 1]} : vector<18x18x128xf32> to vector<16x16x128xf32>
    %39 = vector.shape_cast %38 : vector<16x16x128xf32> to vector<256x128xf32>
    %40 = tpu.concatenate %23, %25, %27, %29, %31, %33, %35, %37, %39 in 1 : vector<256x128xf32>, vector<256x128xf32>, vector<256x128xf32>, vector<256x128xf32>, vector<256x128xf32>, vector<256x128xf32>, vector<256x128xf32>, vector<256x128xf32>, vector<256x128xf32> -> vector<256x1152xf32>
    %cst_22 = arith.constant dense<0.000000e+00> : vector<256x128xf32>
    %41 = tpu.matmul %40, %0, %cst_22 {dimension_numbers = #tpu.dot_dimension_numbers<[1], [0], [0], [1], [0, 0, 1, 1], [], []>} : vector<256x1152xf32>, vector<1152x128xf32>, vector<256x128xf32> -> vector<256x128xf32>
    %cst_23 = arith.constant dense<0.000000e+00> : vector<128xf32>
    %42 = vector.multi_reduction <add>, %41, %cst_23 [0] : vector<256x128xf32> to vector<128xf32>
    %43 = vector.shape_cast %42 : vector<128xf32> to vector<1x128xf32>
    %44 = arith.addf %15, %43 : vector<1x128xf32>
    %45 = arith.mulf %41, %41 : vector<256x128xf32>
    %cst_24 = arith.constant dense<0.000000e+00> : vector<128xf32>
    %46 = vector.multi_reduction <add>, %45, %cst_24 [0] : vector<256x128xf32> to vector<128xf32>
    %47 = vector.shape_cast %46 : vector<128xf32> to vector<1x128xf32>
    %48 = arith.addf %16, %47 : vector<1x128xf32>
    %49 = vector.shape_cast %41 : vector<256x128xf32> to vector<16x16x128xf32>
    %c1_i32 = arith.constant 1 : i32
    %50 = arith.addi %18, %c1_i32 : i32
    %c0_25 = arith.constant 0 : index
    %51 = arith.index_cast %50 : i32 to index
    %c1 = arith.constant 1 : index
    %c0_26 = arith.constant 0 : index
    %52 = vector.load %arg3[%c0_25, %51, %c1, %c0_26] : memref<1x18x18x128xf32, #tpu.memory_space<vmem>>, vector<1x16x16x128xf32>
    %53 = vector.shape_cast %52 : vector<1x16x16x128xf32> to vector<16x16x128xf32>
    %54 = vector.shape_cast %49 : vector<16x16x128xf32> to vector<1x16x16x128xf32>
    tpu.vector_store %arg3[%c0_25, %51, %c1, %c0_26], %54 {strides = array<i32>} : memref<1x18x18x128xf32, #tpu.memory_space<vmem>>, vector<1x16x16x128xf32>,
    %c1_i32_27 = arith.constant 1 : i32
    %55 = tpu.concatenate %44, %48 in 0 : vector<1x128xf32>, vector<1x128xf32> -> vector<2x128xf32>
    %56 = vector.shape_cast %55 : vector<2x128xf32> to vector<1x2x128xf32>
    %c0_28 = arith.constant 0 : index
    %c0_29 = arith.constant 0 : index
    %c0_30 = arith.constant 0 : index
    %57 = vector.load %arg4[%c0_28, %c0_29, %c0_30] : memref<1x2x128xf32, #tpu.memory_space<vmem>>, vector<1x2x128xf32>
    tpu.vector_store %arg4[%c0_28, %c0_29, %c0_30], %56 {strides = array<i32>} : memref<1x2x128xf32, #tpu.memory_space<vmem>>, vector<1x2x128xf32>,
    return
  }
  func.func @transform_0(%arg0: i32) -> (i32, i32, i32, i32) {
    %c0_i32 = arith.constant 0 : i32
    %c0_i32_0 = arith.constant 0 : i32
    %c0_i32_1 = arith.constant 0 : i32
    %c0_i32_2 = arith.constant 0 : i32
    return %arg0, %c0_i32, %c0_i32_0, %c0_i32_1 : i32, i32, i32, i32
  }
  func.func @transform_1(%arg0: i32) -> (i32, i32) {
    %c0_i32 = arith.constant 0 : i32
    %c0_i32_0 = arith.constant 0 : i32
    %c0_i32_1 = arith.constant 0 : i32
    return %c0_i32, %c0_i32_0 : i32, i32
  }
  func.func @transform_2(%arg0: i32) -> (i32, i32, i32, i32) {
    %c0_i32 = arith.constant 0 : i32
    %c0_i32_0 = arith.constant 0 : i32
    %c0_i32_1 = arith.constant 0 : i32
    %c0_i32_2 = arith.constant 0 : i32
    return %arg0, %c0_i32, %c0_i32_0, %c0_i32_1 : i32, i32, i32, i32
  }
  func.func @transform_3(%arg0: i32) -> (i32, i32, i32) {
    %c0_i32 = arith.constant 0 : i32
    %c0_i32_0 = arith.constant 0 : i32
    %c0_i32_1 = arith.constant 0 : i32
    return %arg0, %c0_i32, %c0_i32_0 : i32, i32, i32
  }
}

module attributes {stable_mosaic.version = 11 : i64} {
  func.func @_affine_relu_kernel(%arg0: i32, %arg1: i32, %arg2: memref<1x16x16x128xf32, #tpu.memory_space<vmem>>, %arg3: memref<1x128xf32, #tpu.memory_space<vmem>>, %arg4: memref<1x128xf32, #tpu.memory_space<vmem>>, %arg5: memref<1x16x16x128xf32, #tpu.memory_space<vmem>>) attributes {dimension_semantics = [#tpu.dimension_semantics<parallel>, #tpu.dimension_semantics<parallel>], iteration_bounds = array<i64: 2, 1>, scalar_prefetch = 0 : i64, scratch_operands = 0 : i64, tpu.core_type = #tpu.core_type<tc>, window_params = [{transform_indices = @transform_0, window_bounds = array<i64: 1, 16, 16, 128>}, {pipeline_mode = #tpu.pipeline_mode<synchronous>, transform_indices = @transform_1, window_bounds = array<i64: 1, 128>}, {pipeline_mode = #tpu.pipeline_mode<synchronous>, transform_indices = @transform_2, window_bounds = array<i64: 1, 128>}, {transform_indices = @transform_3, window_bounds = array<i64: 1, 16, 16, 128>}]} {
    %c0 = arith.constant 0 : index
    %c0_0 = arith.constant 0 : index
    %0 = vector.load %arg3[%c0, %c0_0] : memref<1x128xf32, #tpu.memory_space<vmem>>, vector<1x128xf32>
    %1 = vector.shape_cast %0 : vector<1x128xf32> to vector<1x1x1x128xf32>
    %c0_1 = arith.constant 0 : index
    %c0_2 = arith.constant 0 : index
    %2 = vector.load %arg4[%c0_1, %c0_2] : memref<1x128xf32, #tpu.memory_space<vmem>>, vector<1x128xf32>
    %3 = vector.shape_cast %2 : vector<1x128xf32> to vector<1x1x1x128xf32>
    %c0_3 = arith.constant 0 : index
    %c0_4 = arith.constant 0 : index
    %c0_5 = arith.constant 0 : index
    %c0_6 = arith.constant 0 : index
    %4 = vector.load %arg2[%c0_3, %c0_4, %c0_5, %c0_6] : memref<1x16x16x128xf32, #tpu.memory_space<vmem>>, vector<1x16x16x128xf32>
    %5 = vector.broadcast %1 : vector<1x1x1x128xf32> to vector<1x16x16x128xf32>
    %6 = arith.mulf %4, %5 : vector<1x16x16x128xf32>
    %7 = vector.broadcast %3 : vector<1x1x1x128xf32> to vector<1x16x16x128xf32>
    %8 = arith.addf %6, %7 : vector<1x16x16x128xf32>
    %cst = arith.constant 0.000000e+00 : f32
    %9 = vector.broadcast %cst : f32 to vector<1x16x16x128xf32>
    %10 = arith.maximumf %8, %9 : vector<1x16x16x128xf32>
    %c0_7 = arith.constant 0 : index
    %c0_8 = arith.constant 0 : index
    %c0_9 = arith.constant 0 : index
    %c0_10 = arith.constant 0 : index
    %11 = vector.load %arg5[%c0_7, %c0_8, %c0_9, %c0_10] : memref<1x16x16x128xf32, #tpu.memory_space<vmem>>, vector<1x16x16x128xf32>
    tpu.vector_store %arg5[%c0_7, %c0_8, %c0_9, %c0_10], %10 {strides = array<i32>} : memref<1x16x16x128xf32, #tpu.memory_space<vmem>>, vector<1x16x16x128xf32>,
    return
  }
  func.func @transform_0(%arg0: i32, %arg1: i32) -> (i32, i32, i32, i32) {
    %c0_i32 = arith.constant 0 : i32
    %c0_i32_0 = arith.constant 0 : i32
    %c0_i32_1 = arith.constant 0 : i32
    return %arg0, %arg1, %c0_i32, %c0_i32_0 : i32, i32, i32, i32
  }
  func.func @transform_1(%arg0: i32, %arg1: i32) -> (i32, i32) {
    %c0_i32 = arith.constant 0 : i32
    %c0_i32_0 = arith.constant 0 : i32
    %c0_i32_1 = arith.constant 0 : i32
    return %c0_i32, %c0_i32_0 : i32, i32
  }
  func.func @transform_2(%arg0: i32, %arg1: i32) -> (i32, i32) {
    %c0_i32 = arith.constant 0 : i32
    %c0_i32_0 = arith.constant 0 : i32
    %c0_i32_1 = arith.constant 0 : i32
    return %c0_i32, %c0_i32_0 : i32, i32
  }
  func.func @transform_3(%arg0: i32, %arg1: i32) -> (i32, i32, i32, i32) {
    %c0_i32 = arith.constant 0 : i32
    %c0_i32_0 = arith.constant 0 : i32
    %c0_i32_1 = arith.constant 0 : i32
    return %arg0, %arg1, %c0_i32, %c0_i32_0 : i32, i32, i32, i32
  }
}

module attributes {stable_mosaic.version = 11 : i64} {
  func.func @_conv_bn_stats_kernel(%arg0: i32, %arg1: memref<1x18x18x128xf32, #tpu.memory_space<vmem>>, %arg2: memref<1152x128xf32, #tpu.memory_space<vmem>>, %arg3: memref<1x128xf32, #tpu.memory_space<vmem>>, %arg4: memref<1x128xf32, #tpu.memory_space<vmem>>, %arg5: memref<1x16x16x128xf32, #tpu.memory_space<vmem>>, %arg6: memref<1x2x128xf32, #tpu.memory_space<vmem>>) attributes {dimension_semantics = [#tpu.dimension_semantics<parallel>], iteration_bounds = array<i64: 2>, scalar_prefetch = 0 : i64, scratch_operands = 0 : i64, tpu.core_type = #tpu.core_type<tc>, window_params = [{transform_indices = @transform_0, window_bounds = array<i64: 1, 18, 18, 128>}, {pipeline_mode = #tpu.pipeline_mode<synchronous>, transform_indices = @transform_1, window_bounds = array<i64: 1152, 128>}, {pipeline_mode = #tpu.pipeline_mode<synchronous>, transform_indices = @transform_2, window_bounds = array<i64: 1, 128>}, {pipeline_mode = #tpu.pipeline_mode<synchronous>, transform_indices = @transform_3, window_bounds = array<i64: 1, 128>}, {transform_indices = @transform_4, window_bounds = array<i64: 1, 16, 16, 128>}, {transform_indices = @transform_5, window_bounds = array<i64: 1, 2, 128>}]} {
    %c0 = arith.constant 0 : index
    %c0_0 = arith.constant 0 : index
    %0 = vector.load %arg2[%c0, %c0_0] : memref<1152x128xf32, #tpu.memory_space<vmem>>, vector<1152x128xf32>
    %c0_1 = arith.constant 0 : index
    %c0_2 = arith.constant 0 : index
    %1 = vector.load %arg3[%c0_1, %c0_2] : memref<1x128xf32, #tpu.memory_space<vmem>>, vector<1x128xf32>
    %2 = vector.shape_cast %1 : vector<1x128xf32> to vector<1x1x128xf32>
    %c0_3 = arith.constant 0 : index
    %c0_4 = arith.constant 0 : index
    %3 = vector.load %arg4[%c0_3, %c0_4] : memref<1x128xf32, #tpu.memory_space<vmem>>, vector<1x128xf32>
    %4 = vector.shape_cast %3 : vector<1x128xf32> to vector<1x1x128xf32>
    %cst = arith.constant 0.000000e+00 : f32
    %5 = vector.broadcast %cst : f32 to vector<1x128xf32>
    %cst_5 = arith.constant 0.000000e+00 : f32
    %6 = vector.broadcast %cst_5 : f32 to vector<1x128xf32>
    %c0_i32 = arith.constant 0 : i32
    %c16_i32 = arith.constant 16 : i32
    %7 = arith.muli %c0_i32, %c16_i32 : i32
    %8 = tpu.assume_multiple %7, 16 : i32
    %c0_6 = arith.constant 0 : index
    %9 = arith.index_cast %8 : i32 to index
    %c0_7 = arith.constant 0 : index
    %c0_8 = arith.constant 0 : index
    %10 = vector.load %arg1[%c0_6, %9, %c0_7, %c0_8] : memref<1x18x18x128xf32, #tpu.memory_space<vmem>>, vector<1x18x18x128xf32>
    %11 = vector.shape_cast %10 : vector<1x18x18x128xf32> to vector<18x18x128xf32>
    %12 = vector.broadcast %2 : vector<1x1x128xf32> to vector<18x18x128xf32>
    %13 = arith.mulf %11, %12 : vector<18x18x128xf32>
    %14 = vector.broadcast %4 : vector<1x1x128xf32> to vector<18x18x128xf32>
    %15 = arith.addf %13, %14 : vector<18x18x128xf32>
    %cst_9 = arith.constant 0.000000e+00 : f32
    %16 = vector.broadcast %cst_9 : f32 to vector<18x18x128xf32>
    %17 = arith.maximumf %15, %16 : vector<18x18x128xf32>
    %18 = tpu.iota {dimensions = array<i32: 0>} : vector<18x18x128xi32>
    %19 = vector.broadcast %8 : i32 to vector<18x18x128xi32>
    %20 = arith.addi %18, %19 : vector<18x18x128xi32>
    %21 = tpu.iota {dimensions = array<i32: 1>} : vector<18x18x128xi32>
    %c0_i32_10 = arith.constant 0 : i32
    %22 = vector.broadcast %c0_i32_10 : i32 to vector<18x18x128xi32>
    %23 = arith.cmpi eq, %20, %22 : vector<18x18x128xi32>
    %c17_i32 = arith.constant 17 : i32
    %24 = vector.broadcast %c17_i32 : i32 to vector<18x18x128xi32>
    %25 = arith.cmpi eq, %20, %24 : vector<18x18x128xi32>
    %26 = arith.ori %23, %25 : vector<18x18x128xi1>
    %c0_i32_11 = arith.constant 0 : i32
    %27 = vector.broadcast %c0_i32_11 : i32 to vector<18x18x128xi32>
    %28 = arith.cmpi eq, %21, %27 : vector<18x18x128xi32>
    %29 = arith.ori %26, %28 : vector<18x18x128xi1>
    %c17_i32_12 = arith.constant 17 : i32
    %30 = vector.broadcast %c17_i32_12 : i32 to vector<18x18x128xi32>
    %31 = arith.cmpi eq, %21, %30 : vector<18x18x128xi32>
    %32 = arith.ori %29, %31 : vector<18x18x128xi1>
    %cst_13 = arith.constant 0.000000e+00 : f32
    %33 = vector.broadcast %cst_13 : f32 to vector<18x18x128xf32>
    %34 = arith.select %32, %33, %17 : vector<18x18x128xi1>, vector<18x18x128xf32>
    %35 = vector.extract_strided_slice %34 {offsets = [0, 0, 0], sizes = [16, 16, 128], strides = [1, 1, 1]} : vector<18x18x128xf32> to vector<16x16x128xf32>
    %36 = vector.shape_cast %35 : vector<16x16x128xf32> to vector<256x128xf32>
    %37 = vector.extract_strided_slice %34 {offsets = [0, 1, 0], sizes = [16, 16, 128], strides = [1, 1, 1]} : vector<18x18x128xf32> to vector<16x16x128xf32>
    %38 = vector.shape_cast %37 : vector<16x16x128xf32> to vector<256x128xf32>
    %39 = vector.extract_strided_slice %34 {offsets = [0, 2, 0], sizes = [16, 16, 128], strides = [1, 1, 1]} : vector<18x18x128xf32> to vector<16x16x128xf32>
    %40 = vector.shape_cast %39 : vector<16x16x128xf32> to vector<256x128xf32>
    %41 = vector.extract_strided_slice %34 {offsets = [1, 0, 0], sizes = [16, 16, 128], strides = [1, 1, 1]} : vector<18x18x128xf32> to vector<16x16x128xf32>
    %42 = vector.shape_cast %41 : vector<16x16x128xf32> to vector<256x128xf32>
    %43 = vector.extract_strided_slice %34 {offsets = [1, 1, 0], sizes = [16, 16, 128], strides = [1, 1, 1]} : vector<18x18x128xf32> to vector<16x16x128xf32>
    %44 = vector.shape_cast %43 : vector<16x16x128xf32> to vector<256x128xf32>
    %45 = vector.extract_strided_slice %34 {offsets = [1, 2, 0], sizes = [16, 16, 128], strides = [1, 1, 1]} : vector<18x18x128xf32> to vector<16x16x128xf32>
    %46 = vector.shape_cast %45 : vector<16x16x128xf32> to vector<256x128xf32>
    %47 = vector.extract_strided_slice %34 {offsets = [2, 0, 0], sizes = [16, 16, 128], strides = [1, 1, 1]} : vector<18x18x128xf32> to vector<16x16x128xf32>
    %48 = vector.shape_cast %47 : vector<16x16x128xf32> to vector<256x128xf32>
    %49 = vector.extract_strided_slice %34 {offsets = [2, 1, 0], sizes = [16, 16, 128], strides = [1, 1, 1]} : vector<18x18x128xf32> to vector<16x16x128xf32>
    %50 = vector.shape_cast %49 : vector<16x16x128xf32> to vector<256x128xf32>
    %51 = vector.extract_strided_slice %34 {offsets = [2, 2, 0], sizes = [16, 16, 128], strides = [1, 1, 1]} : vector<18x18x128xf32> to vector<16x16x128xf32>
    %52 = vector.shape_cast %51 : vector<16x16x128xf32> to vector<256x128xf32>
    %53 = tpu.concatenate %36, %38, %40, %42, %44, %46, %48, %50, %52 in 1 : vector<256x128xf32>, vector<256x128xf32>, vector<256x128xf32>, vector<256x128xf32>, vector<256x128xf32>, vector<256x128xf32>, vector<256x128xf32>, vector<256x128xf32>, vector<256x128xf32> -> vector<256x1152xf32>
    %cst_14 = arith.constant dense<0.000000e+00> : vector<256x128xf32>
    %54 = tpu.matmul %53, %0, %cst_14 {dimension_numbers = #tpu.dot_dimension_numbers<[1], [0], [0], [1], [0, 0, 1, 1], [], []>} : vector<256x1152xf32>, vector<1152x128xf32>, vector<256x128xf32> -> vector<256x128xf32>
    %cst_15 = arith.constant dense<0.000000e+00> : vector<128xf32>
    %55 = vector.multi_reduction <add>, %54, %cst_15 [0] : vector<256x128xf32> to vector<128xf32>
    %56 = vector.shape_cast %55 : vector<128xf32> to vector<1x128xf32>
    %57 = arith.addf %5, %56 : vector<1x128xf32>
    %58 = arith.mulf %54, %54 : vector<256x128xf32>
    %cst_16 = arith.constant dense<0.000000e+00> : vector<128xf32>
    %59 = vector.multi_reduction <add>, %58, %cst_16 [0] : vector<256x128xf32> to vector<128xf32>
    %60 = vector.shape_cast %59 : vector<128xf32> to vector<1x128xf32>
    %61 = arith.addf %6, %60 : vector<1x128xf32>
    %62 = vector.shape_cast %54 : vector<256x128xf32> to vector<16x16x128xf32>
    %c0_17 = arith.constant 0 : index
    %63 = arith.index_cast %8 : i32 to index
    %c0_18 = arith.constant 0 : index
    %c0_19 = arith.constant 0 : index
    %64 = vector.load %arg5[%c0_17, %63, %c0_18, %c0_19] : memref<1x16x16x128xf32, #tpu.memory_space<vmem>>, vector<1x16x16x128xf32>
    %65 = vector.shape_cast %64 : vector<1x16x16x128xf32> to vector<16x16x128xf32>
    %66 = vector.shape_cast %62 : vector<16x16x128xf32> to vector<1x16x16x128xf32>
    tpu.vector_store %arg5[%c0_17, %63, %c0_18, %c0_19], %66 {strides = array<i32>} : memref<1x16x16x128xf32, #tpu.memory_space<vmem>>, vector<1x16x16x128xf32>,
    %c1_i32 = arith.constant 1 : i32
    %67 = tpu.concatenate %57, %61 in 0 : vector<1x128xf32>, vector<1x128xf32> -> vector<2x128xf32>
    %68 = vector.shape_cast %67 : vector<2x128xf32> to vector<1x2x128xf32>
    %c0_20 = arith.constant 0 : index
    %c0_21 = arith.constant 0 : index
    %c0_22 = arith.constant 0 : index
    %69 = vector.load %arg6[%c0_20, %c0_21, %c0_22] : memref<1x2x128xf32, #tpu.memory_space<vmem>>, vector<1x2x128xf32>
    tpu.vector_store %arg6[%c0_20, %c0_21, %c0_22], %68 {strides = array<i32>} : memref<1x2x128xf32, #tpu.memory_space<vmem>>, vector<1x2x128xf32>,
    return
  }
  func.func @transform_0(%arg0: i32) -> (i32, i32, i32, i32) {
    %c0_i32 = arith.constant 0 : i32
    %c0_i32_0 = arith.constant 0 : i32
    %c0_i32_1 = arith.constant 0 : i32
    %c0_i32_2 = arith.constant 0 : i32
    return %arg0, %c0_i32, %c0_i32_0, %c0_i32_1 : i32, i32, i32, i32
  }
  func.func @transform_1(%arg0: i32) -> (i32, i32) {
    %c0_i32 = arith.constant 0 : i32
    %c0_i32_0 = arith.constant 0 : i32
    %c0_i32_1 = arith.constant 0 : i32
    return %c0_i32, %c0_i32_0 : i32, i32
  }
  func.func @transform_2(%arg0: i32) -> (i32, i32) {
    %c0_i32 = arith.constant 0 : i32
    %c0_i32_0 = arith.constant 0 : i32
    %c0_i32_1 = arith.constant 0 : i32
    return %c0_i32, %c0_i32_0 : i32, i32
  }
  func.func @transform_3(%arg0: i32) -> (i32, i32) {
    %c0_i32 = arith.constant 0 : i32
    %c0_i32_0 = arith.constant 0 : i32
    %c0_i32_1 = arith.constant 0 : i32
    return %c0_i32, %c0_i32_0 : i32, i32
  }
  func.func @transform_4(%arg0: i32) -> (i32, i32, i32, i32) {
    %c0_i32 = arith.constant 0 : i32
    %c0_i32_0 = arith.constant 0 : i32
    %c0_i32_1 = arith.constant 0 : i32
    %c0_i32_2 = arith.constant 0 : i32
    return %arg0, %c0_i32, %c0_i32_0, %c0_i32_1 : i32, i32, i32, i32
  }
  func.func @transform_5(%arg0: i32) -> (i32, i32, i32) {
    %c0_i32 = arith.constant 0 : i32
    %c0_i32_0 = arith.constant 0 : i32
    %c0_i32_1 = arith.constant 0 : i32
    return %arg0, %c0_i32, %c0_i32_0 : i32, i32, i32
  }
}

</mosaic_0001>

<bundles_post_ra>
// kernel: double_conv.5
= control target key start
LH: loop header
LB: loop body
LE: loop exit
PB: predicated region body
PF: predicated region fallthrough
CT: control target
= control target key end

     0   :  { %s562_s12 = smov 0   ;;  %s564_s13 = smov 0   ;;  %s737_s0 = inlined_call_operand.vmem [shape: f32[2,16,16,128], index: 0, kind: input, shape index: {}]   ;;  %s738_s1 = inlined_call_operand.vmem [shape: f32[1,128], index: 1, kind: input, shape index: {}]   ;;  %s739_s2 = inlined_call_operand.vmem [shape: f32[1,128], index: 2, kind: input, shape index: {}]   ;;  %s740_s3 = inlined_call_operand.vmem [shape: f32[2,16,16,128], index: 3, kind: output, shape index: {}]  }
   0x1   :  { %s566_s14 = smov 0  }
   0x2 LB: > { %s25_s15 = sadd.s32 1, %s536_s13  ;;  %p483_p0 = scmp.ge.s32.totalorder %s540_s14, 1  ;;  %s540_s14 = sphi %s566_s14, %s13_s14   ;;  %s536_s13 = sphi %s564_s13, %s742_s13   ;;  %s532_s12 = sphi %s562_s12, %s741_s12  }
   0x3   : > { %p27_p1 = scmp.ge.s32.totalorder %s25_s15, 2  ;;  %p159_p2 = scmp.lt.s32.totalorder %s540_s14, 3 }
   0x5   : > { %s744_s15 = smov (%p27_p1, %s25_s15), 0  ;;  %p160_p3 = pnand %p483_p0, %p159_p2 }
   0x6   : > { %p194_p4 = scmp.lt.s32.totalorder (!%p160_p3), %s532_s12, 1 }
   0x7   : > { %163 = sbr.rel (%p160_p3) target bundleno = 54 (0x36), region = 32 }
   0xc   : > { %s746_s12 = smov (!%p194_p4, %s532_s12), 1  ;;  %v583_v0 = vld [vmem:[%s738_s1] ss:$0 sm:$0xff] }
   0xd   : > { %s490_s18 = sshll.u32 %s746_s12, 8  ;;  %v593_v1 = vld [vmem:[%s739_s2] ss:$0 sm:$0xff] }
   0xe   : > { %s588_s21 = scalar_lea.vmem %s737_s0, %s490_s18  ;;  %s616_s26 = scalar_lea.vmem %s740_s3, %s490_s18 }
   0xf   : > { %v217_v2 = vld [vmem:[%s588_s21] sm:$0xff]  ;;  %v218_v3 = vld [vmem:[%s588_s21 + $0x8] sm:$0xff]  ;;  %v219_v4 = vld [vmem:[%s588_s21 + $0x10] sm:$0xff] }
  0x10   : > { %v252_v5 = vmul.f32 %v583_v0, %v217_v2  ;;  %v253_v6 = vmul.f32 %v583_v0, %v218_v3  ;;  %v254_v7 = vmul.f32 %v583_v0, %v219_v4  ;;  %v220_v8 = vld [vmem:[%s588_s21 + $0x18] sm:$0xff]  ;;  %v221_v9 = vld [vmem:[%s588_s21 + $0x20] sm:$0xff]  ;;  %v222_v10 = vld [vmem:[%s588_s21 + $0x28] sm:$0xff] }
  0x11   : > { %v255_v11 = vmul.f32 %v583_v0, %v220_v8  ;;  %v256_v12 = vmul.f32 %v583_v0, %v221_v9  ;;  %v257_v13 = vmul.f32 %v583_v0, %v222_v10  ;;  %v223_v14 = vld [vmem:[%s588_s21 + $0x30] sm:$0xff]  ;;  %v224_v15 = vld [vmem:[%s588_s21 + $0x38] sm:$0xff]  ;;  %v225_v24 = vld [vmem:[%s588_s21 + $0x40] sm:$0xff] }
  0x12   : > { %v287_v16 = vadd.f32 %v593_v1, %v252_v5  ;;  %v288_v17 = vadd.f32 %v593_v1, %v253_v6  ;;  %v289_v18 = vadd.f32 %v593_v1, %v254_v7  ;;  %v258_v19 = vmul.f32 %v583_v0, %v223_v14  ;;  %v226_v25 = vld [vmem:[%s588_s21 + $0x48] sm:$0xff]  ;;  %v227_v26 = vld [vmem:[%s588_s21 + $0x50] sm:$0xff]  ;;  %v228_v31 = vld [vmem:[%s588_s21 + $0x58] sm:$0xff] }
  0x13   : > { %v290_v20 = vadd.f32 %v593_v1, %v255_v11  ;;  %v291_v21 = vadd.f32 %v593_v1, %v256_v12  ;;  %v292_v22 = vadd.f32 %v593_v1, %v257_v13  ;;  %v259_v23 = vmul.f32 %v583_v0, %v224_v15  ;;  %v229_v32 = vld [vmem:[%s588_s21 + $0x60] sm:$0xff]  ;;  %v230_v33 = vld [vmem:[%s588_s21 + $0x68] sm:$0xff]  ;;  %v231_v37 = vld [vmem:[%s588_s21 + $0x70] sm:$0xff] }
  0x14   : > { %v319_v27 = vmax.f32 %v287_v16, 0.0  ;;  %v320_v28 = vmax.f32 %v288_v17, 0.0  ;;  %v321_v29 = vmax.f32 %v289_v18, 0.0  ;;  %v293_v30 = vadd.f32 %v593_v1, %v258_v19  ;;  %v232_v42 = vld [vmem:[%s588_s21 + $0x78] sm:$0xff]  ;;  %v233_v54 = vld [vmem:[%s588_s21 + $0x80] sm:$0xff]  ;;  %v234_v55 = vld [vmem:[%s588_s21 + $0x88] sm:$0xff] }
  0x15   : > { %v322_v34 = vmax.f32 %v290_v20, 0.0  ;;  %v323_v35 = vmax.f32 %v291_v21, 0.0  ;;  %v294_v36 = vadd.f32 %v593_v1, %v259_v23  ;;  %v324_v38 = vmax.f32 %v292_v22, 0.0  ;;  %v235_v56 = vld [vmem:[%s588_s21 + $0x90] sm:$0xff]  ;;  %v236_v59 = vld [vmem:[%s588_s21 + $0x98] sm:$0xff]  ;;  %v237_v63 = vld [vmem:[%s588_s21 + $0xa0] sm:$0xff] }
  0x16   : > { %351 = vst [vmem:[%s616_s26] sm:$0xff] %v319_v27  ;;  %v260_v39 = vmul.f32 %v583_v0, %v225_v24  ;;  %v261_v40 = vmul.f32 %v583_v0, %v226_v25  ;;  %v262_v41 = vmul.f32 %v583_v0, %v227_v26  ;;  %v325_v43 = vmax.f32 %v293_v30, 0.0  ;;  %v238_v6 = vld [vmem:[%s588_s21 + $0xa8] sm:$0xff]  ;;  %v239_v10 = vld [vmem:[%s588_s21 + $0xb0] sm:$0xff]  ;;  %v240_v14 = vld [vmem:[%s588_s21 + $0xb8] sm:$0xff] }
  0x17   : > { %352 = vst [vmem:[%s616_s26 + $0x8] sm:$0xff] %v320_v28  ;;  %v263_v44 = vmul.f32 %v583_v0, %v228_v31  ;;  %v264_v45 = vmul.f32 %v583_v0, %v229_v32  ;;  %v265_v46 = vmul.f32 %v583_v0, %v230_v33  ;;  %v266_v50 = vmul.f32 %v583_v0, %v231_v37  ;;  %v241_v18 = vld [vmem:[%s588_s21 + $0xc0] sm:$0xff]  ;;  %v242_v22 = vld [vmem:[%s588_s21 + $0xc8] sm:$0xff]  ;;  %v243_v26 = vld [vmem:[%s588_s21 + $0xd0] sm:$0xff] }
  0x18   : > { %353 = vst [vmem:[%s616_s26 + $0x10] sm:$0xff] %v321_v29  ;;  %v295_v47 = vadd.f32 %v593_v1, %v260_v39  ;;  %v296_v48 = vadd.f32 %v593_v1, %v261_v40  ;;  %v297_v49 = vadd.f32 %v593_v1, %v262_v41  ;;  %v326_v51 = vmax.f32 %v294_v36, 0.0  ;;  %v244_v30 = vld [vmem:[%s588_s21 + $0xd8] sm:$0xff] }
  0x19   : > { %354 = vst [vmem:[%s616_s26 + $0x18] sm:$0xff] %v322_v34  ;;  %v298_v52 = vadd.f32 %v593_v1, %v263_v44  ;;  %v267_v53 = vmul.f32 %v583_v0, %v232_v42  ;;  %v299_v58 = vadd.f32 %v593_v1, %v264_v45  ;;  %v300_v62 = vadd.f32 %v593_v1, %v265_v46  ;;  %v245_v34 = vld [vmem:[%s588_s21 + $0xe0] sm:$0xff]  ;;  %v247_v42 = vld [vmem:[%s588_s21 + $0xf0] sm:$0xff]  ;;  %v248_v46 = vld [vmem:[%s588_s21 + $0xf8] sm:$0xff] }
  0x1a   : > { %355 = vst [vmem:[%s616_s26 + $0x20] sm:$0xff] %v323_v35  ;;  %v327_v57 = vmax.f32 %v295_v47, 0.0  ;;  %v328_v60 = vmax.f32 %v296_v48, 0.0  ;;  %v329_v61 = vmax.f32 %v297_v49, 0.0  ;;  %v301_v2 = vadd.f32 %v593_v1, %v266_v50 }
  0x1b   : > { %356 = vst [vmem:[%s616_s26 + $0x28] sm:$0xff] %v324_v38  ;;  %v268_v3 = vmul.f32 %v583_v0, %v233_v54  ;;  %v269_v4 = vmul.f32 %v583_v0, %v234_v55  ;;  %v270_v5 = vmul.f32 %v583_v0, %v235_v56  ;;  %v330_v7 = vmax.f32 %v298_v52, 0.0  ;;  %v246_v38 = vld [vmem:[%s588_s21 + $0xe8] sm:$0xff] }
  0x1c   : > { %357 = vst [vmem:[%s616_s26 + $0x30] sm:$0xff] %v325_v43  ;;  %v302_v8 = vadd.f32 %v593_v1, %v267_v53  ;;  %v271_v9 = vmul.f32 %v583_v0, %v236_v59  ;;  %v331_v11 = vmax.f32 %v299_v58, 0.0  ;;  %v272_v13 = vmul.f32 %v583_v0, %v237_v63 }
  0x1d   : > { %358 = vst [vmem:[%s616_s26 + $0x38] sm:$0xff] %v326_v51  ;;  %v303_v12 = vadd.f32 %v593_v1, %v268_v3  ;;  %v332_v15 = vmax.f32 %v300_v62, 0.0  ;;  %v304_v16 = vadd.f32 %v593_v1, %v269_v4  ;;  %v273_v17 = vmul.f32 %v583_v0, %v238_v6 }
  0x1e   : > { %359 = vst [vmem:[%s616_s26 + $0x40] sm:$0xff] %v327_v57  ;;  %v333_v19 = vmax.f32 %v301_v2, 0.0  ;;  %v305_v20 = vadd.f32 %v593_v1, %v270_v5  ;;  %v274_v21 = vmul.f32 %v583_v0, %v239_v10  ;;  %v334_v23 = vmax.f32 %v302_v8, 0.0 }
  0x1f   : > { %360 = vst [vmem:[%s616_s26 + $0x48] sm:$0xff] %v328_v60  ;;  %v306_v24 = vadd.f32 %v593_v1, %v271_v9  ;;  %v275_v25 = vmul.f32 %v583_v0, %v240_v14  ;;  %v335_v27 = vmax.f32 %v303_v12, 0.0  ;;  %v307_v28 = vadd.f32 %v593_v1, %v272_v13 }
  0x20   : > { %361 = vst [vmem:[%s616_s26 + $0x50] sm:$0xff] %v329_v61  ;;  %v276_v29 = vmul.f32 %v583_v0, %v241_v18  ;;  %v336_v31 = vmax.f32 %v304_v16, 0.0  ;;  %v308_v32 = vadd.f32 %v593_v1, %v273_v17  ;;  %v277_v33 = vmul.f32 %v583_v0, %v242_v22 }
  0x21   : > { %362 = vst [vmem:[%s616_s26 + $0x58] sm:$0xff] %v330_v7  ;;  %v337_v35 = vmax.f32 %v305_v20, 0.0  ;;  %v309_v36 = vadd.f32 %v593_v1, %v274_v21  ;;  %v278_v37 = vmul.f32 %v583_v0, %v243_v26  ;;  %v338_v39 = vmax.f32 %v306_v24, 0.0 }
  0x22   : > { %363 = vst [vmem:[%s616_s26 + $0x60] sm:$0xff] %v331_v11  ;;  %v310_v40 = vadd.f32 %v593_v1, %v275_v25  ;;  %v279_v41 = vmul.f32 %v583_v0, %v244_v30  ;;  %v339_v43 = vmax.f32 %v307_v28, 0.0  ;;  %v311_v44 = vadd.f32 %v593_v1, %v276_v29 }
  0x23   : > { %364 = vst [vmem:[%s616_s26 + $0x68] sm:$0xff] %v332_v15  ;;  %v280_v45 = vmul.f32 %v583_v0, %v245_v34  ;;  %v340_v47 = vmax.f32 %v308_v32, 0.0  ;;  %v312_v48 = vadd.f32 %v593_v1, %v277_v33  ;;  %v281_v49 = vmul.f32 %v583_v0, %v246_v38 }
  0x24   : > { %365 = vst [vmem:[%s616_s26 + $0x70] sm:$0xff] %v333_v19  ;;  %v341_v50 = vmax.f32 %v309_v36, 0.0  ;;  %v313_v51 = vadd.f32 %v593_v1, %v278_v37  ;;  %v282_v52 = vmul.f32 %v583_v0, %v247_v42  ;;  %v342_v53 = vmax.f32 %v310_v40, 0.0 }
  0x25   : > { %366 = vst [vmem:[%s616_s26 + $0x78] sm:$0xff] %v334_v23  ;;  %v314_v54 = vadd.f32 %v593_v1, %v279_v41  ;;  %v283_v55 = vmul.f32 %v583_v0, %v248_v46  ;;  %v343_v56 = vmax.f32 %v311_v44, 0.0  ;;  %v315_v57 = vadd.f32 %v593_v1, %v280_v45 }
  0x26   : > { %367 = vst [vmem:[%s616_s26 + $0x80] sm:$0xff] %v335_v27  ;;  %v344_v58 = vmax.f32 %v312_v48, 0.0  ;;  %v316_v59 = vadd.f32 %v593_v1, %v281_v49  ;;  %v345_v60 = vmax.f32 %v313_v51, 0.0  ;;  %v317_v61 = vadd.f32 %v593_v1, %v282_v52 }
  0x27   : > { %368 = vst [vmem:[%s616_s26 + $0x88] sm:$0xff] %v336_v31  ;;  %v346_v0 = vmax.f32 %v314_v54, 0.0  ;;  %v318_v62 = vadd.f32 %v593_v1, %v283_v55  ;;  %v347_v63 = vmax.f32 %v315_v57, 0.0 }
  0x28   : > { %369 = vst [vmem:[%s616_s26 + $0x90] sm:$0xff] %v337_v35  ;;  %v348_v2 = vmax.f32 %v316_v59, 0.0  ;;  %v349_v3 = vmax.f32 %v317_v61, 0.0 }
  0x29   : > { %370 = vst [vmem:[%s616_s26 + $0x98] sm:$0xff] %v338_v39  ;;  %v350_v4 = vmax.f32 %v318_v62, 0.0 }
  0x2a   : > { %371 = vst [vmem:[%s616_s26 + $0xa0] sm:$0xff] %v339_v43 }
  0x2b   : > { %372 = vst [vmem:[%s616_s26 + $0xa8] sm:$0xff] %v340_v47 }
  0x2c   : > { %373 = vst [vmem:[%s616_s26 + $0xb0] sm:$0xff] %v341_v50 }
  0x2d   : > { %374 = vst [vmem:[%s616_s26 + $0xb8] sm:$0xff] %v342_v53 }
  0x2e   : > { %375 = vst [vmem:[%s616_s26 + $0xc0] sm:$0xff] %v343_v56 }
  0x2f   : > { %376 = vst [vmem:[%s616_s26 + $0xc8] sm:$0xff] %v344_v58 }
  0x30   : > { %377 = vst [vmem:[%s616_s26 + $0xd0] sm:$0xff] %v345_v60 }
  0x31   : > { %378 = vst [vmem:[%s616_s26 + $0xd8] sm:$0xff] %v346_v0 }
  0x32   : > { %379 = vst [vmem:[%s616_s26 + $0xe0] sm:$0xff] %v347_v63 }
  0x33   : > { %380 = vst [vmem:[%s616_s26 + $0xe8] sm:$0xff] %v348_v2 }
  0x34   : > { %381 = vst [vmem:[%s616_s26 + $0xf0] sm:$0xff] %v349_v3 }
  0x35   : > { %382 = vst [vmem:[%s616_s26 + $0xf8] sm:$0xff] %v350_v4 }
  0x36 PF: > { %s13_s14 = sadd.s32 1, %s540_s14   ;;  %s741_s12 = smov %s536_s13 }
  0x37   : > { %p10_p5 = scmp.ge.s32.totalorder %s13_s14, 4   ;;  %s742_s13 = smov %s744_s15 }
  0x39   :  { %12 = sbr.rel (!%p10_p5) target bundleno = 2 (0x2), region = 62 }

// kernel: double_conv.3
= control target key start
LH: loop header
LB: loop body
LE: loop exit
PB: predicated region body
PF: predicated region fallthrough
CT: control target
= control target key end

     0   :  { %s2143_s12 = smov 0   ;;  %s3575_s0 = inlined_call_operand.vmem [shape: f32[2,18,18,128], index: 0, kind: input, shape index: {}]   ;;  %s3576_s1 = inlined_call_operand.vmem [shape: f32[1152,128], index: 1, kind: input, shape index: {}]   ;;  %s3577_s2 = inlined_call_operand.vmem [shape: f32[2,18,18,128], index: 2, kind: output, shape index: {0}]   ;;  %s3578_s3 = inlined_call_operand.vmem [shape: f32[2,2,128], index: 3, kind: output, shape index: {1}]  }
   0x1 LB: > { %s1983_s13 = sadd.s32 4294967295, %s2120_s12   ;;  %p1987_p0 = scmp.ge.s32.totalorder %s2120_s12, 1  ;;  %s2120_s12 = sphi %s2143_s12, %s14_s12  }
   0x2   : > { %p140_p1 = scmp.lt.s32.totalorder %s2120_s12, 3 }
   0x4   : > { %p141_p2 = pnand %p1987_p0, %p140_p1 }
   0x6   : > { %144 = sbr.rel (%p141_p2) target bundleno = 767 (0x2ff), region = 28 }
   0xb   : > { %v197_v0 = vld [vmem:[%s3576_s1 + $0x78] sm:$0xff]  ;;  %v196_v1 = vld [vmem:[%s3576_s1 + $0x70] sm:$0xff]  ;;  %v195_v2 = vld [vmem:[%s3576_s1 + $0x68] sm:$0xff]  ;;  %p168_p3 = scmp.lt.s32.totalorder %s1983_s13, 1  ;;  %vm473_vm0 = vcmask 1046528   ;;  %vm586_vm1 = vcmask 1045504  }
   0xc   : > { %2028 = vmatpush.msra.mxu1 %v197_v0  ;;  %2029 = vmatpush.msra.mxu2 %v197_v0  ;;  %v194_v3 = vld [vmem:[%s3576_s1 + $0x60] sm:$0xff]  ;;  %v193_v4 = vld [vmem:[%s3576_s1 + $0x58] sm:$0xff]  ;;  %v192_v5 = vld [vmem:[%s3576_s1 + $0x50] sm:$0xff]  ;;  %vm1893_vm2 = vcmask 1040384  }
   0xd   : > { %2030 = vmatpush.msra.mxu3 %v197_v0  ;;  %733 = vmatpush.msra.mxu0 %v197_v0  ;;  %v191_v6 = vld [vmem:[%s3576_s1 + $0x48] sm:$0xff]  ;;  %v190_v7 = vld [vmem:[%s3576_s1 + $0x40] sm:$0xff]  ;;  %v189_v8 = vld [vmem:[%s3576_s1 + $0x38] sm:$0xff]  ;;  %s3724_s13 = smov (!%p168_p3, %s1983_s13), 1 }
   0xe   : > { %2031 = vmatpush.msra.mxu1 %v196_v1  ;;  %2032 = vmatpush.msra.mxu2 %v196_v1  ;;  %v188_v9 = vld [vmem:[%s3576_s1 + $0x30] sm:$0xff]  ;;  %v187_v10 = vld [vmem:[%s3576_s1 + $0x28] sm:$0xff]  ;;  %v186_v11 = vld [vmem:[%s3576_s1 + $0x20] sm:$0xff]  ;;  %s2076_s15 = smul.u32 432, %s3724_s13 }
   0xf   : > { %2033 = vmatpush.msra.mxu3 %v196_v1  ;;  %734 = vmatpush.msra.mxu0 %v196_v1  ;;  %v185_v12 = vld [vmem:[%s3576_s1 + $0x18] sm:$0xff]  ;;  %v184_v13 = vld [vmem:[%s3576_s1 + $0x10] sm:$0xff]  ;;  %v183_v14 = vld [vmem:[%s3576_s1 + $0x8] sm:$0xff] }
  0x10   : > { %2034 = vmatpush.msra.mxu1 %v195_v2  ;;  %2035 = vmatpush.msra.mxu2 %v195_v2  ;;  %s2208_s22 = scalar_lea.vmem %s3575_s0, %s2076_s15  ;;  %v182_v15 = vld [vmem:[%s3576_s1] sm:$0xff]  ;;  %v229_v18 = vld [vmem:[%s3576_s1 + $0x178] sm:$0xff]  ;;  %v228_v22 = vld [vmem:[%s3576_s1 + $0x170] sm:$0xff]  ;;  %s3245_s30 = scalar_lea.vmem %s3577_s2, %s2076_s15 }
  0x11   : > { %2036 = vmatpush.msra.mxu3 %v195_v2  ;;  %735 = vmatpush.msra.mxu0 %v195_v2  ;;  %v2214_v16 = vld [vmem:[%s2208_s22 + $0x60] sm:$0xff]  ;;  %v213_v20 = vld [vmem:[%s3576_s1 + $0xf8] sm:$0xff]  ;;  %v212_v23 = vld [vmem:[%s3576_s1 + $0xf0] sm:$0xff]  ;;  %s1990_s15 = sshll.u32 %s3724_s13, 1 }
  0x12   : > { %2037 = vmatpush.msra.mxu1 %v194_v3  ;;  %2038 = vmatpush.msra.mxu2 %v194_v3  ;;  %v2217_v17 = vld [vmem:[%s2208_s22 + $0xc0] sm:$0xff]  ;;  %v245_v21 = vld [vmem:[%s3576_s1 + $0x1f8] sm:$0xff]  ;;  %v244_v24 = vld [vmem:[%s3576_s1 + $0x1f0] sm:$0xff]  ;;  %s181_s5 = scalar_lea.vmem %s3578_s3, %s1990_s15 }
  0x13   : > { %2039 = vmatpush.msra.mxu3 %v194_v3  ;;  %736 = vmatpush.msra.mxu0 %v194_v3  ;;  %v407_v19 = vld [vmem:[%s2208_s22 + $0x120] sm:$0xff]  ;;  %v227_v25 = vld [vmem:[%s3576_s1 + $0x168] sm:$0xff]  ;;  %v261_v29 = vld [vmem:[%s3576_s1 + $0x278] sm:$0xff] }
  0x14   : > { %2040 = vmatpush.msra.mxu1 %v193_v4  ;;  %2041 = vmatpush.msra.mxu2 %v193_v4  ;;  %v2244_v26 = vld [vmem:[%s2208_s22] sm:$0xff]  ;;  %v211_v27 = vld [vmem:[%s3576_s1 + $0xe8] sm:$0xff]  ;;  %v260_v35 = vld [vmem:[%s3576_s1 + $0x270] sm:$0xff] }
  0x15   : > { %2042 = vmatpush.msra.mxu3 %v193_v4  ;;  %737 = vmatpush.msra.mxu0 %v193_v4  ;;  %v243_v28 = vld [vmem:[%s3576_s1 + $0x1e8] sm:$0xff]  ;;  %v226_v32 = vld [vmem:[%s3576_s1 + $0x160] sm:$0xff]  ;;  %v225_v37 = vld [vmem:[%s3576_s1 + $0x158] sm:$0xff] }
  0x16   : > { %2043 = vmatpush.msra.mxu1 %v192_v5  ;;  %2044 = vmatpush.msra.mxu2 %v192_v5  ;;  %v2256_v30 = vld [vmem:[%s2208_s22 + $0x68] sm:$0xff]  ;;  %v242_v33 = vld [vmem:[%s3576_s1 + $0x1e0] sm:$0xff]  ;;  %v241_v38 = vld [vmem:[%s3576_s1 + $0x1d8] sm:$0xff] }
  0x17   : > { %2045 = vmatpush.msra.mxu3 %v192_v5  ;;  %738 = vmatpush.msra.mxu0 %v192_v5  ;;  %v2259_v31 = vld [vmem:[%s2208_s22 + $0xc8] sm:$0xff]  ;;  %v210_v36 = vld [vmem:[%s3576_s1 + $0xe0] sm:$0xff]  ;;  %v209_v40 = vld [vmem:[%s3576_s1 + $0xd8] sm:$0xff] }
  0x18   : > { %2046 = vmatpush.msra.mxu1 %v191_v6  ;;  %2047 = vmatpush.msra.mxu2 %v191_v6  ;;  %v408_v34 = vld [vmem:[%s2208_s22 + $0x128] sm:$0xff]  ;;  %v224_v41 = vld [vmem:[%s3576_s1 + $0x150] sm:$0xff]  ;;  %v258_v44 = vld [vmem:[%s3576_s1 + $0x260] sm:$0xff] }
  0x19   : > { %2048 = vmatpush.msra.mxu3 %v191_v6  ;;  %739 = vmatpush.msra.mxu0 %v191_v6  ;;  %v259_v39 = vld [vmem:[%s3576_s1 + $0x268] sm:$0xff]  ;;  %v240_v43 = vld [vmem:[%s3576_s1 + $0x1d0] sm:$0xff]  ;;  %v2305_v46 = vld [vmem:[%s2208_s22 + $0x78] sm:$0xff] }
  0x1a   : > { %2049 = vmatpush.msra.mxu1 %v190_v7  ;;  %2050 = vmatpush.msra.mxu2 %v190_v7  ;;  %v2293_v42 = vld [vmem:[%s2208_s22 + $0x8] sm:$0xff]  ;;  %v208_v45 = vld [vmem:[%s3576_s1 + $0xd0] sm:$0xff]  ;;  %v2308_v47 = vld [vmem:[%s2208_s22 + $0xd8] sm:$0xff] }
  0x1b   : > { %2051 = vmatpush.msra.mxu3 %v190_v7  ;;  %740 = vmatpush.msra.mxu0 %v190_v7  ;;  %v223_v48 = vld [vmem:[%s3576_s1 + $0x148] sm:$0xff]  ;;  %v410_v50 = vld [vmem:[%s2208_s22 + $0x138] sm:$0xff]  ;;  %v222_v53 = vld [vmem:[%s3576_s1 + $0x140] sm:$0xff] }
  0x1c   : > { %2052 = vmatpush.msra.mxu1 %v189_v8  ;;  %2053 = vmatpush.msra.mxu2 %v189_v8  ;;  %v239_v49 = vld [vmem:[%s3576_s1 + $0x1c8] sm:$0xff]  ;;  %v257_v51 = vld [vmem:[%s3576_s1 + $0x258] sm:$0xff]  ;;  %v238_v54 = vld [vmem:[%s3576_s1 + $0x1c0] sm:$0xff] }
  0x1d   : > { %2054 = vmatpush.msra.mxu3 %v189_v8  ;;  %741 = vmatpush.msra.mxu0 %v189_v8  ;;  %v207_v52 = vld [vmem:[%s3576_s1 + $0xc8] sm:$0xff]  ;;  %v256_v55 = vld [vmem:[%s3576_s1 + $0x250] sm:$0xff]  ;;  %v206_v56 = vld [vmem:[%s3576_s1 + $0xc0] sm:$0xff] }
  0x1e   : > { %2055 = vmatpush.msra.mxu1 %v188_v9  ;;  %2056 = vmatpush.msra.mxu2 %v188_v9  ;;  %v221_v57 = vld [vmem:[%s3576_s1 + $0x138] sm:$0xff]  ;;  %v255_v60 = vld [vmem:[%s3576_s1 + $0x248] sm:$0xff]  ;;  %v2354_v62 = vld [vmem:[%s2208_s22 + $0x80] sm:$0xff] }
  0x1f   : > { %2057 = vmatpush.msra.mxu3 %v188_v9  ;;  %742 = vmatpush.msra.mxu0 %v188_v9  ;;  %v2342_v58 = vld [vmem:[%s2208_s22 + $0x18] sm:$0xff]  ;;  %v2357_v63 = vld [vmem:[%s2208_s22 + $0xe0] sm:$0xff]  ;;  %v220_v0 = vld [vmem:[%s3576_s1 + $0x130] sm:$0xff] }
  0x20   : > { %2058 = vmatpush.msra.mxu1 %v187_v10  ;;  %2059 = vmatpush.msra.mxu2 %v187_v10  ;;  %v237_v59 = vld [vmem:[%s3576_s1 + $0x1b8] sm:$0xff]  ;;  %v236_v1 = vld [vmem:[%s3576_s1 + $0x1b0] sm:$0xff]  ;;  %v411_v2 = vld [vmem:[%s2208_s22 + $0x140] sm:$0xff] }
  0x21   : > { %2060 = vmatpush.msra.mxu3 %v187_v10  ;;  %743 = vmatpush.msra.mxu0 %v187_v10  ;;  %v205_v61 = vld [vmem:[%s3576_s1 + $0xb8] sm:$0xff]  ;;  %v254_v3 = vld [vmem:[%s3576_s1 + $0x240] sm:$0xff]  ;;  %v204_v4 = vld [vmem:[%s3576_s1 + $0xb0] sm:$0xff] }
  0x22   : > { %2061 = vmatpush.msra.mxu1 %v186_v11  ;;  %2062 = vmatpush.msra.mxu2 %v186_v11  ;;  %v219_v5 = vld [vmem:[%s3576_s1 + $0x128] sm:$0xff]  ;;  %v253_v7 = vld [vmem:[%s3576_s1 + $0x238] sm:$0xff]  ;;  %v218_v9 = vld [vmem:[%s3576_s1 + $0x120] sm:$0xff] }
  0x23   : > { %2063 = vmatpush.msra.mxu3 %v186_v11  ;;  %744 = vmatpush.msra.mxu0 %v186_v11  ;;  %v235_v6 = vld [vmem:[%s3576_s1 + $0x1a8] sm:$0xff]  ;;  %v2391_v10 = vld [vmem:[%s2208_s22 + $0x20] sm:$0xff] }
  0x24   : > { %2064 = vmatpush.msra.mxu1 %v185_v12  ;;  %2065 = vmatpush.msra.mxu2 %v185_v12  ;;  %v203_v8 = vld [vmem:[%s3576_s1 + $0xa8] sm:$0xff]  ;;  %v234_v11 = vld [vmem:[%s3576_s1 + $0x1a0] sm:$0xff] }
  0x25   : > { %2066 = vmatpush.msra.mxu3 %v185_v12  ;;  %745 = vmatpush.msra.mxu0 %v185_v12  ;;  %v252_v12 = vld [vmem:[%s3576_s1 + $0x230] sm:$0xff] }
  0x26   : > { %2067 = vmatpush.msra.mxu1 %v184_v13  ;;  %2068 = vmatpush.msra.mxu2 %v184_v13 }
  0x27   : > { %2069 = vmatpush.msra.mxu3 %v184_v13  ;;  %746 = vmatpush.msra.mxu0 %v184_v13  ;;  %v202_v13 = vld [vmem:[%s3576_s1 + $0xa0] sm:$0xff] }
  0x28   : > { %2070 = vmatpush.msra.mxu1 %v183_v14  ;;  %2071 = vmatpush.msra.mxu2 %v183_v14 }
  0x29   : > { %2072 = vmatpush.msra.mxu3 %v183_v14  ;;  %747 = vmatpush.msra.mxu0 %v183_v14  ;;  %v2403_v14 = vld [vmem:[%s2208_s22 + $0x90] sm:$0xff] }
  0x2a   : > { %2073 = vmatpush.msra.mxu1 %v182_v15  ;;  %2074 = vmatpush.msra.mxu2 %v182_v15 }
  0x2b   : > { %773 = vmatmul.f32.vlgmr.msra.gmra.mxu1 %v2214_v16  ;;  %797 = vmatmul.f32.vlgmr.msra.gmra.mxu2 %v2217_v17 }
  0x2c   : > { %959 = vmatpush.msrb.mxu2 %v229_v18  ;;  %2075 = vmatpush.msra.mxu3 %v182_v15  ;;  %v217_v18 = vld [vmem:[%s3576_s1 + $0x118] sm:$0xff] }
  0x2d   : > { %821 = vmatmul.f32.vlgmr.msra.gmra.mxu3 %v407_v19  ;;  %846 = vmatpush.msrb.mxu1 %v213_v20  ;;  %v233_v19 = vld [vmem:[%s3576_s1 + $0x198] sm:$0xff]  ;;  %v413_v20 = vld [vmem:[%s2208_s22 + $0x150] sm:$0xff] }
  0x2e   : > { %1072 = vmatpush.msrb.mxu3 %v245_v21  ;;  %960 = vmatpush.msrb.mxu2 %v228_v22  ;;  %v251_v21 = vld [vmem:[%s3576_s1 + $0x228] sm:$0xff]  ;;  %v201_v22 = vld [vmem:[%s3576_s1 + $0x98] sm:$0xff] }
  0x2f   : > { %847 = vmatpush.msrb.mxu1 %v212_v23  ;;  %748 = vmatpush.msra.mxu0 %v182_v15  ;;  %v2406_v15 = vld [vmem:[%s2208_s22 + $0xf0] sm:$0xff] }
  0x30   : > { %1073 = vmatpush.msrb.mxu3 %v244_v24  ;;  %961 = vmatpush.msrb.mxu2 %v227_v25  ;;  %v216_v23 = vld [vmem:[%s3576_s1 + $0x110] sm:$0xff]  ;;  %v250_v25 = vld [vmem:[%s3576_s1 + $0x220] sm:$0xff] }
  0x31   : > { %749 = vmatmul.f32.vlgmr.msra.gmra.mxu0 %v2244_v26  ;;  %848 = vmatpush.msrb.mxu1 %v211_v27  ;;  %v232_v24 = vld [vmem:[%s3576_s1 + $0x190] sm:$0xff] }
  0x32   : > { %1074 = vmatpush.msrb.mxu3 %v243_v28  ;;  %1185 = vmatpush.msrb.mxu0 %v261_v29  ;;  %v200_v27 = vld [vmem:[%s3576_s1 + $0x90] sm:$0xff]  ;;  %v215_v28 = vld [vmem:[%s3576_s1 + $0x108] sm:$0xff] }
  0x33   : > { %776 = vmatmul.f32.gmra.mxu1 %v2256_v30  ;;  %800 = vmatmul.f32.gmra.mxu2 %v2259_v31  ;;  %v2440_v29 = vld [vmem:[%s2208_s22 + $0x30] sm:$0xff] }
  0x34   : > { %962 = vmatpush.msrb.mxu2 %v226_v32  ;;  %1075 = vmatpush.msrb.mxu3 %v242_v33  ;;  %v231_v32 = vld [vmem:[%s3576_s1 + $0x188] sm:$0xff]  ;;  %v249_v33 = vld [vmem:[%s3576_s1 + $0x218] sm:$0xff] }
  0x35   : > { %824 = vmatmul.f32.gmra.mxu3 %v408_v34  ;;  %1186 = vmatpush.msrb.mxu0 %v260_v35  ;;  %v199_v34 = vld [vmem:[%s3576_s1 + $0x88] sm:$0xff]  ;;  %v2452_v35 = vld [vmem:[%s2208_s22 + $0x98] sm:$0xff] }
  0x36   : > { %849 = vmatpush.msrb.mxu1 %v210_v36  ;;  %963 = vmatpush.msrb.mxu2 %v225_v37  ;;  %v2455_v36 = vld [vmem:[%s2208_s22 + $0xf8] sm:$0xff]  ;;  %v214_v37 = vld [vmem:[%s3576_s1 + $0x100] sm:$0xff] }
  0x37   : > { %1076 = vmatpush.msrb.mxu3 %v241_v38  ;;  %1187 = vmatpush.msrb.mxu0 %v259_v39  ;;  %v230_v38 = vld [vmem:[%s3576_s1 + $0x180] sm:$0xff]  ;;  %v414_v39 = vld [vmem:[%s2208_s22 + $0x158] sm:$0xff] }
  0x38   : > { %850 = vmatpush.msrb.mxu1 %v209_v40  ;;  %964 = vmatpush.msrb.mxu2 %v224_v41  ;;  %v248_v40 = vld [vmem:[%s3576_s1 + $0x210] sm:$0xff]  ;;  %v198_v41 = vld [vmem:[%s3576_s1 + $0x80] sm:$0xff] }
  0x39   : > { %752 = vmatmul.f32.gmra.mxu0 %v2293_v42  ;;  %1077 = vmatpush.msrb.mxu3 %v240_v43  ;;  %v293_v43 = vld [vmem:[%s3576_s1 + $0x378] sm:$0xff] }
  0x3a   : > { %1188 = vmatpush.msrb.mxu0 %v258_v44  ;;  %851 = vmatpush.msrb.mxu1 %v208_v45  ;;  %v247_v44 = vld [vmem:[%s3576_s1 + $0x208] sm:$0xff]  ;;  %v309_v45 = vld [vmem:[%s3576_s1 + $0x3f8] sm:$0xff] }
  0x3b   : > { %779 = vmatmul.f32.gmra.mxu1 %v2305_v46  ;;  %803 = vmatmul.f32.gmra.mxu2 %v2308_v47 }
  0x3c   : > { %965 = vmatpush.msrb.mxu2 %v223_v48  ;;  %1078 = vmatpush.msrb.mxu3 %v239_v49  ;;  %v277_v48 = vld [vmem:[%s3576_s1 + $0x2f8] sm:$0xff] }
  0x3d   : > { %827 = vmatmul.f32.gmra.mxu3 %v410_v50  ;;  %1189 = vmatpush.msrb.mxu0 %v257_v51  ;;  %v2486_v49 = vld [vmem:[%s2208_s22 + $0x38] sm:$0xff]  ;;  %v246_v50 = vld [vmem:[%s3576_s1 + $0x200] sm:$0xff]  ;;  %v2492_v51 = vld [vmem:[%s2208_s22 + $0xa8] sm:$0xff] }
  0x3e   : > { %852 = vmatpush.msrb.mxu1 %v207_v52  ;;  %966 = vmatpush.msrb.mxu2 %v222_v53  ;;  %v2495_v52 = vld [vmem:[%s2208_s22 + $0x108] sm:$0xff]  ;;  %v325_v53 = vld [vmem:[%s3576_s1 + $0x478] sm:$0xff] }
  0x3f   : > { %1079 = vmatpush.msrb.mxu3 %v238_v54  ;;  %1190 = vmatpush.msrb.mxu0 %v256_v55  ;;  %v416_v54 = vld [vmem:[%s2208_s22 + $0x168] sm:$0xff]  ;;  %v292_v55 = vld [vmem:[%s3576_s1 + $0x370] sm:$0xff] }
  0x40   : > { %853 = vmatpush.msrb.mxu1 %v206_v56  ;;  %967 = vmatpush.msrb.mxu2 %v221_v57  ;;  %v308_v56 = vld [vmem:[%s3576_s1 + $0x3f0] sm:$0xff] }
  0x41   : > { %755 = vmatmul.f32.gmra.mxu0 %v2342_v58  ;;  %1080 = vmatpush.msrb.mxu3 %v237_v59  ;;  %v276_v57 = vld [vmem:[%s3576_s1 + $0x2f0] sm:$0xff]  ;;  %v2514_v59 = vld [vmem:[%s2208_s22 + $0x48] sm:$0xff] }
  0x42   : > { %1191 = vmatpush.msrb.mxu0 %v255_v60  ;;  %854 = vmatpush.msrb.mxu1 %v205_v61  ;;  %v2517_v60 = vld [vmem:[%s2208_s22 + $0xb0] sm:$0xff] }
  0x43   : > { %782 = vmatmul.f32.gmra.mxu1 %v2354_v62  ;;  %806 = vmatmul.f32.gmra.mxu2 %v2357_v63  ;;  %v2520_v61 = vld [vmem:[%s2208_s22 + $0x110] sm:$0xff] }
  0x44   : > { %968 = vmatpush.msrb.mxu2 %v220_v0  ;;  %1081 = vmatpush.msrb.mxu3 %v236_v1  ;;  %v417_v0 = vld [vmem:[%s2208_s22 + $0x170] sm:$0xff]  ;;  %v474_v1 = vrot.slane %v2244_v26, 1 }
  0x45   : > { %830 = vmatmul.f32.gmra.mxu3 %v411_v2  ;;  %1192 = vmatpush.msrb.mxu0 %v254_v3  ;;  %v587_v2 = vrot.slane %v2244_v26, 2  ;;  %v475_v3 = vrot.slane %v2293_v42, 1  ;;  %v373_v26 = vld [vmem:[%s2208_s22 + $0x10] sm:$0x3] }
  0x46   : > { %855 = vmatpush.msrb.mxu1 %v204_v4  ;;  %969 = vmatpush.msrb.mxu2 %v219_v5  ;;  %v588_v4 = vrot.slane %v2293_v42, 2  ;;  %v324_v5 = vld [vmem:[%s3576_s1 + $0x470] sm:$0xff]  ;;  %v479_v42 = vrot.slane %v2342_v58, 1 }
  0x47   : > { %1082 = vmatpush.msrb.mxu3 %v235_v6  ;;  %1193 = vmatpush.msrb.mxu0 %v253_v7  ;;  %v2534_v6 = vld [vmem:[%s2208_s22 + $0x50] sm:$0xff]  ;;  %v476_v7 = vsel %vm473_vm0, %v474_v1, %v475_v3  ;;  %v273_v1 = vld [vmem:[%s3576_s1 + $0x2d8] sm:$0xff] }
  0x48   : > { %856 = vmatpush.msrb.mxu1 %v203_v8  ;;  %970 = vmatpush.msrb.mxu2 %v218_v9  ;;  %v589_v8 = vsel %vm586_vm1, %v587_v2, %v588_v4  ;;  %v480_v9 = vrot.slane %v2391_v10, 1  ;;  %v382_v2 = vld [vmem:[%s2208_s22 + $0x58] sm:$0x3] }
  0x49   : > { %758 = vmatmul.f32.gmra.mxu0 %v2391_v10  ;;  %1083 = vmatpush.msrb.mxu3 %v234_v11  ;;  %v291_v11 = vld [vmem:[%s3576_s1 + $0x368] sm:$0xff] }
  0x4a   : > { %1194 = vmatpush.msrb.mxu0 %v252_v12  ;;  %857 = vmatpush.msrb.mxu1 %v202_v13  ;;  %v477_v12 = vrot.slane %v373_v26, 1  ;;  %v590_v13 = vrot.slane %v373_v26, 2 }
  0x4b   : > { %785 = vmatmul.f32.gmra.mxu1 %v2403_v14  ;;  %809 = vmatmul.f32.gmra.mxu2 %v2406_v15 }
  0x4c   : > { %971 = vmatpush.msrb.mxu2 %v217_v18  ;;  %1084 = vmatpush.msrb.mxu3 %v233_v19  ;;  %v307_v18 = vld [vmem:[%s3576_s1 + $0x3e8] sm:$0xff] }
  0x4d   : > { %833 = vmatmul.f32.gmra.mxu3 %v413_v20  ;;  %1195 = vmatpush.msrb.mxu0 %v251_v21  ;;  %v275_v19 = vld [vmem:[%s3576_s1 + $0x2e8] sm:$0xff]  ;;  %v481_v20 = vsel %vm473_vm0, %v479_v42, %v480_v9 }
  0x4e   : > { %858 = vmatpush.msrb.mxu1 %v201_v22  ;;  %972 = vmatpush.msrb.mxu2 %v216_v23  ;;  %v376_v21 = vld [vmem:[%s2208_s22 + $0x28] sm:$0x3]  ;;  %v478_v22 = vsel %vm473_vm0, %v475_v3, %v477_v12  ;;  %v591_v23 = vsel %vm586_vm1, %v588_v4, %v590_v13  ;;  %v492_v4 = vrot.slane %v382_v2, 1  ;;  %v304_v12 = vld [vmem:[%s3576_s1 + $0x3d0] sm:$0xff] }
  0x4f   : > { %1085 = vmatpush.msrb.mxu3 %v232_v24  ;;  %1196 = vmatpush.msrb.mxu0 %v250_v25  ;;  %v482_v24 = vrot.slane %v376_v21, 1  ;;  %v592_v25 = vrot.slane %v2342_v58, 2 }
  0x50   : > { %859 = vmatpush.msrb.mxu1 %v200_v27  ;;  %973 = vmatpush.msrb.mxu2 %v215_v28  ;;  %v593_v27 = vrot.slane %v2391_v10, 2  ;;  %v323_v28 = vld [vmem:[%s3576_s1 + $0x468] sm:$0xff] }
  0x51   : > { %761 = vmatmul.f32.gmra.mxu0 %v2440_v29  ;;  %1086 = vmatpush.msrb.mxu3 %v231_v32  ;;  %v483_v32 = vsel %vm473_vm0, %v480_v9, %v482_v24  ;;  %v495_v9 = vrot.slane %v2256_v30, 1  ;;  %v320_v24 = vld [vmem:[%s3576_s1 + $0x450] sm:$0xff] }
  0x52   : > { %1197 = vmatpush.msrb.mxu0 %v249_v33  ;;  %860 = vmatpush.msrb.mxu1 %v199_v34  ;;  %v2564_v33 = vsel %vm586_vm1, %v592_v25, %v593_v27  ;;  %v484_v34 = vrot.slane %v2440_v29, 1 }
  0x53   : > { %788 = vmatmul.f32.gmra.mxu1 %v2452_v35  ;;  %812 = vmatmul.f32.gmra.mxu2 %v2455_v36 }
  0x54   : > { %974 = vmatpush.msrb.mxu2 %v214_v37  ;;  %1087 = vmatpush.msrb.mxu3 %v230_v38  ;;  %v595_v37 = vrot.slane %v376_v21, 2  ;;  %v306_v38 = vld [vmem:[%s3576_s1 + $0x3e0] sm:$0xff] }
  0x55   : > { %836 = vmatmul.f32.gmra.mxu3 %v414_v39  ;;  %1198 = vmatpush.msrb.mxu0 %v248_v40  ;;  %v274_v39 = vld [vmem:[%s3576_s1 + $0x2e0] sm:$0xff] }
  0x56   : > { %861 = vmatpush.msrb.mxu1 %v198_v41  ;;  %1411 = vmatpush.msra.mxu2 %v293_v43  ;;  %v379_v41 = vld [vmem:[%s2208_s22 + $0x40] sm:$0x3]  ;;  %v2584_v43 = vsel %vm586_vm1, %v593_v27, %v595_v37 }
  0x57   : > { %1199 = vmatpush.msrb.mxu0 %v247_v44  ;;  %1524 = vmatpush.msra.mxu3 %v309_v45  ;;  %v487_v44 = vrot.slane %v379_v41, 1  ;;  %v597_v45 = vrot.slane %v2440_v29, 2 }
  0x58   : > { %1298 = vmatpush.msra.mxu1 %v277_v48  ;;  %1412 = vmatpush.msra.mxu2 %v292_v55  ;;  %v598_v48 = vrot.slane %v2486_v49, 2  ;;  %v490_v55 = vrot.slane %v2534_v6, 1 }
  0x59   : > { %764 = vmatmul.f32.gmra.mxu0 %v2486_v49  ;;  %1525 = vmatpush.msra.mxu3 %v308_v56  ;;  %v600_v56 = vrot.slane %v379_v41, 2  ;;  %v388_v41 = vld [vmem:[%s2208_s22 + $0x88] sm:$0x3] }
  0x5a   : > { %1200 = vmatpush.msrb.mxu0 %v246_v50  ;;  %1299 = vmatpush.msra.mxu1 %v276_v57  ;;  %v322_v50 = vld [vmem:[%s3576_s1 + $0x460] sm:$0xff]  ;;  %v305_v57 = vld [vmem:[%s3576_s1 + $0x3d8] sm:$0xff]  ;;  %v2632_v26 = vsel %vm473_vm0, %v490_v55, %v492_v4 }
  0x5b   : > { %791 = vmatmul.f32.gmra.mxu1 %v2492_v51  ;;  %815 = vmatmul.f32.gmra.mxu2 %v2495_v52  ;;  %v2620_v3 = vsel %vm586_vm1, %v598_v48, %v600_v56 }
  0x5c   : > { %1637 = vmatpush.msra.mxu0 %v325_v53  ;;  %1413 = vmatpush.msra.mxu2 %v291_v11  ;;  %v605_v11 = vrot.slane %v382_v2, 2 }
  0x5d   : > { %839 = vmatmul.f32.gmra.mxu3 %v416_v54  ;;  %1300 = vmatpush.msra.mxu1 %v275_v19  ;;  %v2598_v54 = vsel %vm586_vm1, %v597_v45, %v598_v48  ;;  %v385_v19 = vld [vmem:[%s2208_s22 + $0x70] sm:$0x3] }
  0x5e   : > { %1638 = vmatpush.msra.mxu0 %v324_v5  ;;  %1526 = vmatpush.msra.mxu3 %v307_v18  ;;  %v602_v5 = vrot.slane %v2514_v59, 2  ;;  %v272_v18 = vld [vmem:[%s3576_s1 + $0x2d0] sm:$0xff]  ;;  %v497_v21 = vrot.slane %v385_v19, 1 }
  0x5f   : > { %1301 = vmatpush.msra.mxu1 %v274_v39  ;;  %v271_v39 = vld [vmem:[%s3576_s1 + $0x2c8] sm:$0xff] }
  0x60   : > { %1639 = vmatpush.msra.mxu0 %v323_v28  ;;  %1527 = vmatpush.msra.mxu3 %v306_v38  ;;  %v2669_v25 = vsel %vm473_vm0, %v495_v9, %v497_v21 }
  0x61   : > { %767 = vmatmul.f32.gmra.mxu0 %v2514_v59  ;;  %1302 = vmatpush.msra.mxu1 %v273_v1 }
  0x62   : > { %1640 = vmatpush.msra.mxu0 %v322_v50  ;;  %1528 = vmatpush.msra.mxu3 %v305_v57  ;;  %v502_v50 = vrot.slane %v388_v41, 1 }
  0x63   : > { %794 = vmatmul.f32.gmra.mxu1 %v2517_v60  ;;  %818 = vmatmul.f32.gmra.mxu2 %v2520_v61 }
  0x64   : > { %1529 = vmatpush.msra.mxu3 %v304_v12  ;;  %1303 = vmatpush.msra.mxu1 %v272_v18  ;;  %v270_v12 = vld [vmem:[%s3576_s1 + $0x2c0] sm:$0xff] }
  0x65   : > { %842 = vmatmul.f32.gmra.mxu3 %v417_v0  ;;  %v391_v18 = vld [vmem:[%s2208_s22 + $0xa0] sm:$0x3] }
  0x66   : > { %1304 = vmatpush.msra.mxu1 %v271_v39 }
  0x68   : > { %1305 = vmatpush.msra.mxu1 %v270_v12 }
  0x69   : > { %770 = vmatmul.f32.gmra.mxu0 %v2534_v6 }
  0x6b   : > { %862 = vmatmul.f32.vlgmr.msrb.gmra.mxu1 %v476_v7  ;;  %975 = vmatmul.f32.vlgmr.msrb.gmra.mxu2 %v589_v8  ;;  %v603_v7 = vrot.slane %v2534_v6, 2  ;;  %v321_v8 = vld [vmem:[%s3576_s1 + $0x458] sm:$0xff] }
  0x6c   : > { %1641 = vmatpush.msra.mxu0 %v321_v8  ;;  %v615_v8 = vrot.slane %v388_v41, 2 }
  0x6d   : > { %1088 = vmatmul.f32.vlgmr.msrb.gmra.mxu3 %v2342_v58  ;;  %v485_v58 = vrot.slane %v2486_v49, 1  ;;  %v2635_v42 = vsel %vm586_vm1, %v602_v5, %v603_v7  ;;  %v505_v5 = vrot.slane %v2452_v35, 1 }
  0x6e   : > { %1642 = vmatpush.msra.mxu0 %v320_v24  ;;  %v617_v24 = vrot.slane %v2403_v14, 2 }
  0x6f   : > { %v2580_v40 = vsel %vm473_vm0, %v484_v34, %v485_v58  ;;  %v2595_v53 = vsel %vm473_vm0, %v485_v58, %v487_v44  ;;  %v610_v34 = vrot.slane %v385_v19, 2  ;;  %v303_v58 = vld [vmem:[%s3576_s1 + $0x3c8] sm:$0xff] }
  0x70   : > { %1530 = vmatpush.msra.mxu3 %v303_v58 }
  0x71   : > { %1201 = vmatmul.f32.vlgmr.msrb.gmra.mxu0 %v481_v20 }
  0x73   : > { %865 = vmatmul.f32.gmra.mxu1 %v478_v22  ;;  %978 = vmatmul.f32.gmra.mxu2 %v591_v23  ;;  %v607_v22 = vrot.slane %v2214_v16, 2  ;;  %v608_v23 = vrot.slane %v2256_v30, 2 }
  0x75   : > { %1091 = vmatmul.f32.gmra.mxu3 %v2391_v10  ;;  %v290_v10 = vld [vmem:[%s3576_s1 + $0x360] sm:$0xff]  ;;  %v2674_v28 = vsel %vm586_vm1, %v607_v22, %v608_v23  ;;  %v2704_v48 = vsel %vm586_vm1, %v608_v23, %v610_v34  ;;  %v507_v23 = vrot.slane %v391_v18, 1 }
  0x76   : > { %1414 = vmatpush.msra.mxu2 %v290_v10 }
  0x77   : > { %v2773_v58 = vsel %vm473_vm0, %v505_v5, %v507_v23 }
  0x78   : > { %3625 = vst [vmem:[#allocation8_spill] sm:$0xff] %v2773_v58 }
  0x79   : > { %1204 = vmatmul.f32.gmra.mxu0 %v483_v32 }
  0x7b   : > { %868 = vmatmul.f32.gmra.mxu1 %v481_v20  ;;  %981 = vmatmul.f32.gmra.mxu2 %v2564_v33  ;;  %v2657_v20 = vsel %vm586_vm1, %v603_v7, %v605_v11  ;;  %v286_v7 = vld [vmem:[%s3576_s1 + $0x340] sm:$0xff] }
  0x7d   : > { %1094 = vmatmul.f32.gmra.mxu3 %v2440_v29  ;;  %v489_v29 = vrot.slane %v2514_v59, 1 }
  0x7f   : > { %v2613_v0 = vsel %vm473_vm0, %v489_v29, %v490_v55  ;;  %v612_v29 = vrot.slane %v2305_v46, 2  ;;  %v613_v55 = vrot.slane %v2354_v62, 2 }
  0x81   : > { %1207 = vmatmul.f32.gmra.mxu0 %v2580_v40  ;;  %v2757_v22 = vsel %vm586_vm1, %v613_v55, %v615_v8  ;;  %v394_v8 = vld [vmem:[%s2208_s22 + $0xb8] sm:$0x3] }
  0x82   : > { %3624 = vst [vmem:[#allocation7_spill] sm:$0xff] %v2757_v22 }
  0x83   : > { %871 = vmatmul.f32.gmra.mxu1 %v483_v32  ;;  %984 = vmatmul.f32.gmra.mxu2 %v2584_v43  ;;  %v287_v32 = vld [vmem:[%s3576_s1 + $0x348] sm:$0xff] }
  0x85   : > { %1097 = vmatmul.f32.gmra.mxu3 %v2486_v49  ;;  %v289_v49 = vld [vmem:[%s3576_s1 + $0x358] sm:$0xff] }
  0x86   : > { %1415 = vmatpush.msra.mxu2 %v289_v49  ;;  %v319_v49 = vld [vmem:[%s3576_s1 + $0x448] sm:$0xff] }
  0x87   : > { %1643 = vmatpush.msra.mxu0 %v319_v49  ;;  %v301_v49 = vld [vmem:[%s3576_s1 + $0x3b8] sm:$0xff] }
  0x89   : > { %1210 = vmatmul.f32.gmra.mxu0 %v2595_v53 }
  0x8b   : > { %874 = vmatmul.f32.gmra.mxu1 %v2580_v40  ;;  %987 = vmatmul.f32.gmra.mxu2 %v2598_v54 }
  0x8d   : > { %1100 = vmatmul.f32.gmra.mxu3 %v2514_v59  ;;  %v494_v59 = vrot.slane %v2214_v16, 1 }
  0x8f   : > { %v2650_v13 = vsel %vm473_vm0, %v494_v59, %v495_v9  ;;  %v302_v59 = vld [vmem:[%s3576_s1 + $0x3c0] sm:$0xff] }
  0x90   : > { %1531 = vmatpush.msra.mxu3 %v302_v59  ;;  %v269_v59 = vld [vmem:[%s3576_s1 + $0x2b8] sm:$0xff] }
  0x91   : > { %1213 = vmatmul.f32.gmra.mxu0 %v2613_v0  ;;  %1306 = vmatpush.msra.mxu1 %v269_v59 }
  0x92   : > { %1532 = vmatpush.msra.mxu3 %v301_v49 }
  0x93   : > { %877 = vmatmul.f32.gmra.mxu1 %v2595_v53  ;;  %990 = vmatmul.f32.gmra.mxu2 %v2620_v3 }
  0x95   : > { %1103 = vmatmul.f32.gmra.mxu3 %v2534_v6  ;;  %v288_v6 = vld [vmem:[%s3576_s1 + $0x350] sm:$0xff] }
  0x96   : > { %1416 = vmatpush.msra.mxu2 %v288_v6 }
  0x98   : > { %1417 = vmatpush.msra.mxu2 %v287_v32 }
  0x99   : > { %1216 = vmatmul.f32.gmra.mxu0 %v2632_v26 }
  0x9a   : > { %1418 = vmatpush.msra.mxu2 %v286_v7 }
  0x9b   : > { %880 = vmatmul.f32.gmra.mxu1 %v2613_v0  ;;  %993 = vmatmul.f32.gmra.mxu2 %v2635_v42 }
  0x9d   : > { %1106 = vmatmul.f32.gmra.mxu3 %v2214_v16  ;;  %v499_v16 = vrot.slane %v2305_v46, 1 }
  0xa1   : > { %1219 = vmatmul.f32.gmra.mxu0 %v2650_v13 }
  0xa3   : > { %883 = vmatmul.f32.gmra.mxu1 %v2632_v26  ;;  %996 = vmatmul.f32.gmra.mxu2 %v2657_v20 }
  0xa5   : > { %1109 = vmatmul.f32.gmra.mxu3 %v2256_v30  ;;  %v500_v30 = vrot.slane %v2354_v62, 1 }
  0xa7   : > { %v2693_v38 = vsel %vm473_vm0, %v499_v16, %v500_v30  ;;  %v2720_v1 = vsel %vm473_vm0, %v500_v30, %v502_v50  ;;  %v618_v16 = vrot.slane %v2452_v35, 2  ;;  %v318_v30 = vld [vmem:[%s3576_s1 + $0x440] sm:$0xff]  ;;  %v510_v50 = vrot.slane %v2517_v60, 1 }
  0xa8   : > { %v2671_v27 = vpop.f32.mrf.mxu1  ;;  %3620 = vst [vmem:[#allocation3_spill] sm:$0xff] %v2720_v1  ;;  %1644 = vmatpush.msra.mxu0 %v318_v30  ;;  %v622_v30 = vrot.slane %v2492_v51, 2 }
  0xa9   : > { %1222 = vmatmul.f32.gmra.mxu0 %v2669_v25 }
  0xab   : > { %886 = vmatmul.f32.gmra.mxu1 %v2650_v13  ;;  %999 = vmatmul.f32.gmra.mxu2 %v2674_v28 }
  0xad   : > { %1112 = vmatmul.f32.gmra.mxu3 %v2305_v46  ;;  %v2727_v46 = vsel %vm586_vm1, %v612_v29, %v613_v55  ;;  %v285_v29 = vld [vmem:[%s3576_s1 + $0x338] sm:$0xff]  ;;  %v620_v55 = vrot.slane %v391_v18, 2 }
  0xae   : > { %v2688_v10 = vpop.f32.mrf.mxu2  ;;  %v2690_v37 = vpop.f32.mrf.mxu0  ;;  %1419 = vmatpush.msra.mxu2 %v285_v29  ;;  %v317_v29 = vld [vmem:[%s3576_s1 + $0x438] sm:$0xff] }
  0xaf   : > { %v2810_v23 = vsel %vm586_vm1, %v618_v16, %v620_v55  ;;  %1645 = vmatpush.msra.mxu0 %v317_v29 }
  0xb0   : > { %v2699_v44 = vpop.f32.mrf.mxu1  ;;  %v2701_v45 = vpop.f32.mrf.mxu3  ;;  %3630 = vst [vmem:[#allocation13_spill] sm:$0xff] %v2810_v23 }
  0xb1   : > { %3619 = vst [vmem:[#allocation2_spill] sm:$0xff] %v2701_v45  ;;  %1225 = vmatmul.f32.gmra.mxu0 %v2693_v38 }
  0xb3   : > { %889 = vmatmul.f32.gmra.mxu1 %v2669_v25  ;;  %1002 = vmatmul.f32.gmra.mxu2 %v2704_v48 }
  0xb5   : > { %1115 = vmatmul.f32.gmra.mxu3 %v2354_v62  ;;  %v504_v62 = vrot.slane %v2403_v14, 1 }
  0xb6   : > { %v2715_v56 = vpop.f32.mrf.mxu2  ;;  %v2717_v57 = vpop.f32.mrf.mxu0 }
  0xb7   : > { %v2746_v11 = vsel %vm473_vm0, %v504_v62, %v505_v5 }
  0xb8   : > { %v2722_v2 = vpop.f32.mrf.mxu1  ;;  %v2724_v4 = vpop.f32.mrf.mxu3  ;;  %3622 = vst [vmem:[#allocation5_spill] sm:$0xff] %v2746_v11 }
  0xb9   : > { %3621 = vst [vmem:[#allocation4_spill] sm:$0xff] %v2724_v4  ;;  %1228 = vmatmul.f32.gmra.mxu0 %v2720_v1  ;;  %v520_v4 = vrot.slane %v2357_v63, 1 }
  0xbb   : > { %892 = vmatmul.f32.gmra.mxu1 %v2693_v38  ;;  %1005 = vmatmul.f32.gmra.mxu2 %v2727_v46 }
  0xbd   : > { %1118 = vmatmul.f32.gmra.mxu3 %v2403_v14  ;;  %v2780_v14 = vsel %vm586_vm1, %v617_v24, %v618_v16  ;;  %v512_v24 = vrot.slane %v394_v8, 1 }
  0xbe   : > { %v2741_v9 = vpop.f32.mrf.mxu2  ;;  %v2743_v6 = vpop.f32.mrf.mxu0  ;;  %3627 = vst [vmem:[#allocation10_spill] sm:$0xff] %v2780_v14 }
  0xbf   : > { %v2826_v49 = vsel %vm473_vm0, %v510_v50, %v512_v24  ;;  %v625_v24 = vrot.slane %v394_v8, 2  ;;  %v268_v8 = vld [vmem:[%s3576_s1 + $0x2b0] sm:$0xff] }
  0xc0   : > { %v2752_v19 = vpop.f32.mrf.mxu1  ;;  %v2754_v21 = vpop.f32.mrf.mxu3  ;;  %3631 = vst [vmem:[#allocation14_spill] sm:$0xff] %v2826_v49  ;;  %1307 = vmatpush.msra.mxu1 %v268_v8 }
  0xc1   : > { %3623 = vst [vmem:[#allocation6_spill] sm:$0xff] %v2754_v21  ;;  %1231 = vmatmul.f32.gmra.mxu0 %v2746_v11 }
  0xc3   : > { %895 = vmatmul.f32.gmra.mxu1 %v2720_v1  ;;  %1008 = vmatmul.f32.gmra.mxu2 %v2757_v22 }
  0xc5   : > { %1121 = vmatmul.f32.gmra.mxu3 %v2452_v35  ;;  %v509_v35 = vrot.slane %v2492_v51, 1 }
  0xc6   : > { %v2768_v32 = vpop.f32.mrf.mxu2  ;;  %v2770_v34 = vpop.f32.mrf.mxu0 }
  0xc7   : > { %v2799_v7 = vsel %vm473_vm0, %v509_v35, %v510_v50  ;;  %v623_v35 = vrot.slane %v2517_v60, 2  ;;  %v284_v50 = vld [vmem:[%s3576_s1 + $0x330] sm:$0xff] }
  0xc8   : > { %v2775_v39 = vpop.f32.mrf.mxu1  ;;  %v2777_v41 = vpop.f32.mrf.mxu3  ;;  %3628 = vst [vmem:[#allocation11_spill] sm:$0xff] %v2799_v7  ;;  %1420 = vmatpush.msra.mxu2 %v284_v50 }
  0xc9   : > { %3626 = vst [vmem:[#allocation9_spill] sm:$0xff] %v2777_v41  ;;  %1234 = vmatmul.f32.gmra.mxu0 %v2773_v58  ;;  %v515_v41 = vrot.slane %v2259_v31, 1 }
  0xcb   : > { %898 = vmatmul.f32.gmra.mxu1 %v2746_v11  ;;  %1011 = vmatmul.f32.gmra.mxu2 %v2780_v14  ;;  %v400_v11 = vld [vmem:[%s2208_s22 + $0xe8] sm:$0x3] }
  0xcc   : > { %v522_v22 = vrot.slane %v400_v11, 1 }
  0xcd   : > { %1124 = vmatmul.f32.gmra.mxu3 %v2492_v51  ;;  %v2833_v51 = vsel %vm586_vm1, %v622_v30, %v623_v35  ;;  %v300_v30 = vld [vmem:[%s3576_s1 + $0x3b0] sm:$0xff] }
  0xce   : > { %v2794_v62 = vpop.f32.mrf.mxu2  ;;  %v2796_v5 = vpop.f32.mrf.mxu0  ;;  %3633 = vst [vmem:[#allocation16_spill] sm:$0xff] %v2833_v51  ;;  %1533 = vmatpush.msra.mxu3 %v300_v30  ;;  %v628_v30 = vrot.slane %v2259_v31, 2 }
  0xd0   : > { %v2805_v12 = vpop.f32.mrf.mxu1  ;;  %v2807_v18 = vpop.f32.mrf.mxu3 }
  0xd1   : > { %3629 = vst [vmem:[#allocation12_spill] sm:$0xff] %v2807_v18  ;;  %1237 = vmatmul.f32.gmra.mxu0 %v2799_v7 }
  0xd3   : > { %901 = vmatmul.f32.gmra.mxu1 %v2773_v58  ;;  %1014 = vmatmul.f32.gmra.mxu2 %v2810_v23  ;;  %v2863_v23 = vsel %vm586_vm1, %v623_v35, %v625_v24 }
  0xd4   : > { %3636 = vst [vmem:[#allocation19_spill] sm:$0xff] %v2863_v23 }
  0xd5   : > { %1127 = vmatmul.f32.gmra.mxu3 %v2517_v60  ;;  %v514_v60 = vrot.slane %v2217_v17, 1 }
  0xd6   : > { %v2821_v16 = vpop.f32.mrf.mxu2  ;;  %v2823_v55 = vpop.f32.mrf.mxu0 }
  0xd8   : > { %v2828_v59 = vpop.f32.mrf.mxu1  ;;  %v2830_v18 = vpop.f32.mrf.mxu3 }
  0xd9   : > { %3632 = vst [vmem:[#allocation15_spill] sm:$0xff] %v2830_v18  ;;  %1240 = vmatmul.f32.gmra.mxu0 %v2826_v49 }
  0xdb   : > { %904 = vmatmul.f32.gmra.mxu1 %v2799_v7  ;;  %1017 = vmatmul.f32.gmra.mxu2 %v2833_v51  ;;  %v2852_v7 = vsel %vm473_vm0, %v514_v60, %v515_v41  ;;  %v397_v51 = vld [vmem:[%s2208_s22 + $0xd0] sm:$0x3]  ;;  %v627_v60 = vrot.slane %v2217_v17, 2 }
  0xdc   : > { %3634 = vst [vmem:[#allocation17_spill] sm:$0xff] %v2852_v7  ;;  %v517_v58 = vrot.slane %v397_v51, 1 }
  0xdd   : > { %1130 = vmatmul.f32.gmra.mxu3 %v2217_v17  ;;  %v2884_v17 = vsel %vm586_vm1, %v627_v60, %v628_v30  ;;  %v299_v60 = vld [vmem:[%s3576_s1 + $0x3a8] sm:$0xff] }
  0xde   : > { %v2847_v29 = vpop.f32.mrf.mxu2  ;;  %v2849_v18 = vpop.f32.mrf.mxu0  ;;  %v2879_v8 = vsel %vm473_vm0, %v515_v41, %v517_v58  ;;  %3638 = vst [vmem:[#allocation21_spill] sm:$0xff] %v2884_v17  ;;  %v630_v58 = vrot.slane %v397_v51, 2  ;;  %1534 = vmatpush.msra.mxu3 %v299_v60  ;;  %v267_v51 = vld [vmem:[%s3576_s1 + $0x2a8] sm:$0xff] }
  0xdf   : > { %1308 = vmatpush.msra.mxu1 %v267_v51 }
  0xe0   : > { %v2858_v50 = vpop.f32.mrf.mxu1  ;;  %v2860_v21 = vpop.f32.mrf.mxu3 }
  0xe1   : > { %3635 = vst [vmem:[#allocation18_spill] sm:$0xff] %v2860_v21  ;;  %1243 = vmatmul.f32.gmra.mxu0 %v2852_v7  ;;  %v316_v21 = vld [vmem:[%s3576_s1 + $0x430] sm:$0xff] }
  0xe2   : > { %1646 = vmatpush.msra.mxu0 %v316_v21  ;;  %v283_v21 = vld [vmem:[%s3576_s1 + $0x328] sm:$0xff] }
  0xe3   : > { %907 = vmatmul.f32.gmra.mxu1 %v2826_v49  ;;  %1020 = vmatmul.f32.gmra.mxu2 %v2863_v23 }
  0xe4   : > { %1421 = vmatpush.msra.mxu2 %v283_v21 }
  0xe5   : > { %1133 = vmatmul.f32.gmra.mxu3 %v2259_v31  ;;  %v519_v31 = vrot.slane %v2308_v47, 1 }
  0xe6   : > { %v2874_v35 = vpop.f32.mrf.mxu2  ;;  %v2876_v24 = vpop.f32.mrf.mxu0 }
  0xe8   : > { %v2881_v49 = vpop.f32.mrf.mxu3  ;;  %v863_v23 = vpop.f32.mrf.mxu1 }
  0xe9   : > { %3637 = vst [vmem:[#allocation20_spill] sm:$0xff] %v2881_v49  ;;  %1246 = vmatmul.f32.gmra.mxu0 %v2879_v8  ;;  %v864_v41 = vadd.f32 %v863_v23, %v2690_v37  ;;  %v2907_v23 = vsel %vm586_vm1, %v628_v30, %v630_v58  ;;  %v315_v30 = vld [vmem:[%s3576_s1 + $0x428] sm:$0xff] }
  0xea   : > { %1647 = vmatpush.msra.mxu0 %v315_v30 }
  0xeb   : > { %910 = vmatmul.f32.gmra.mxu1 %v2852_v7  ;;  %1023 = vmatmul.f32.gmra.mxu2 %v2884_v17  ;;  %v2900_v7 = vsel %vm473_vm0, %v519_v31, %v520_v4  ;;  %v633_v31 = vrot.slane %v2357_v63, 2 }
  0xed   : > { %1136 = vmatmul.f32.gmra.mxu3 %v2308_v47 }
  0xee   : > { %v976_v49 = vpop.f32.mrf.mxu2  ;;  %v1202_v14 = vpop.f32.mrf.mxu0 }
  0xef   : > { %v977_v17 = vadd.f32 %v976_v49, %v864_v41  ;;  %v632_v49 = vrot.slane %v2308_v47, 2 }
  0xf0   : > { %v866_v21 = vpop.f32.mrf.mxu1  ;;  %v1089_v37 = vpop.f32.mrf.mxu3 }
  0xf1   : > { %v1090_v45 = vadd.f32 %v1089_v37, %v977_v17  ;;  %1249 = vmatmul.f32.gmra.mxu0 %v2900_v7  ;;  %v867_v41 = vadd.f32 %v866_v21, %v2717_v57  ;;  %v2925_v47 = vsel %vm586_vm1, %v632_v49, %v633_v31  ;;  %v525_v57 = vrot.slane %v2455_v36, 1 }
  0xf3   : > { %v2910_v1 = vadd.f32 %v1202_v14, %v1090_v45  ;;  %913 = vmatmul.f32.gmra.mxu1 %v2879_v8  ;;  %1026 = vmatmul.f32.gmra.mxu2 %v2907_v23  ;;  %v2922_v45 = vsel %vm473_vm0, %v520_v4, %v522_v22  ;;  %v282_v4 = vld [vmem:[%s3576_s1 + $0x320] sm:$0xff]  ;;  %v635_v22 = vrot.slane %v400_v11, 2 }
  0xf4   : > { %1422 = vmatpush.msra.mxu2 %v282_v4  ;;  %v266_v11 = vld [vmem:[%s3576_s1 + $0x2a0] sm:$0xff] }
  0xf5   : > { %3639 = vst [vmem:[#allocation22_spill] sm:$0xff] %v2910_v1  ;;  %1139 = vmatmul.f32.gmra.mxu3 %v2357_v63  ;;  %v524_v63 = vrot.slane %v2406_v15, 1  ;;  %1309 = vmatpush.msra.mxu1 %v266_v11 }
  0xf6   : > { %v979_v17 = vpop.f32.mrf.mxu2  ;;  %v1205_v58 = vpop.f32.mrf.mxu0 }
  0xf7   : > { %v980_v14 = vadd.f32 %v979_v17, %v867_v41  ;;  %v298_v41 = vld [vmem:[%s3576_s1 + $0x3a0] sm:$0xff] }
  0xf8   : > { %v869_v60 = vpop.f32.mrf.mxu1  ;;  %v1092_v51 = vpop.f32.mrf.mxu3  ;;  %1535 = vmatpush.msra.mxu3 %v298_v41 }
  0xf9   : > { %v1093_v37 = vadd.f32 %v1092_v51, %v980_v14  ;;  %1252 = vmatmul.f32.gmra.mxu0 %v2922_v45  ;;  %v870_v49 = vadd.f32 %v869_v60, %v2743_v6  ;;  %v403_v51 = vld [vmem:[%s2208_s22 + $0x100] sm:$0x3]  ;;  %v2950_v60 = vsel %vm586_vm1, %v633_v31, %v635_v22 }
  0xfa   : > { %v314_v31 = vld [vmem:[%s3576_s1 + $0x420] sm:$0xff] }
  0xfb   : > { %v2930_v21 = vadd.f32 %v1205_v58, %v1093_v37  ;;  %916 = vmatmul.f32.gmra.mxu1 %v2900_v7  ;;  %1029 = vmatmul.f32.gmra.mxu2 %v2925_v47  ;;  %v2943_v58 = vsel %vm473_vm0, %v524_v63, %v525_v57  ;;  %v637_v63 = vrot.slane %v2406_v15, 2 }
  0xfc   : > { %1648 = vmatpush.msra.mxu0 %v314_v31 }
  0xfd   : > { %3640 = vst [vmem:[#allocation23_spill] sm:$0xff] %v2930_v21  ;;  %1142 = vmatmul.f32.gmra.mxu3 %v2406_v15  ;;  %v527_v21 = vrot.slane %v403_v51, 1 }
  0xfe   : > { %v982_v30 = vpop.f32.mrf.mxu2  ;;  %v1208_v17 = vpop.f32.mrf.mxu0 }
  0xff   : > { %v983_v14 = vadd.f32 %v982_v30, %v870_v49  ;;  %v638_v49 = vrot.slane %v2455_v36, 2 }
 0x100   : > { %v872_v37 = vpop.f32.mrf.mxu1  ;;  %v1095_v6 = vpop.f32.mrf.mxu3 }
 0x101   : > { %v1096_v4 = vadd.f32 %v1095_v6, %v983_v14  ;;  %1255 = vmatmul.f32.gmra.mxu0 %v2943_v58  ;;  %v873_v41 = vadd.f32 %v872_v37, %v2770_v34  ;;  %v2968_v15 = vsel %vm586_vm1, %v637_v63, %v638_v49  ;;  %v530_v34 = vrot.slane %v2520_v61, 1 }
 0x103   : > { %v2953_v1 = vadd.f32 %v1208_v17, %v1096_v4  ;;  %919 = vmatmul.f32.gmra.mxu1 %v2922_v45  ;;  %1032 = vmatmul.f32.gmra.mxu2 %v2950_v60  ;;  %v2965_v17 = vsel %vm473_vm0, %v525_v57, %v527_v21  ;;  %v281_v57 = vld [vmem:[%s3576_s1 + $0x318] sm:$0xff]  ;;  %v640_v21 = vrot.slane %v403_v51, 2 }
 0x104   : > { %1423 = vmatpush.msra.mxu2 %v281_v57  ;;  %v265_v51 = vld [vmem:[%s3576_s1 + $0x298] sm:$0xff] }
 0x105   : > { %3641 = vst [vmem:[#allocation24_spill] sm:$0xff] %v2953_v1  ;;  %1145 = vmatmul.f32.gmra.mxu3 %v2455_v36  ;;  %v529_v36 = vrot.slane %v2495_v52, 1  ;;  %1310 = vmatpush.msra.mxu1 %v265_v51 }
 0x106   : > { %v985_v22 = vpop.f32.mrf.mxu2  ;;  %v1211_v30 = vpop.f32.mrf.mxu0 }
 0x107   : > { %v986_v14 = vadd.f32 %v985_v22, %v873_v41  ;;  %v297_v41 = vld [vmem:[%s3576_s1 + $0x398] sm:$0xff] }
 0x108   : > { %v875_v11 = vpop.f32.mrf.mxu1  ;;  %v1098_v6 = vpop.f32.mrf.mxu3  ;;  %1536 = vmatpush.msra.mxu3 %v297_v41 }
 0x109   : > { %v1099_v4 = vadd.f32 %v1098_v6, %v986_v14  ;;  %1258 = vmatmul.f32.gmra.mxu0 %v2965_v17  ;;  %v876_v63 = vadd.f32 %v875_v11, %v2796_v5  ;;  %v406_v6 = vld [vmem:[%s2208_s22 + $0x118] sm:$0x3]  ;;  %v2993_v11 = vsel %vm586_vm1, %v638_v49, %v640_v21 }
 0x10a   : > { %v313_v21 = vld [vmem:[%s3576_s1 + $0x418] sm:$0xff] }
 0x10b   : > { %v2973_v37 = vadd.f32 %v1211_v30, %v1099_v4  ;;  %922 = vmatmul.f32.gmra.mxu1 %v2943_v58  ;;  %1035 = vmatmul.f32.gmra.mxu2 %v2968_v15  ;;  %v2986_v30 = vsel %vm473_vm0, %v529_v36, %v530_v34  ;;  %v642_v36 = vrot.slane %v2495_v52, 2 }
 0x10c   : > { %3643 = vst [vmem:[#allocation26_spill] sm:$0xff] %v2986_v30  ;;  %1649 = vmatpush.msra.mxu0 %v313_v21 }
 0x10d   : > { %3642 = vst [vmem:[#allocation25_spill] sm:$0xff] %v2973_v37  ;;  %1148 = vmatmul.f32.gmra.mxu3 %v2495_v52  ;;  %v532_v37 = vrot.slane %v406_v6, 1 }
 0x10e   : > { %v988_v31 = vpop.f32.mrf.mxu2  ;;  %v1214_v22 = vpop.f32.mrf.mxu0 }
 0x10f   : > { %v989_v14 = vadd.f32 %v988_v31, %v876_v63  ;;  %v643_v63 = vrot.slane %v2520_v61, 2 }
 0x110   : > { %v878_v4 = vpop.f32.mrf.mxu1  ;;  %v1101_v5 = vpop.f32.mrf.mxu3 }
 0x111   : > { %v1102_v57 = vadd.f32 %v1101_v5, %v989_v14  ;;  %1261 = vmatmul.f32.gmra.mxu0 %v2986_v30  ;;  %v879_v49 = vadd.f32 %v878_v4, %v2823_v55  ;;  %v3011_v5 = vsel %vm586_vm1, %v642_v36, %v643_v63  ;;  %v3019_v4 = vld [vmem:[%s2208_s22 + $0x128] sm:$0xff]  ;;  %v280_v36 = vld [vmem:[%s3576_s1 + $0x310] sm:$0xff] }
 0x112   : > { %3645 = vst [vmem:[#allocation28_spill] sm:$0xff] %v3011_v5  ;;  %1424 = vmatpush.msra.mxu2 %v280_v36 }
 0x113   : > { %v2996_v1 = vadd.f32 %v1214_v22, %v1102_v57  ;;  %925 = vmatmul.f32.gmra.mxu1 %v2965_v17  ;;  %1038 = vmatmul.f32.gmra.mxu2 %v2993_v11  ;;  %v3008_v22 = vsel %vm473_vm0, %v530_v34, %v532_v37  ;;  %3647 = vst [vmem:[#allocation30_spill] sm:$0xff] %v3019_v4  ;;  %v535_v34 = vrot.slane %v3019_v4, 1 }
 0x115   : > { %3644 = vst [vmem:[#allocation27_spill] sm:$0xff] %v2996_v1  ;;  %1151 = vmatmul.f32.gmra.mxu3 %v2520_v61  ;;  %v3015_v61 = vld [vmem:[%s2208_s22 + $0x120] sm:$0xff] }
 0x116   : > { %v991_v41 = vpop.f32.mrf.mxu2  ;;  %v1217_v31 = vpop.f32.mrf.mxu0  ;;  %3646 = vst [vmem:[#allocation29_spill] sm:$0xff] %v3015_v61  ;;  %v534_v55 = vrot.slane %v3015_v61, 1 }
 0x117   : > { %v992_v14 = vadd.f32 %v991_v41, %v879_v49  ;;  %v645_v49 = vrot.slane %v406_v6, 2  ;;  %v296_v41 = vld [vmem:[%s3576_s1 + $0x390] sm:$0xff] }
 0x118   : > { %v881_v51 = vpop.f32.mrf.mxu1  ;;  %v1104_v52 = vpop.f32.mrf.mxu3  ;;  %1537 = vmatpush.msra.mxu3 %v296_v41  ;;  %v264_v6 = vld [vmem:[%s3576_s1 + $0x290] sm:$0xff] }
 0x119   : > { %v1105_v57 = vadd.f32 %v1104_v52, %v992_v14  ;;  %1264 = vmatmul.f32.gmra.mxu0 %v3008_v22  ;;  %v882_v21 = vadd.f32 %v881_v51, %v2849_v18  ;;  %v3035_v52 = vsel %vm473_vm0, %v534_v55, %v535_v34  ;;  %v3042_v51 = vsel %vm586_vm1, %v643_v63, %v645_v49  ;;  %v312_v49 = vld [vmem:[%s3576_s1 + $0x410] sm:$0xff] }
 0x11a   : > { %3649 = vst [vmem:[#allocation32_spill] sm:$0xff] %v3035_v52  ;;  %1311 = vmatpush.msra.mxu1 %v264_v6  ;;  %v647_v55 = vrot.slane %v3015_v61, 2  ;;  %1650 = vmatpush.msra.mxu0 %v312_v49 }
 0x11b   : > { %v3022_v37 = vadd.f32 %v1217_v31, %v1105_v57  ;;  %928 = vmatmul.f32.gmra.mxu1 %v2986_v30  ;;  %1041 = vmatmul.f32.gmra.mxu2 %v3011_v5 }
 0x11d   : > { %3648 = vst [vmem:[#allocation31_spill] sm:$0xff] %v3022_v37  ;;  %1154 = vmatmul.f32.gmra.mxu3 %v3015_v61  ;;  %v409_v37 = vld [vmem:[%s2208_s22 + $0x130] sm:$0x3] }
 0x11e   : > { %v994_v31 = vpop.f32.mrf.mxu2  ;;  %v1220_v14 = vpop.f32.mrf.mxu0  ;;  %v537_v5 = vrot.slane %v409_v37, 1 }
 0x11f   : > { %v995_v57 = vadd.f32 %v994_v31, %v882_v21  ;;  %v648_v21 = vrot.slane %v3019_v4, 2 }
 0x120   : > { %v884_v36 = vpop.f32.mrf.mxu1  ;;  %v1107_v18 = vpop.f32.mrf.mxu3  ;;  %v3057_v31 = vsel %vm473_vm0, %v535_v34, %v537_v5 }
 0x121   : > { %v1108_v1 = vadd.f32 %v1107_v18, %v995_v57  ;;  %1267 = vmatmul.f32.gmra.mxu0 %v3035_v52  ;;  %v885_v63 = vadd.f32 %v884_v36, %v2876_v24  ;;  %v3060_v18 = vsel %vm586_vm1, %v647_v55, %v648_v21  ;;  %v3064_v24 = vld [vmem:[%s2208_s22 + $0x138] sm:$0xff]  ;;  %v279_v55 = vld [vmem:[%s3576_s1 + $0x308] sm:$0xff] }
 0x122   : > { %3651 = vst [vmem:[#allocation34_spill] sm:$0xff] %v3060_v18  ;;  %v539_v36 = vrot.slane %v3064_v24, 1  ;;  %1425 = vmatpush.msra.mxu2 %v279_v55 }
 0x123   : > { %v3045_v30 = vadd.f32 %v1220_v14, %v1108_v1  ;;  %931 = vmatmul.f32.gmra.mxu1 %v3008_v22  ;;  %1044 = vmatmul.f32.gmra.mxu2 %v3042_v51  ;;  %3652 = vst [vmem:[#allocation35_spill] sm:$0xff] %v3064_v24 }
 0x125   : > { %3650 = vst [vmem:[#allocation33_spill] sm:$0xff] %v3045_v30  ;;  %1157 = vmatmul.f32.gmra.mxu3 %v3019_v4  ;;  %v3068_v4 = vld [vmem:[%s2208_s22 + $0x140] sm:$0xff] }
 0x126   : > { %v997_v1 = vpop.f32.mrf.mxu2  ;;  %v1223_v41 = vpop.f32.mrf.mxu0  ;;  %3653 = vst [vmem:[#allocation36_spill] sm:$0xff] %v3068_v4  ;;  %v540_v5 = vrot.slane %v3068_v4, 1 }
 0x127   : > { %v998_v14 = vadd.f32 %v997_v1, %v885_v63  ;;  %v650_v63 = vrot.slane %v409_v37, 2  ;;  %v295_v1 = vld [vmem:[%s3576_s1 + $0x388] sm:$0xff] }
 0x128   : > { %v887_v57 = vpop.f32.mrf.mxu1  ;;  %v1110_v6 = vpop.f32.mrf.mxu3  ;;  %1538 = vmatpush.msra.mxu3 %v295_v1  ;;  %v263_v37 = vld [vmem:[%s3576_s1 + $0x288] sm:$0xff] }
 0x129   : > { %v1111_v30 = vadd.f32 %v1110_v6, %v998_v14  ;;  %1270 = vmatmul.f32.gmra.mxu0 %v3057_v31  ;;  %v888_v49 = vadd.f32 %v887_v57, %v2671_v27  ;;  %v3084_v14 = vsel %vm473_vm0, %v539_v36, %v540_v5  ;;  %v3091_v57 = vsel %vm586_vm1, %v648_v21, %v650_v63  ;;  %v311_v63 = vld [vmem:[%s3576_s1 + $0x408] sm:$0xff] }
 0x12a   : > { %3655 = vst [vmem:[#allocation38_spill] sm:$0xff] %v3084_v14  ;;  %1312 = vmatpush.msra.mxu1 %v263_v37  ;;  %v652_v36 = vrot.slane %v3064_v24, 2  ;;  %1651 = vmatpush.msra.mxu0 %v311_v63 }
 0x12b   : > { %v3071_v34 = vadd.f32 %v1223_v41, %v1111_v30  ;;  %934 = vmatmul.f32.gmra.mxu1 %v3035_v52  ;;  %1047 = vmatmul.f32.gmra.mxu2 %v3060_v18 }
 0x12d   : > { %3654 = vst [vmem:[#allocation37_spill] sm:$0xff] %v3071_v34  ;;  %1160 = vmatmul.f32.gmra.mxu3 %v3064_v24  ;;  %v412_v34 = vld [vmem:[%s2208_s22 + $0x148] sm:$0x3] }
 0x12e   : > { %v1000_v30 = vpop.f32.mrf.mxu2  ;;  %v1226_v41 = vpop.f32.mrf.mxu0  ;;  %v542_v52 = vrot.slane %v412_v34, 1 }
 0x12f   : > { %v1001_v6 = vadd.f32 %v1000_v30, %v888_v49  ;;  %v653_v49 = vrot.slane %v3068_v4, 2 }
 0x130   : > { %v890_v55 = vpop.f32.mrf.mxu1  ;;  %v1113_v27 = vpop.f32.mrf.mxu3  ;;  %v3106_v30 = vsel %vm473_vm0, %v540_v5, %v542_v52 }
 0x131   : > { %v1114_v18 = vadd.f32 %v1113_v27, %v1001_v6  ;;  %1273 = vmatmul.f32.gmra.mxu0 %v3084_v14  ;;  %v891_v21 = vadd.f32 %v890_v55, %v2699_v44  ;;  %3657 = vst [vmem:[#allocation40_spill] sm:$0xff] %v3106_v30  ;;  %v3109_v27 = vsel %vm586_vm1, %v652_v36, %v653_v49  ;;  %v3113_v44 = vld [vmem:[%s2208_s22 + $0x150] sm:$0xff]  ;;  %v278_v36 = vld [vmem:[%s3576_s1 + $0x300] sm:$0xff] }
 0x132   : > { %3658 = vst [vmem:[#allocation41_spill] sm:$0xff] %v3109_v27  ;;  %v544_v55 = vrot.slane %v3113_v44, 1  ;;  %1426 = vmatpush.msra.mxu2 %v278_v36 }
 0x133   : > { %v3094_v61 = vadd.f32 %v1226_v41, %v1114_v18  ;;  %937 = vmatmul.f32.gmra.mxu1 %v3057_v31  ;;  %1050 = vmatmul.f32.gmra.mxu2 %v3091_v57  ;;  %3659 = vst [vmem:[#allocation42_spill] sm:$0xff] %v3113_v44 }
 0x135   : > { %3656 = vst [vmem:[#allocation39_spill] sm:$0xff] %v3094_v61  ;;  %1163 = vmatmul.f32.gmra.mxu3 %v3068_v4  ;;  %v3117_v4 = vld [vmem:[%s2208_s22 + $0x158] sm:$0xff] }
 0x136   : > { %v1003_v18 = vpop.f32.mrf.mxu2  ;;  %v1229_v1 = vpop.f32.mrf.mxu0  ;;  %3660 = vst [vmem:[#allocation43_spill] sm:$0xff] %v3117_v4  ;;  %v545_v52 = vrot.slane %v3117_v4, 1 }
 0x137   : > { %v1004_v41 = vadd.f32 %v1003_v18, %v891_v21  ;;  %v655_v21 = vrot.slane %v412_v34, 2  ;;  %v294_v18 = vld [vmem:[%s3576_s1 + $0x380] sm:$0xff] }
 0x138   : > { %v893_v6 = vpop.f32.mrf.mxu1  ;;  %v1116_v37 = vpop.f32.mrf.mxu3  ;;  %1539 = vmatpush.msra.mxu3 %v294_v18  ;;  %v262_v34 = vld [vmem:[%s3576_s1 + $0x280] sm:$0xff] }
 0x139   : > { %v1117_v61 = vadd.f32 %v1116_v37, %v1004_v41  ;;  %1276 = vmatmul.f32.gmra.mxu0 %v3106_v30  ;;  %v894_v63 = vadd.f32 %v893_v6, %v2722_v2  ;;  %v3133_v41 = vsel %vm473_vm0, %v544_v55, %v545_v52  ;;  %v3140_v6 = vsel %vm586_vm1, %v653_v49, %v655_v21  ;;  %v310_v21 = vld [vmem:[%s3576_s1 + $0x400] sm:$0xff] }
 0x13a   : > { %3662 = vst [vmem:[#allocation45_spill] sm:$0xff] %v3140_v6  ;;  %1313 = vmatpush.msra.mxu1 %v262_v34  ;;  %v657_v55 = vrot.slane %v3113_v44, 2  ;;  %1652 = vmatpush.msra.mxu0 %v310_v21 }
 0x13b   : > { %v3120_v5 = vadd.f32 %v1229_v1, %v1117_v61  ;;  %940 = vmatmul.f32.gmra.mxu1 %v3084_v14  ;;  %1053 = vmatmul.f32.gmra.mxu2 %v3109_v27 }
 0x13d   : > { %3661 = vst [vmem:[#allocation44_spill] sm:$0xff] %v3120_v5  ;;  %1166 = vmatmul.f32.gmra.mxu3 %v3113_v44  ;;  %v415_v5 = vld [vmem:[%s2208_s22 + $0x160] sm:$0x3]  ;;  %v418_v44 = vld [vmem:[%s2208_s22 + $0x178] sm:$0x3] }
 0x13e   : > { %v1006_v61 = vpop.f32.mrf.mxu2  ;;  %v1232_v1 = vpop.f32.mrf.mxu0  ;;  %v547_v14 = vrot.slane %v415_v5, 1 }
 0x13f   : > { %v1007_v37 = vadd.f32 %v1006_v61, %v894_v63  ;;  %v658_v63 = vrot.slane %v3117_v4, 2 }
 0x140   : > { %v896_v36 = vpop.f32.mrf.mxu1  ;;  %v1119_v2 = vpop.f32.mrf.mxu3  ;;  %v3155_v61 = vsel %vm473_vm0, %v545_v52, %v547_v14 }
 0x141   : > { %v1120_v27 = vadd.f32 %v1119_v2, %v1007_v37  ;;  %1279 = vmatmul.f32.gmra.mxu0 %v3133_v41  ;;  %v897_v49 = vadd.f32 %v896_v36, %v2752_v19  ;;  %v3158_v2 = vsel %vm586_vm1, %v657_v55, %v658_v63  ;;  %v3162_v19 = vld [vmem:[%s2208_s22 + $0x168] sm:$0xff]  ;;  %v660_v55 = vrot.slane %v415_v5, 2 }
 0x142   : > { %3664 = vst [vmem:[#allocation47_spill] sm:$0xff] %v3162_v19  ;;  %v549_v36 = vrot.slane %v3162_v19, 1  ;;  %v552_v5 = vrot.slane %v418_v44, 1 }
 0x143   : > { %v3143_v24 = vadd.f32 %v1232_v1, %v1120_v27  ;;  %943 = vmatmul.f32.gmra.mxu1 %v3106_v30  ;;  %1056 = vmatmul.f32.gmra.mxu2 %v3140_v6 }
 0x145   : > { %3663 = vst [vmem:[#allocation46_spill] sm:$0xff] %v3143_v24  ;;  %1169 = vmatmul.f32.gmra.mxu3 %v3117_v4  ;;  %v3166_v4 = vld [vmem:[%s2208_s22 + $0x170] sm:$0xff] }
 0x146   : > { %v1009_v27 = vpop.f32.mrf.mxu2  ;;  %v1235_v18 = vpop.f32.mrf.mxu0  ;;  %3665 = vst [vmem:[#allocation48_spill] sm:$0xff] %v3166_v4  ;;  %v550_v14 = vrot.slane %v3166_v4, 1 }
 0x147   : > { %v1010_v1 = vadd.f32 %v1009_v27, %v897_v49 }
 0x148   : > { %v899_v37 = vpop.f32.mrf.mxu1  ;;  %v1122_v34 = vpop.f32.mrf.mxu3 }
 0x149   : > { %v1123_v24 = vadd.f32 %v1122_v34, %v1010_v1  ;;  %1282 = vmatmul.f32.gmra.mxu0 %v3155_v61  ;;  %v900_v49 = vadd.f32 %v899_v37, %v2775_v39  ;;  %v3176_v1 = vsel %vm473_vm0, %v549_v36, %v550_v14  ;;  %v662_v37 = vrot.slane %v3162_v19, 2 }
 0x14a   : > { %v663_v36 = vrot.slane %v3166_v4, 2 }
 0x14b   : > { %v3169_v52 = vadd.f32 %v1235_v18, %v1123_v24  ;;  %946 = vmatmul.f32.gmra.mxu1 %v3133_v41  ;;  %1059 = vmatmul.f32.gmra.mxu2 %v3158_v2  ;;  %v3180_v24 = vsel %vm586_vm1, %v658_v63, %v660_v55  ;;  %v3192_v55 = vsel %vm473_vm0, %v550_v14, %v552_v5  ;;  %v665_v5 = vrot.slane %v418_v44, 2 }
 0x14c   : > { %3667 = vst [vmem:[#allocation50_spill] sm:$0xff] %v3180_v24 }
 0x14d   : > { %3666 = vst [vmem:[#allocation49_spill] sm:$0xff] %v3169_v52  ;;  %1172 = vmatmul.f32.gmra.mxu3 %v3162_v19  ;;  %v3201_v19 = vld [vmem:[%s2208_s22 + $0x180] sm:$0xff] }
 0x14e   : > { %v1012_v21 = vpop.f32.mrf.mxu2  ;;  %v1238_v27 = vpop.f32.mrf.mxu0 }
 0x14f   : > { %v1013_v34 = vadd.f32 %v1012_v21, %v900_v49 }
 0x150   : > { %v902_v6 = vpop.f32.mrf.mxu1  ;;  %v1125_v30 = vpop.f32.mrf.mxu3 }
 0x151   : > { %v1126_v18 = vadd.f32 %v1125_v30, %v1013_v34  ;;  %1285 = vmatmul.f32.gmra.mxu0 %v3176_v1  ;;  %v903_v49 = vadd.f32 %v902_v6, %v2805_v12  ;;  %v702_v12 = vrot.slane %v3201_v19, 1 }
 0x153   : > { %v3183_v39 = vadd.f32 %v1238_v27, %v1126_v18  ;;  %949 = vmatmul.f32.gmra.mxu1 %v3155_v61  ;;  %1062 = vmatmul.f32.gmra.mxu2 %v3180_v24  ;;  %v3195_v27 = vld [vmem:[%s2208_s22 + $0x188] sm:$0xff] }
 0x154   : > { %v703_v6 = vrot.slane %v3195_v27, 1 }
 0x155   : > { %3668 = vst [vmem:[#allocation51_spill] sm:$0xff] %v3183_v39  ;;  %1175 = vmatmul.f32.gmra.mxu3 %v3166_v4  ;;  %v3198_v39 = vsel %vm586_vm1, %v662_v37, %v663_v36  ;;  %v3216_v4 = vld [vmem:[%s2208_s22 + $0x190] sm:$0x3] }
 0x156   : > { %v1015_v63 = vpop.f32.mrf.mxu2  ;;  %v1241_v30 = vpop.f32.mrf.mxu0 }
 0x157   : > { %v1016_v21 = vadd.f32 %v1015_v63, %v903_v49 }
 0x158   : > { %v905_v34 = vpop.f32.mrf.mxu1  ;;  %v1128_v18 = vpop.f32.mrf.mxu3 }
 0x159   : > { %v1129_v52 = vadd.f32 %v1128_v18, %v1016_v21  ;;  %1288 = vmatmul.f32.gmra.mxu0 %v3192_v55  ;;  %v906_v37 = vadd.f32 %v905_v34, %v2828_v59  ;;  %v3213_v21 = vsel %vm473_vm0, %v702_v12, %v703_v6  ;;  %v705_v59 = vrot.slane %v3216_v4, 1 }
 0x15b   : > { %v3206_v14 = vadd.f32 %v1241_v30, %v1129_v52  ;;  %952 = vmatmul.f32.gmra.mxu1 %v3176_v1  ;;  %1065 = vmatmul.f32.gmra.mxu2 %v3198_v39  ;;  %v3219_v30 = vsel %vm586_vm1, %v663_v36, %v665_v5  ;;  %v3230_v36 = vsel %vm473_vm0, %v703_v6, %v705_v59 }
 0x15d   : > { %3669 = vst [vmem:[#allocation52_spill] sm:$0xff] %v3206_v14  ;;  %1178 = vmatmul.f32.gmra.mxu3 %v3201_v19 }
 0x15e   : > { %v1018_v49 = vpop.f32.mrf.mxu2  ;;  %v1244_v63 = vpop.f32.mrf.mxu0 }
 0x15f   : > { %v1019_v18 = vadd.f32 %v1018_v49, %v906_v37 }
 0x160   : > { %v908_v24 = vpop.f32.mrf.mxu1  ;;  %v1131_v52 = vpop.f32.mrf.mxu3 }
 0x161   : > { %v1132_v14 = vadd.f32 %v1131_v52, %v1019_v18  ;;  %1291 = vmatmul.f32.gmra.mxu0 %v3213_v21  ;;  %v909_v34 = vadd.f32 %v908_v24, %v2858_v50 }
 0x163   : > { %v3223_v44 = vadd.f32 %v1244_v63, %v1132_v14  ;;  %955 = vmatmul.f32.gmra.mxu1 %v3192_v55  ;;  %1068 = vmatmul.f32.gmra.mxu2 %v3219_v30  ;;  %v2094_v63 = vld [vmem:[%s2208_s22 + $0x30] sm:$0xff] }
 0x165   : > { %3670 = vst [vmem:[#allocation53_spill] sm:$0xff] %v3223_v44  ;;  %1181 = vmatmul.f32.gmra.mxu3 %v3195_v27 }
 0x166   : > { %v1021_v12 = vpop.f32.mrf.mxu2  ;;  %v1247_v37 = vpop.f32.mrf.mxu0 }
 0x167   : > { %v1022_v5 = vadd.f32 %v1021_v12, %v909_v34 }
 0x168   : > { %v911_v49 = vpop.f32.mrf.mxu1  ;;  %v1134_v18 = vpop.f32.mrf.mxu3 }
 0x169   : > { %v1135_v52 = vadd.f32 %v1134_v18, %v1022_v5  ;;  %1294 = vmatmul.f32.gmra.mxu0 %v3230_v36  ;;  %v912_v50 = vadd.f32 %v911_v49, %v2688_v10  ;;  %v2095_v10 = vld [vmem:[%s2208_s22 + $0x38] sm:$0xff] }
 0x16b   : > { %v3233_v14 = vadd.f32 %v1247_v37, %v1135_v52  ;;  %1314 = vmatmul.f32.vlgmr.msra.gmra.mxu1 %v2564_v33  ;;  %1427 = vmatmul.f32.vlgmr.msra.gmra.mxu2 %v2094_v63  ;;  %v2122_v33 = vmov 0.0   ;;  %v2096_v52 = vld [vmem:[%s2208_s22 + $0x48] sm:$0xff] }
 0x16c   : > { %326 = vst [vmem:[%s3245_s30] sm:$0xff] %v2122_v33 }
 0x16d   : > { %1540 = vmatmul.f32.vlgmr.msra.gmra.mxu3 %v2580_v40  ;;  %327 = vst [vmem:[%s3245_s30 + $0x8] sm:$0xff] %v2122_v33 }
 0x16e   : > { %v1024_v24 = vpop.f32.mrf.mxu2  ;;  %v1250_v6 = vpop.f32.mrf.mxu0  ;;  %328 = vst [vmem:[%s3245_s30 + $0x10] sm:$0x3] %v2122_v33 }
 0x16f   : > { %v1025_v59 = vadd.f32 %v1024_v24, %v912_v50  ;;  %1991 = vst [vmem:[%s3245_s30 + $0x198] sm:$0xff] %v2122_v33 }
 0x170   : > { %v914_v34 = vpop.f32.mrf.mxu1  ;;  %v1137_v12 = vpop.f32.mrf.mxu3  ;;  %1992 = vst [vmem:[%s3245_s30 + $0x1a0] sm:$0xff] %v2122_v33 }
 0x171   : > { %v1138_v44 = vadd.f32 %v1137_v12, %v1025_v59  ;;  %1653 = vmatmul.f32.vlgmr.msra.gmra.mxu0 %v2598_v54  ;;  %v915_v37 = vadd.f32 %v914_v34, %v2715_v56  ;;  %1993 = vst [vmem:[%s3245_s30 + $0x1a8] sm:$0x3] %v2122_v33  ;;  %v2097_v34 = vld [vmem:[%s2208_s22 + $0x50] sm:$0xff] }
 0x172   : > { %334 = vst [vmem:[%s3245_s30 + $0x18] sm:$0x1] %v2122_v33 }
 0x173   : > { %v3249_v40 = vadd.f32 %v1250_v6, %v1138_v44  ;;  %1317 = vmatmul.f32.gmra.mxu1 %v2584_v43  ;;  %1430 = vmatmul.f32.gmra.mxu2 %v2095_v10  ;;  %335 = vst [vmem:[%s3245_s30 + $0x30] sm:$0x1] %v2122_v33 }
 0x174   : > { %336 = vst [vmem:[%s3245_s30 + $0x48] sm:$0x1] %v2122_v33 }
 0x175   : > { %1543 = vmatmul.f32.gmra.mxu3 %v2595_v53  ;;  %337 = vst [vmem:[%s3245_s30 + $0x60] sm:$0x1] %v2122_v33 }
 0x176   : > { %v1027_v44 = vpop.f32.mrf.mxu2  ;;  %v1253_v5 = vpop.f32.mrf.mxu0  ;;  %338 = vst [vmem:[%s3245_s30 + $0x78] sm:$0x1] %v2122_v33 }
 0x177   : > { %v1028_v43 = vadd.f32 %v1027_v44, %v915_v37  ;;  %339 = vst [vmem:[%s3245_s30 + $0x90] sm:$0x1] %v2122_v33 }
 0x178   : > { %v917_v49 = vpop.f32.mrf.mxu1  ;;  %v1140_v18 = vpop.f32.mrf.mxu3  ;;  %340 = vst [vmem:[%s3245_s30 + $0xa8] sm:$0x1] %v2122_v33 }
 0x179   : > { %v1141_v56 = vadd.f32 %v1140_v18, %v1028_v43  ;;  %1656 = vmatmul.f32.gmra.mxu0 %v2620_v3  ;;  %v918_v63 = vadd.f32 %v917_v49, %v2741_v9  ;;  %341 = vst [vmem:[%s3245_s30 + $0xc0] sm:$0x1] %v2122_v33  ;;  %v2098_v43 = vld [vmem:[%s2208_s22 + $0x60] sm:$0xff] }
 0x17a   : > { %342 = vst [vmem:[%s3245_s30 + $0xd8] sm:$0x1] %v2122_v33 }
 0x17b   : > { %v3272_v53 = vadd.f32 %v1253_v5, %v1141_v56  ;;  %1320 = vmatmul.f32.gmra.mxu1 %v2598_v54  ;;  %1433 = vmatmul.f32.gmra.mxu2 %v2096_v52  ;;  %343 = vst [vmem:[%s3245_s30 + $0xf0] sm:$0x1] %v2122_v33 }
 0x17c   : > { %344 = vst [vmem:[%s3245_s30 + $0x108] sm:$0x1] %v2122_v33 }
 0x17d   : > { %1546 = vmatmul.f32.gmra.mxu3 %v2613_v0  ;;  %345 = vst [vmem:[%s3245_s30 + $0x120] sm:$0x1] %v2122_v33 }
 0x17e   : > { %v1030_v50 = vpop.f32.mrf.mxu2  ;;  %v1256_v24 = vpop.f32.mrf.mxu0  ;;  %346 = vst [vmem:[%s3245_s30 + $0x138] sm:$0x1] %v2122_v33 }
 0x17f   : > { %v1031_v54 = vadd.f32 %v1030_v50, %v918_v63  ;;  %347 = vst [vmem:[%s3245_s30 + $0x150] sm:$0x1] %v2122_v33  ;;  %v2099_v50 = vld [vmem:[%s2208_s22 + $0x68] sm:$0xff] }
 0x180   : > { %v920_v6 = vpop.f32.mrf.mxu1  ;;  %v1143_v59 = vpop.f32.mrf.mxu3  ;;  %348 = vst [vmem:[%s3245_s30 + $0x168] sm:$0x1] %v2122_v33 }
 0x181   : > { %v1144_v9 = vadd.f32 %v1143_v59, %v1031_v54  ;;  %1659 = vmatmul.f32.gmra.mxu0 %v2635_v42  ;;  %v921_v12 = vadd.f32 %v920_v6, %v2768_v32  ;;  %349 = vst [vmem:[%s3245_s30 + $0x180] sm:$0x1] %v2122_v33 }
 0x182   : > { %352 = vst [vmem:[%s3245_s30 + $0x29] sm:$0x1] %v2122_v33 }
 0x183   : > { %v3295_v0 = vadd.f32 %v1256_v24, %v1144_v9  ;;  %1323 = vmatmul.f32.gmra.mxu1 %v2620_v3  ;;  %1436 = vmatmul.f32.gmra.mxu2 %v2097_v34  ;;  %353 = vst [vmem:[%s3245_s30 + $0x41] sm:$0x1] %v2122_v33 }
 0x184   : > { %354 = vst [vmem:[%s3245_s30 + $0x59] sm:$0x1] %v2122_v33 }
 0x185   : > { %1549 = vmatmul.f32.gmra.mxu3 %v2632_v26  ;;  %355 = vst [vmem:[%s3245_s30 + $0x71] sm:$0x1] %v2122_v33 }
 0x186   : > { %v1033_v10 = vpop.f32.mrf.mxu2  ;;  %v1259_v37 = vpop.f32.mrf.mxu0  ;;  %356 = vst [vmem:[%s3245_s30 + $0x89] sm:$0x1] %v2122_v33 }
 0x187   : > { %v1034_v3 = vadd.f32 %v1033_v10, %v921_v12  ;;  %357 = vst [vmem:[%s3245_s30 + $0xa1] sm:$0x1] %v2122_v33 }
 0x188   : > { %v923_v44 = vpop.f32.mrf.mxu1  ;;  %v1146_v5 = vpop.f32.mrf.mxu3  ;;  %358 = vst [vmem:[%s3245_s30 + $0xb9] sm:$0x1] %v2122_v33 }
 0x189   : > { %v1147_v32 = vadd.f32 %v1146_v5, %v1034_v3  ;;  %1662 = vmatmul.f32.gmra.mxu0 %v2657_v20  ;;  %v924_v49 = vadd.f32 %v923_v44, %v2794_v62  ;;  %359 = vst [vmem:[%s3245_s30 + $0xd1] sm:$0x1] %v2122_v33 }
 0x18a   : > { %360 = vst [vmem:[%s3245_s30 + $0xe9] sm:$0x1] %v2122_v33 }
 0x18b   : > { %v3318_v26 = vadd.f32 %v1259_v37, %v1147_v32  ;;  %1326 = vmatmul.f32.gmra.mxu1 %v2635_v42  ;;  %1439 = vmatmul.f32.gmra.mxu2 %v2098_v43  ;;  %361 = vst [vmem:[%s3245_s30 + $0x101] sm:$0x1] %v2122_v33 }
 0x18c   : > { %362 = vst [vmem:[%s3245_s30 + $0x119] sm:$0x1] %v2122_v33 }
 0x18d   : > { %1552 = vmatmul.f32.gmra.mxu3 %v2650_v13  ;;  %363 = vst [vmem:[%s3245_s30 + $0x131] sm:$0x1] %v2122_v33 }
 0x18e   : > { %v1036_v18 = vpop.f32.mrf.mxu2  ;;  %v1262_v56 = vpop.f32.mrf.mxu0  ;;  %364 = vst [vmem:[%s3245_s30 + $0x149] sm:$0x1] %v2122_v33 }
 0x18f   : > { %v1037_v42 = vadd.f32 %v1036_v18, %v924_v49  ;;  %365 = vst [vmem:[%s3245_s30 + $0x161] sm:$0x1] %v2122_v33 }
 0x190   : > { %v926_v52 = vpop.f32.mrf.mxu1  ;;  %v1149_v63 = vpop.f32.mrf.mxu3  ;;  %366 = vst [vmem:[%s3245_s30 + $0x179] sm:$0x1] %v2122_v33 }
 0x191   : > { %v1150_v62 = vadd.f32 %v1149_v63, %v1037_v42  ;;  %1665 = vmatmul.f32.gmra.mxu0 %v2674_v28  ;;  %v927_v24 = vadd.f32 %v926_v52, %v2821_v16  ;;  %367 = vst [vmem:[%s3245_s30 + $0x191] sm:$0x1] %v2122_v33  ;;  %v2100_v16 = vld [vmem:[%s2208_s22 + $0x78] sm:$0xff]  ;;  %v3672_v63 = vld [vmem:[#allocation7_spill] sm:$0xff] }
 0x192   : > { %333 = vst [vmem:[%s3245_s30] sm:$0x1] %v2122_v33 }
 0x193   : > { %v3341_v13 = vadd.f32 %v1262_v56, %v1150_v62  ;;  %1329 = vmatmul.f32.gmra.mxu1 %v2657_v20  ;;  %1442 = vmatmul.f32.gmra.mxu2 %v2099_v50  ;;  %350 = vst [vmem:[%s3245_s30 + $0x198] sm:$0x1] %v2122_v33  ;;  %v3673_v50 = vld [vmem:[#allocation2_spill] sm:$0xff] }
 0x194   : > { %351 = vst [vmem:[%s3245_s30 + $0x11] sm:$0x1] %v2122_v33 }
 0x195   : > { %1555 = vmatmul.f32.gmra.mxu3 %v2669_v25  ;;  %368 = vst [vmem:[%s3245_s30 + $0x1a9] sm:$0x1] %v2122_v33 }
 0x196   : > { %v1039_v54 = vpop.f32.mrf.mxu2  ;;  %v1265_v6 = vpop.f32.mrf.mxu0 }
 0x197   : > { %v1040_v20 = vadd.f32 %v1039_v54, %v927_v24 }
 0x198   : > { %v929_v59 = vpop.f32.mrf.mxu1  ;;  %v1152_v9 = vpop.f32.mrf.mxu3 }
 0x199   : > { %v1153_v34 = vadd.f32 %v1152_v9, %v1040_v20  ;;  %1668 = vmatmul.f32.gmra.mxu0 %v2704_v48  ;;  %v930_v12 = vadd.f32 %v929_v59, %v2847_v29  ;;  %v3671_v29 = vld [vmem:[#allocation3_spill] sm:$0xff] }
 0x19b   : > { %v3364_v25 = vadd.f32 %v1265_v6, %v1153_v34  ;;  %1332 = vmatmul.f32.gmra.mxu1 %v2674_v28  ;;  %1445 = vmatmul.f32.gmra.mxu2 %v2100_v16  ;;  %v2101_v28 = vld [vmem:[%s2208_s22 + $0x80] sm:$0xff] }
 0x19c   : > { %v3675_v16 = vld [vmem:[#allocation10_spill] sm:$0xff] }
 0x19d   : > { %1558 = vmatmul.f32.gmra.mxu3 %v2693_v38 }
 0x19e   : > { %v1042_v10 = vpop.f32.mrf.mxu2  ;;  %v1268_v37 = vpop.f32.mrf.mxu0 }
 0x19f   : > { %v1043_v3 = vadd.f32 %v1042_v10, %v930_v12  ;;  %v3676_v10 = vld [vmem:[#allocation4_spill] sm:$0xff] }
 0x1a0   : > { %v932_v44 = vpop.f32.mrf.mxu1  ;;  %v1155_v5 = vpop.f32.mrf.mxu3 }
 0x1a1   : > { %v1156_v32 = vadd.f32 %v1155_v5, %v1043_v3  ;;  %1671 = vmatmul.f32.gmra.mxu0 %v2727_v46  ;;  %v933_v33 = vadd.f32 %v932_v44, %v2874_v35  ;;  %v3674_v35 = vld [vmem:[#allocation5_spill] sm:$0xff]  ;;  %v3677_v3 = vld [vmem:[#allocation8_spill] sm:$0xff] }
 0x1a3   : > { %v3373_v43 = vadd.f32 %v1268_v37, %v1156_v32  ;;  %1335 = vmatmul.f32.gmra.mxu1 %v2704_v48  ;;  %1448 = vmatmul.f32.gmra.mxu2 %v2101_v28  ;;  %v2102_v48 = vld [vmem:[%s2208_s22 + $0x90] sm:$0xff] }
 0x1a5   : > { %1561 = vmatmul.f32.gmra.mxu3 %v3671_v29 }
 0x1a6   : > { %v1045_v38 = vpop.f32.mrf.mxu2  ;;  %v1271_v49 = vpop.f32.mrf.mxu0 }
 0x1a7   : > { %v1046_v18 = vadd.f32 %v1045_v38, %v933_v33  ;;  %v3678_v38 = vld [vmem:[#allocation13_spill] sm:$0xff] }
 0x1a8   : > { %v935_v56 = vpop.f32.mrf.mxu1  ;;  %v1158_v42 = vpop.f32.mrf.mxu3 }
 0x1a9   : > { %v1159_v52 = vadd.f32 %v1158_v42, %v1046_v18  ;;  %1674 = vmatmul.f32.gmra.mxu0 %v3672_v63  ;;  %v936_v24 = vadd.f32 %v935_v56, %v3673_v50  ;;  %v2104_v18 = vld [vmem:[%s2208_s22 + $0xa8] sm:$0xff]  ;;  %v3679_v56 = vld [vmem:[#allocation6_spill] sm:$0xff] }
 0x1ab   : > { %v3380_v62 = vadd.f32 %v1271_v49, %v1159_v52  ;;  %1338 = vmatmul.f32.gmra.mxu1 %v2727_v46  ;;  %1451 = vmatmul.f32.gmra.mxu2 %v2102_v48  ;;  %v2103_v46 = vld [vmem:[%s2208_s22 + $0x98] sm:$0xff]  ;;  %v3680_v52 = vld [vmem:[#allocation11_spill] sm:$0xff] }
 0x1ad   : > { %1564 = vmatmul.f32.gmra.mxu3 %v3674_v35 }
 0x1ae   : > { %v1048_v54 = vpop.f32.mrf.mxu2  ;;  %v1274_v6 = vpop.f32.mrf.mxu0 }
 0x1af   : > { %v1049_v20 = vadd.f32 %v1048_v54, %v936_v24 }
 0x1b0   : > { %v938_v59 = vpop.f32.mrf.mxu1  ;;  %v1161_v9 = vpop.f32.mrf.mxu3 }
 0x1b1   : > { %v1162_v34 = vadd.f32 %v1161_v9, %v1049_v20  ;;  %1677 = vmatmul.f32.gmra.mxu0 %v3675_v16  ;;  %v939_v37 = vadd.f32 %v938_v59, %v3676_v10  ;;  %v2105_v59 = vld [vmem:[%s2208_s22 + $0xb0] sm:$0xff]  ;;  %v3682_v9 = vld [vmem:[#allocation9_spill] sm:$0xff] }
 0x1b3   : > { %v3387_v12 = vadd.f32 %v1274_v6, %v1162_v34  ;;  %1341 = vmatmul.f32.gmra.mxu1 %v3672_v63  ;;  %1454 = vmatmul.f32.gmra.mxu2 %v2103_v46  ;;  %v3681_v6 = vld [vmem:[#allocation16_spill] sm:$0xff] }
 0x1b5   : > { %1567 = vmatmul.f32.gmra.mxu3 %v3677_v3 }
 0x1b6   : > { %v1051_v44 = vpop.f32.mrf.mxu2  ;;  %v1277_v5 = vpop.f32.mrf.mxu0 }
 0x1b7   : > { %v1052_v32 = vadd.f32 %v1051_v44, %v939_v37 }
 0x1b8   : > { %v941_v28 = vpop.f32.mrf.mxu1  ;;  %v1164_v33 = vpop.f32.mrf.mxu3 }
 0x1b9   : > { %v1165_v29 = vadd.f32 %v1164_v33, %v1052_v32  ;;  %1680 = vmatmul.f32.gmra.mxu0 %v3678_v38  ;;  %v942_v42 = vadd.f32 %v941_v28, %v3679_v56  ;;  %v3684_v32 = vld [vmem:[#allocation19_spill] sm:$0xff]  ;;  %v2106_v33 = vld [vmem:[%s2208_s22 + $0xc0] sm:$0xff] }
 0x1bb   : > { %v3394_v49 = vadd.f32 %v1277_v5, %v1165_v29  ;;  %1344 = vmatmul.f32.gmra.mxu1 %v3675_v16  ;;  %1457 = vmatmul.f32.gmra.mxu2 %v2104_v18  ;;  %v3683_v16 = vld [vmem:[#allocation14_spill] sm:$0xff]  ;;  %v3685_v29 = vld [vmem:[#allocation12_spill] sm:$0xff]  ;;  %v3686_v18 = vld [vmem:[#allocation17_spill] sm:$0xff] }
 0x1bd   : > { %1570 = vmatmul.f32.gmra.mxu3 %v3680_v52 }
 0x1be   : > { %v1054_v63 = vpop.f32.mrf.mxu2  ;;  %v1280_v48 = vpop.f32.mrf.mxu0 }
 0x1bf   : > { %v1055_v50 = vadd.f32 %v1054_v63, %v942_v42 }
 0x1c0   : > { %v944_v24 = vpop.f32.mrf.mxu1  ;;  %v1167_v35 = vpop.f32.mrf.mxu3 }
 0x1c1   : > { %v1168_v54 = vadd.f32 %v1167_v35, %v1055_v50  ;;  %1683 = vmatmul.f32.gmra.mxu0 %v3681_v6  ;;  %v945_v34 = vadd.f32 %v944_v24, %v3682_v9  ;;  %v3687_v24 = vld [vmem:[#allocation21_spill] sm:$0xff] }
 0x1c3   : > { %v3401_v20 = vadd.f32 %v1280_v48, %v1168_v54  ;;  %1347 = vmatmul.f32.gmra.mxu1 %v3678_v38  ;;  %1460 = vmatmul.f32.gmra.mxu2 %v2105_v59  ;;  %v2107_v54 = vld [vmem:[%s2208_s22 + $0xc8] sm:$0xff] }
 0x1c5   : > { %1573 = vmatmul.f32.gmra.mxu3 %v3683_v16 }
 0x1c6   : > { %v1057_v46 = vpop.f32.mrf.mxu2  ;;  %v1283_v10 = vpop.f32.mrf.mxu0 }
 0x1c7   : > { %v1058_v37 = vadd.f32 %v1057_v46, %v945_v34 }
 0x1c8   : > { %v947_v3 = vpop.f32.mrf.mxu1  ;;  %v1170_v44 = vpop.f32.mrf.mxu3 }
 0x1c9   : > { %v1171_v5 = vadd.f32 %v1170_v44, %v1058_v37  ;;  %1686 = vmatmul.f32.gmra.mxu0 %v3684_v32  ;;  %v948_v38 = vadd.f32 %v947_v3, %v3685_v29  ;;  %v2108_v44 = vld [vmem:[%s2208_s22 + $0xd8] sm:$0xff] }
 0x1cb   : > { %v3408_v28 = vadd.f32 %v1283_v10, %v1171_v5  ;;  %1350 = vmatmul.f32.gmra.mxu1 %v3681_v6  ;;  %1463 = vmatmul.f32.gmra.mxu2 %v2106_v33  ;;  %v3688_v6 = vld [vmem:[#allocation15_spill] sm:$0xff]  ;;  %v3689_v5 = vld [vmem:[#allocation18_spill] sm:$0xff] }
 0x1cd   : > { %1576 = vmatmul.f32.gmra.mxu3 %v3686_v18 }
 0x1ce   : > { %v1060_v56 = vpop.f32.mrf.mxu2  ;;  %v1286_v42 = vpop.f32.mrf.mxu0 }
 0x1cf   : > { %v1061_v52 = vadd.f32 %v1060_v56, %v948_v38 }
 0x1d0   : > { %v950_v63 = vpop.f32.mrf.mxu1  ;;  %v1173_v48 = vpop.f32.mrf.mxu3 }
 0x1d1   : > { %v1174_v50 = vadd.f32 %v1173_v48, %v1061_v52  ;;  %1689 = vmatmul.f32.gmra.mxu0 %v3687_v24  ;;  %v951_v59 = vadd.f32 %v950_v63, %v3688_v6  ;;  %v2109_v52 = vld [vmem:[%s2208_s22 + $0xe0] sm:$0xff]  ;;  %v3690_v63 = vld [vmem:[#allocation20_spill] sm:$0xff] }
 0x1d3   : > { %v3415_v35 = vadd.f32 %v1286_v42, %v1174_v50  ;;  %1353 = vmatmul.f32.gmra.mxu1 %v3684_v32  ;;  %1466 = vmatmul.f32.gmra.mxu2 %v2107_v54 }
 0x1d5   : > { %1579 = vmatmul.f32.gmra.mxu3 %v2879_v8 }
 0x1d6   : > { %v1063_v9 = vpop.f32.mrf.mxu2  ;;  %v1289_v34 = vpop.f32.mrf.mxu0 }
 0x1d7   : > { %v1064_v16 = vadd.f32 %v1063_v9, %v951_v59 }
 0x1d8   : > { %v953_v46 = vpop.f32.mrf.mxu1  ;;  %v1176_v10 = vpop.f32.mrf.mxu3 }
 0x1d9   : > { %v1177_v37 = vadd.f32 %v1176_v10, %v1064_v16  ;;  %1692 = vmatmul.f32.gmra.mxu0 %v2907_v23  ;;  %v954_v32 = vadd.f32 %v953_v46, %v3689_v5 }
 0x1db   : > { %v3422_v3 = vadd.f32 %v1289_v34, %v1177_v37  ;;  %1356 = vmatmul.f32.gmra.mxu1 %v3687_v24  ;;  %1469 = vmatmul.f32.gmra.mxu2 %v2108_v44  ;;  %v3691_v34 = vld [vmem:[#allocation22_spill] sm:$0xff] }
 0x1dd   : > { %1582 = vmatmul.f32.gmra.mxu3 %v2900_v7 }
 0x1de   : > { %v1066_v8 = vpop.f32.mrf.mxu2  ;;  %v1292_v33 = vpop.f32.mrf.mxu0 }
 0x1df   : > { %v1067_v29 = vadd.f32 %v1066_v8, %v954_v32  ;;  %v3692_v8 = vld [vmem:[#allocation23_spill] sm:$0xff] }
 0x1e0   : > { %v956_v38 = vpop.f32.mrf.mxu1  ;;  %v1179_v18 = vpop.f32.mrf.mxu3 }
 0x1e1   : > { %v1180_v56 = vadd.f32 %v1179_v18, %v1067_v29  ;;  %1695 = vmatmul.f32.gmra.mxu0 %v2925_v47  ;;  %v957_v48 = vadd.f32 %v956_v38, %v3690_v63 }
 0x1e3   : > { %v3429_v42 = vadd.f32 %v1292_v33, %v1180_v56  ;;  %1359 = vmatmul.f32.gmra.mxu1 %v2907_v23  ;;  %1472 = vmatmul.f32.gmra.mxu2 %v2109_v52  ;;  %v2110_v23 = vld [vmem:[%s2208_s22 + $0xf0] sm:$0xff] }
 0x1e5   : > { %1585 = vmatmul.f32.gmra.mxu3 %v2922_v45 }
 0x1e6   : > { %v1069_v7 = vpop.f32.mrf.mxu2  ;;  %v1295_v50 = vpop.f32.mrf.mxu0 }
 0x1e7   : > { %v1070_v24 = vadd.f32 %v1069_v7, %v957_v48  ;;  %v3693_v7 = vld [vmem:[#allocation24_spill] sm:$0xff] }
 0x1e8   : > { %v1182_v54 = vpop.f32.mrf.mxu3  ;;  %v1315_v6 = vpop.f32.mrf.mxu1 }
 0x1e9   : > { %v1183_v59 = vadd.f32 %v1182_v54, %v1070_v24  ;;  %1698 = vmatmul.f32.gmra.mxu0 %v2950_v60  ;;  %v1316_v16 = vadd.f32 %v1315_v6, %v3691_v34  ;;  %v3694_v54 = vld [vmem:[#allocation26_spill] sm:$0xff] }
 0x1eb   : > { %v3436_v9 = vadd.f32 %v1295_v50, %v1183_v59  ;;  %1362 = vmatmul.f32.gmra.mxu1 %v2925_v47  ;;  %1475 = vmatmul.f32.gmra.mxu2 %v2110_v23  ;;  %v2111_v47 = vld [vmem:[%s2208_s22 + $0xf8] sm:$0xff] }
 0x1ed   : > { %1588 = vmatmul.f32.gmra.mxu3 %v2943_v58 }
 0x1ee   : > { %v1428_v45 = vpop.f32.mrf.mxu2  ;;  %v1654_v46 = vpop.f32.mrf.mxu0 }
 0x1ef   : > { %v1429_v10 = vadd.f32 %v1428_v45, %v1316_v16 }
 0x1f0   : > { %v1318_v37 = vpop.f32.mrf.mxu1  ;;  %v1541_v44 = vpop.f32.mrf.mxu3 }
 0x1f1   : > { %v1542_v5 = vadd.f32 %v1541_v44, %v1429_v10  ;;  %1701 = vmatmul.f32.gmra.mxu0 %v2968_v15  ;;  %v1319_v33 = vadd.f32 %v1318_v37, %v3692_v8  ;;  %v2113_v37 = vld [vmem:[%s2208_s22 + $0x110] sm:$0xff]  ;;  %v3696_v44 = vld [vmem:[#allocation25_spill] sm:$0xff] }
 0x1f3   : > { %v1655_v32 = vadd.f32 %v1654_v46, %v1542_v5  ;;  %1365 = vmatmul.f32.gmra.mxu1 %v2950_v60  ;;  %1478 = vmatmul.f32.gmra.mxu2 %v2111_v47  ;;  %v2112_v60 = vld [vmem:[%s2208_s22 + $0x108] sm:$0xff] }
 0x1f5   : > { %1994 = vst [vmem:[%s3245_s30 + $0x19] sm:$0xff] %v1655_v32  ;;  %1591 = vmatmul.f32.gmra.mxu3 %v2965_v17  ;;  %v1788_v48 = vmul.f32 %v1655_v32, %v1655_v32 }
 0x1f6   : > { %v1431_v58 = vpop.f32.mrf.mxu2  ;;  %v1657_v29 = vpop.f32.mrf.mxu0 }
 0x1f7   : > { %v1432_v38 = vadd.f32 %v1431_v58, %v1319_v33 }
 0x1f8   : > { %v1321_v18 = vpop.f32.mrf.mxu1  ;;  %v1544_v56 = vpop.f32.mrf.mxu3 }
 0x1f9   : > { %v1545_v52 = vadd.f32 %v1544_v56, %v1432_v38  ;;  %1704 = vmatmul.f32.gmra.mxu0 %v2993_v11  ;;  %v1322_v50 = vadd.f32 %v1321_v18, %v3693_v7 }
 0x1fb   : > { %v1658_v63 = vadd.f32 %v1657_v29, %v1545_v52  ;;  %1368 = vmatmul.f32.gmra.mxu1 %v2968_v15  ;;  %1481 = vmatmul.f32.gmra.mxu2 %v2112_v60  ;;  %v3695_v15 = vld [vmem:[#allocation28_spill] sm:$0xff]  ;;  %v3697_v52 = vld [vmem:[#allocation29_spill] sm:$0xff] }
 0x1fd   : > { %v1750_v24 = vadd.f32 %v1658_v63, %v1655_v32  ;;  %v1789_v17 = vmul.f32 %v1658_v63, %v1658_v63  ;;  %1995 = vst [vmem:[%s3245_s30 + $0x21] sm:$0xff] %v1658_v63  ;;  %1594 = vmatmul.f32.gmra.mxu3 %v3694_v54  ;;  %v3698_v63 = vld [vmem:[#allocation27_spill] sm:$0xff] }
 0x1fe   : > { %v1434_v6 = vpop.f32.mrf.mxu2  ;;  %v1660_v59 = vpop.f32.mrf.mxu0 }
 0x1ff   : > { %v1820_v23 = vadd.f32 %v1789_v17, %v1788_v48  ;;  %v1435_v34 = vadd.f32 %v1434_v6, %v1322_v50 }
 0x200   : > { %v1324_v16 = vpop.f32.mrf.mxu1  ;;  %v1547_v45 = vpop.f32.mrf.mxu3 }
 0x201   : > { %v1548_v46 = vadd.f32 %v1547_v45, %v1435_v34  ;;  %1707 = vmatmul.f32.gmra.mxu0 %v3695_v15  ;;  %v1325_v5 = vadd.f32 %v1324_v16, %v3696_v44  ;;  %v3700_v34 = vld [vmem:[#allocation34_spill] sm:$0xff] }
 0x202   : > { %v3701_v45 = vld [vmem:[#allocation30_spill] sm:$0xff] }
 0x203   : > { %v1661_v10 = vadd.f32 %v1660_v59, %v1548_v46  ;;  %1371 = vmatmul.f32.gmra.mxu1 %v2993_v11  ;;  %1484 = vmatmul.f32.gmra.mxu2 %v2113_v37  ;;  %v3702_v46 = vld [vmem:[#allocation31_spill] sm:$0xff] }
 0x205   : > { %v1751_v32 = vadd.f32 %v1750_v24, %v1661_v10  ;;  %v1790_v47 = vmul.f32 %v1661_v10, %v1661_v10  ;;  %1996 = vst [vmem:[%s3245_s30 + $0x31] sm:$0xff] %v1661_v10  ;;  %1597 = vmatmul.f32.gmra.mxu3 %v3008_v22  ;;  %v3699_v22 = vld [vmem:[#allocation32_spill] sm:$0xff] }
 0x206   : > { %v1437_v8 = vpop.f32.mrf.mxu2  ;;  %v1663_v33 = vpop.f32.mrf.mxu0 }
 0x207   : > { %v1821_v58 = vadd.f32 %v1820_v23, %v1790_v47  ;;  %v1438_v29 = vadd.f32 %v1437_v8, %v1325_v5 }
 0x208   : > { %v1327_v38 = vpop.f32.mrf.mxu1  ;;  %v1550_v18 = vpop.f32.mrf.mxu3 }
 0x209   : > { %v1551_v56 = vadd.f32 %v1550_v18, %v1438_v29  ;;  %1710 = vmatmul.f32.gmra.mxu0 %v3042_v51  ;;  %v1328_v60 = vadd.f32 %v1327_v38, %v3698_v63  ;;  %v3703_v29 = vld [vmem:[#allocation35_spill] sm:$0xff]  ;;  %v3704_v38 = vld [vmem:[#allocation33_spill] sm:$0xff] }
 0x20b   : > { %v1664_v11 = vadd.f32 %v1663_v33, %v1551_v56  ;;  %1374 = vmatmul.f32.gmra.mxu1 %v3695_v15  ;;  %1487 = vmatmul.f32.gmra.mxu2 %v3697_v52 }
 0x20d   : > { %v1752_v48 = vadd.f32 %v1751_v32, %v1664_v11  ;;  %v1791_v7 = vmul.f32 %v1664_v11, %v1664_v11  ;;  %1997 = vst [vmem:[%s3245_s30 + $0x39] sm:$0xff] %v1664_v11  ;;  %1600 = vmatmul.f32.gmra.mxu3 %v3699_v22 }
 0x20e   : > { %v1440_v50 = vpop.f32.mrf.mxu2  ;;  %v1666_v24 = vpop.f32.mrf.mxu0 }
 0x20f   : > { %v1822_v17 = vadd.f32 %v1821_v58, %v1791_v7  ;;  %v1441_v54 = vadd.f32 %v1440_v50, %v1328_v60 }
 0x210   : > { %v1330_v6 = vpop.f32.mrf.mxu1  ;;  %v1553_v59 = vpop.f32.mrf.mxu3 }
 0x211   : > { %v1554_v23 = vadd.f32 %v1553_v59, %v1441_v54  ;;  %1713 = vmatmul.f32.gmra.mxu0 %v3700_v34  ;;  %v1331_v15 = vadd.f32 %v1330_v6, %v3702_v46  ;;  %v3707_v54 = vld [vmem:[#allocation36_spill] sm:$0xff]  ;;  %v3708_v6 = vld [vmem:[#allocation37_spill] sm:$0xff] }
 0x213   : > { %v1667_v16 = vadd.f32 %v1666_v24, %v1554_v23  ;;  %1377 = vmatmul.f32.gmra.mxu1 %v3042_v51  ;;  %1490 = vmatmul.f32.gmra.mxu2 %v3701_v45  ;;  %v3706_v24 = vld [vmem:[#allocation41_spill] sm:$0xff] }
 0x215   : > { %v1753_v10 = vadd.f32 %v1752_v48, %v1667_v16  ;;  %v1792_v37 = vmul.f32 %v1667_v16, %v1667_v16  ;;  %1998 = vst [vmem:[%s3245_s30 + $0x49] sm:$0xff] %v1667_v16  ;;  %1603 = vmatmul.f32.gmra.mxu3 %v3057_v31  ;;  %v3705_v31 = vld [vmem:[#allocation38_spill] sm:$0xff]  ;;  %v3709_v16 = vld [vmem:[#allocation40_spill] sm:$0xff] }
 0x216   : > { %v1443_v44 = vpop.f32.mrf.mxu2  ;;  %v1669_v5 = vpop.f32.mrf.mxu0 }
 0x217   : > { %v1823_v32 = vadd.f32 %v1822_v17, %v1792_v37  ;;  %v1444_v47 = vadd.f32 %v1443_v44, %v1331_v15 }
 0x218   : > { %v1333_v8 = vpop.f32.mrf.mxu1  ;;  %v1556_v33 = vpop.f32.mrf.mxu3 }
 0x219   : > { %v1557_v58 = vadd.f32 %v1556_v33, %v1444_v47  ;;  %1716 = vmatmul.f32.gmra.mxu0 %v3091_v57  ;;  %v1334_v18 = vadd.f32 %v1333_v8, %v3704_v38  ;;  %v3711_v47 = vld [vmem:[#allocation42_spill] sm:$0xff]  ;;  %v3712_v8 = vld [vmem:[#allocation39_spill] sm:$0xff] }
 0x21b   : > { %v1670_v51 = vadd.f32 %v1669_v5, %v1557_v58  ;;  %1380 = vmatmul.f32.gmra.mxu1 %v3700_v34  ;;  %1493 = vmatmul.f32.gmra.mxu2 %v3703_v29 }
 0x21d   : > { %v1754_v56 = vadd.f32 %v1753_v10, %v1670_v51  ;;  %v1793_v11 = vmul.f32 %v1670_v51, %v1670_v51  ;;  %1999 = vst [vmem:[%s3245_s30 + $0x51] sm:$0xff] %v1670_v51  ;;  %1606 = vmatmul.f32.gmra.mxu3 %v3705_v31 }
 0x21e   : > { %v1446_v52 = vpop.f32.mrf.mxu2  ;;  %v1672_v63 = vpop.f32.mrf.mxu0 }
 0x21f   : > { %v1824_v60 = vadd.f32 %v1823_v32, %v1793_v11  ;;  %v1447_v48 = vadd.f32 %v1446_v52, %v1334_v18  ;;  %v3710_v32 = vld [vmem:[#allocation45_spill] sm:$0xff] }
 0x220   : > { %v1336_v7 = vpop.f32.mrf.mxu1  ;;  %v1559_v22 = vpop.f32.mrf.mxu3 }
 0x221   : > { %v1560_v50 = vadd.f32 %v1559_v22, %v1447_v48  ;;  %1719 = vmatmul.f32.gmra.mxu0 %v3706_v24  ;;  %v1337_v59 = vadd.f32 %v1336_v7, %v3708_v6  ;;  %v3714_v48 = vld [vmem:[#allocation44_spill] sm:$0xff] }
 0x223   : > { %v1673_v17 = vadd.f32 %v1672_v63, %v1560_v50  ;;  %1383 = vmatmul.f32.gmra.mxu1 %v3091_v57  ;;  %1496 = vmatmul.f32.gmra.mxu2 %v3707_v54 }
 0x225   : > { %v1755_v23 = vadd.f32 %v1754_v56, %v1673_v17  ;;  %v1794_v34 = vmul.f32 %v1673_v17, %v1673_v17  ;;  %2000 = vst [vmem:[%s3245_s30 + $0x61] sm:$0xff] %v1673_v17  ;;  %1609 = vmatmul.f32.gmra.mxu3 %v3709_v16 }
 0x226   : > { %v1449_v45 = vpop.f32.mrf.mxu2  ;;  %v1675_v46 = vpop.f32.mrf.mxu0 }
 0x227   : > { %v1825_v15 = vadd.f32 %v1824_v60, %v1794_v34  ;;  %v1450_v10 = vadd.f32 %v1449_v45, %v1337_v59  ;;  %v3713_v60 = vld [vmem:[#allocation43_spill] sm:$0xff]  ;;  %v3715_v34 = vld [vmem:[#allocation50_spill] sm:$0xff] }
 0x228   : > { %v1339_v37 = vpop.f32.mrf.mxu1  ;;  %v1562_v44 = vpop.f32.mrf.mxu3  ;;  %v3716_v45 = vld [vmem:[#allocation47_spill] sm:$0xff] }
 0x229   : > { %v1563_v5 = vadd.f32 %v1562_v44, %v1450_v10  ;;  %1722 = vmatmul.f32.gmra.mxu0 %v3710_v32  ;;  %v1340_v33 = vadd.f32 %v1339_v37, %v3712_v8 }
 0x22b   : > { %v1676_v57 = vadd.f32 %v1675_v46, %v1563_v5  ;;  %1386 = vmatmul.f32.gmra.mxu1 %v3706_v24  ;;  %1499 = vmatmul.f32.gmra.mxu2 %v3711_v47  ;;  %v3717_v46 = vld [vmem:[#allocation46_spill] sm:$0xff] }
 0x22d   : > { %v1756_v58 = vadd.f32 %v1755_v23, %v1676_v57  ;;  %v1795_v51 = vmul.f32 %v1676_v57, %v1676_v57  ;;  %2001 = vst [vmem:[%s3245_s30 + $0x69] sm:$0xff] %v1676_v57  ;;  %1612 = vmatmul.f32.gmra.mxu3 %v3133_v41 }
 0x22e   : > { %v1452_v29 = vpop.f32.mrf.mxu2  ;;  %v1678_v38 = vpop.f32.mrf.mxu0 }
 0x22f   : > { %v1826_v18 = vadd.f32 %v1825_v15, %v1795_v51  ;;  %v1453_v56 = vadd.f32 %v1452_v29, %v1340_v33  ;;  %v3718_v33 = vld [vmem:[#allocation48_spill] sm:$0xff] }
 0x230   : > { %v1342_v11 = vpop.f32.mrf.mxu1  ;;  %v1565_v31 = vpop.f32.mrf.mxu3 }
 0x231   : > { %v1566_v52 = vadd.f32 %v1565_v31, %v1453_v56  ;;  %1725 = vmatmul.f32.gmra.mxu0 %v3158_v2  ;;  %v1343_v7 = vadd.f32 %v1342_v11, %v3714_v48  ;;  %v710_v48 = vrot.slane %v3195_v27, 2 }
 0x233   : > { %v1679_v63 = vadd.f32 %v1678_v38, %v1566_v52  ;;  %1389 = vmatmul.f32.gmra.mxu1 %v3710_v32  ;;  %1502 = vmatmul.f32.gmra.mxu2 %v3713_v60  ;;  %v709_v60 = vrot.slane %v3201_v19, 2 }
 0x235   : > { %v1757_v22 = vadd.f32 %v1756_v58, %v1679_v63  ;;  %v1796_v50 = vmul.f32 %v1679_v63, %v1679_v63  ;;  %2002 = vst [vmem:[%s3245_s30 + $0x79] sm:$0xff] %v1679_v63  ;;  %1615 = vmatmul.f32.gmra.mxu3 %v3155_v61  ;;  %v3719_v58 = vld [vmem:[#allocation49_spill] sm:$0xff] }
 0x236   : > { %v1455_v41 = vpop.f32.mrf.mxu2  ;;  %v1681_v24 = vpop.f32.mrf.mxu0 }
 0x237   : > { %v1827_v17 = vadd.f32 %v1826_v18, %v1796_v50  ;;  %v1456_v54 = vadd.f32 %v1455_v41, %v1343_v7 }
 0x238   : > { %v1345_v6 = vpop.f32.mrf.mxu1  ;;  %v1568_v59 = vpop.f32.mrf.mxu3 }
 0x239   : > { %v1569_v23 = vadd.f32 %v1568_v59, %v1456_v54  ;;  %1728 = vmatmul.f32.gmra.mxu0 %v3715_v34  ;;  %v1346_v15 = vadd.f32 %v1345_v6, %v3717_v46  ;;  %v711_v54 = vsel %vm586_vm1, %v709_v60, %v710_v48  ;;  %v3721_v46 = vld [vmem:[#allocation52_spill] sm:$0xff] }
 0x23b   : > { %v1682_v16 = vadd.f32 %v1681_v24, %v1569_v23  ;;  %1392 = vmatmul.f32.gmra.mxu1 %v3158_v2  ;;  %1505 = vmatmul.f32.gmra.mxu2 %v3716_v45  ;;  %v422_v45 = vld [vmem:[%s2208_s22 + $0x198] sm:$0xff] }
 0x23d   : > { %v1758_v10 = vadd.f32 %v1757_v22, %v1682_v16  ;;  %v1797_v37 = vmul.f32 %v1682_v16, %v1682_v16  ;;  %2003 = vst [vmem:[%s3245_s30 + $0x81] sm:$0xff] %v1682_v16  ;;  %1618 = vmatmul.f32.gmra.mxu3 %v3176_v1 }
 0x23e   : > { %v1458_v61 = vpop.f32.mrf.mxu2  ;;  %v1684_v44 = vpop.f32.mrf.mxu0 }
 0x23f   : > { %v1828_v5 = vadd.f32 %v1827_v17, %v1797_v37  ;;  %v1459_v32 = vadd.f32 %v1458_v61, %v1346_v15 }
 0x240   : > { %v1348_v57 = vpop.f32.mrf.mxu1  ;;  %v1571_v47 = vpop.f32.mrf.mxu3 }
 0x241   : > { %v1572_v8 = vadd.f32 %v1571_v47, %v1459_v32  ;;  %1731 = vmatmul.f32.gmra.mxu0 %v3198_v39  ;;  %v1349_v51 = vadd.f32 %v1348_v57, %v3719_v58 }
 0x243   : > { %v1685_v2 = vadd.f32 %v1684_v44, %v1572_v8  ;;  %1395 = vmatmul.f32.gmra.mxu1 %v3715_v34  ;;  %1508 = vmatmul.f32.gmra.mxu2 %v3718_v33 }
 0x245   : > { %v1759_v29 = vadd.f32 %v1758_v10, %v1685_v2  ;;  %v1798_v38 = vmul.f32 %v1685_v2, %v1685_v2  ;;  %2004 = vst [vmem:[%s3245_s30 + $0x91] sm:$0xff] %v1685_v2  ;;  %1621 = vmatmul.f32.gmra.mxu3 %v3192_v55  ;;  %v3720_v55 = vld [vmem:[#allocation51_spill] sm:$0xff]  ;;  %v726_v2 = vrot.slane %v422_v45, 2 }
 0x246   : > { %v1461_v1 = vpop.f32.mrf.mxu2  ;;  %v1687_v18 = vpop.f32.mrf.mxu0 }
 0x247   : > { %v1829_v56 = vadd.f32 %v1828_v5, %v1798_v38  ;;  %v1462_v11 = vadd.f32 %v1461_v1, %v1349_v51  ;;  %v719_v5 = vrot.slane %v422_v45, 1 }
 0x248   : > { %v1351_v31 = vpop.f32.mrf.mxu1  ;;  %v1574_v52 = vpop.f32.mrf.mxu3 }
 0x249   : > { %v1575_v63 = vadd.f32 %v1574_v52, %v1462_v11  ;;  %1734 = vmatmul.f32.gmra.mxu0 %v3219_v30  ;;  %v1352_v22 = vadd.f32 %v1351_v31, %v3720_v55 }
 0x24b   : > { %v1688_v7 = vadd.f32 %v1687_v18, %v1575_v63  ;;  %1398 = vmatmul.f32.gmra.mxu1 %v3198_v39  ;;  %1511 = vmatmul.f32.gmra.mxu2 %v3201_v19  ;;  %v712_v19 = vrot.slane %v3216_v4, 2 }
 0x24d   : > { %v1760_v50 = vadd.f32 %v1759_v29, %v1688_v7  ;;  %v1799_v41 = vmul.f32 %v1688_v7, %v1688_v7  ;;  %2005 = vst [vmem:[%s3245_s30 + $0x99] sm:$0xff] %v1688_v7  ;;  %1624 = vmatmul.f32.gmra.mxu3 %v3213_v21  ;;  %v423_v21 = vld [vmem:[%s2208_s22 + $0x1a0] sm:$0xff]  ;;  %v713_v4 = vsel %vm586_vm1, %v710_v48, %v712_v19  ;;  %v3722_v29 = vld [vmem:[#allocation53_spill] sm:$0xff] }
 0x24e   : > { %v1464_v24 = vpop.f32.mrf.mxu2  ;;  %v1690_v17 = vpop.f32.mrf.mxu0  ;;  %v720_v32 = vrot.slane %v423_v21, 1  ;;  %v727_v58 = vrot.slane %v423_v21, 2 }
 0x24f   : > { %v1830_v6 = vadd.f32 %v1829_v56, %v1799_v41  ;;  %v1465_v59 = vadd.f32 %v1464_v24, %v1352_v22 }
 0x250   : > { %v1354_v23 = vpop.f32.mrf.mxu1  ;;  %v1577_v39 = vpop.f32.mrf.mxu3  ;;  %v721_v33 = vsel %vm473_vm0, %v719_v5, %v720_v32  ;;  %v728_v52 = vsel %vm586_vm1, %v726_v2, %v727_v58 }
 0x251   : > { %v1578_v34 = vadd.f32 %v1577_v39, %v1465_v59  ;;  %1737 = vmatmul.f32.gmra.mxu0 %v711_v54  ;;  %v1355_v15 = vadd.f32 %v1354_v23, %v3721_v46 }
 0x253   : > { %v1691_v16 = vadd.f32 %v1690_v17, %v1578_v34  ;;  %1401 = vmatmul.f32.gmra.mxu1 %v3219_v30  ;;  %1514 = vmatmul.f32.gmra.mxu2 %v3195_v27 }
 0x255   : > { %v1761_v10 = vadd.f32 %v1760_v50, %v1691_v16  ;;  %v1800_v37 = vmul.f32 %v1691_v16, %v1691_v16  ;;  %2006 = vst [vmem:[%s3245_s30 + $0xa9] sm:$0xff] %v1691_v16  ;;  %1627 = vmatmul.f32.gmra.mxu3 %v3230_v36  ;;  %v424_v36 = vld [vmem:[%s2208_s22 + $0x1a8] sm:$0x3] }
 0x256   : > { %v1467_v61 = vpop.f32.mrf.mxu2  ;;  %v1693_v44 = vpop.f32.mrf.mxu0  ;;  %v722_v31 = vrot.slane %v424_v36, 1  ;;  %v729_v50 = vrot.slane %v424_v36, 2 }
 0x257   : > { %v1831_v57 = vadd.f32 %v1830_v6, %v1800_v37  ;;  %v1468_v30 = vadd.f32 %v1467_v61, %v1355_v15 }
 0x258   : > { %v1357_v27 = vpop.f32.mrf.mxu1  ;;  %v1580_v47 = vpop.f32.mrf.mxu3  ;;  %v723_v22 = vsel %vm473_vm0, %v720_v32, %v722_v31  ;;  %v730_v23 = vsel %vm586_vm1, %v727_v58, %v729_v50 }
 0x259   : > { %v1581_v8 = vadd.f32 %v1580_v47, %v1468_v30  ;;  %1740 = vmatmul.f32.gmra.mxu0 %v713_v4  ;;  %v1358_v38 = vadd.f32 %v1357_v27, %v3722_v29 }
 0x25b   : > { %v1694_v51 = vadd.f32 %v1693_v44, %v1581_v8  ;;  %1404 = vmatmul.f32.gmra.mxu1 %v711_v54  ;;  %1517 = vmatmul.f32.gmra.mxu2 %v422_v45 }
 0x25d   : > { %v1762_v1 = vadd.f32 %v1761_v10, %v1694_v51  ;;  %v1801_v18 = vmul.f32 %v1694_v51, %v1694_v51  ;;  %2007 = vst [vmem:[%s3245_s30 + $0xb1] sm:$0xff] %v1694_v51  ;;  %1630 = vmatmul.f32.gmra.mxu3 %v721_v33 }
 0x25e   : > { %v1470_v56 = vpop.f32.mrf.mxu2  ;;  %v1696_v11 = vpop.f32.mrf.mxu0 }
 0x25f   : > { %v1832_v63 = vadd.f32 %v1831_v57, %v1801_v18  ;;  %v1471_v60 = vadd.f32 %v1470_v56, %v1358_v38 }
 0x260   : > { %v1360_v48 = vpop.f32.mrf.mxu1  ;;  %v1583_v7 = vpop.f32.mrf.mxu3 }
 0x261   : > { %v1584_v55 = vadd.f32 %v1583_v7, %v1471_v60  ;;  %1743 = vmatmul.f32.gmra.mxu0 %v728_v52  ;;  %v1361_v24 = vadd.f32 %v1360_v48, %v3233_v14 }
 0x263   : > { %v1697_v41 = vadd.f32 %v1696_v11, %v1584_v55  ;;  %1407 = vmatmul.f32.gmra.mxu1 %v713_v4  ;;  %1520 = vmatmul.f32.gmra.mxu2 %v423_v21 }
 0x265   : > { %v1763_v17 = vadd.f32 %v1762_v1, %v1697_v41  ;;  %v1802_v54 = vmul.f32 %v1697_v41, %v1697_v41  ;;  %2008 = vst [vmem:[%s3245_s30 + $0xc1] sm:$0xff] %v1697_v41  ;;  %1633 = vmatmul.f32.gmra.mxu3 %v723_v22 }
 0x266   : > { %v1473_v6 = vpop.f32.mrf.mxu2  ;;  %v1699_v59 = vpop.f32.mrf.mxu0 }
 0x267   : > { %v1833_v39 = vadd.f32 %v1832_v63, %v1802_v54  ;;  %v1474_v34 = vadd.f32 %v1473_v6, %v1361_v24 }
 0x268   : > { %v1363_v19 = vpop.f32.mrf.mxu1  ;;  %v1586_v16 = vpop.f32.mrf.mxu3 }
 0x269   : > { %v1587_v45 = vadd.f32 %v1586_v16, %v1474_v34  ;;  %1746 = vmatmul.f32.gmra.mxu0 %v730_v23  ;;  %v1364_v21 = vadd.f32 %v1363_v19, %v3249_v40 }
 0x26b   : > { %v1700_v46 = vadd.f32 %v1699_v59, %v1587_v45 }
 0x26d   : > { %v1764_v14 = vadd.f32 %v1763_v17, %v1700_v46  ;;  %v1803_v15 = vmul.f32 %v1700_v46, %v1700_v46  ;;  %2009 = vst [vmem:[%s3245_s30 + $0xc9] sm:$0xff] %v1700_v46 }
 0x26e   : > { %v1476_v10 = vpop.f32.mrf.mxu2  ;;  %v1702_v37 = vpop.f32.mrf.mxu0 }
 0x26f   : > { %v1834_v61 = vadd.f32 %v1833_v39, %v1803_v15  ;;  %v1477_v44 = vadd.f32 %v1476_v10, %v1364_v21 }
 0x270   : > { %v1366_v5 = vpop.f32.mrf.mxu1  ;;  %v1589_v32 = vpop.f32.mrf.mxu3 }
 0x271   : > { %v1590_v4 = vadd.f32 %v1589_v32, %v1477_v44  ;;  %v1367_v30 = vadd.f32 %v1366_v5, %v3272_v53 }
 0x273   : > { %v1703_v57 = vadd.f32 %v1702_v37, %v1590_v4 }
 0x275   : > { %v1765_v27 = vadd.f32 %v1764_v14, %v1703_v57  ;;  %v1804_v47 = vmul.f32 %v1703_v57, %v1703_v57  ;;  %2010 = vst [vmem:[%s3245_s30 + $0xd9] sm:$0xff] %v1703_v57 }
 0x276   : > { %v1479_v8 = vpop.f32.mrf.mxu2  ;;  %v1705_v2 = vpop.f32.mrf.mxu0 }
 0x277   : > { %v1835_v40 = vadd.f32 %v1834_v61, %v1804_v47  ;;  %v1480_v33 = vadd.f32 %v1479_v8, %v1367_v30 }
 0x278   : > { %v1369_v58 = vpop.f32.mrf.mxu1  ;;  %v1592_v51 = vpop.f32.mrf.mxu3 }
 0x279   : > { %v1593_v36 = vadd.f32 %v1592_v51, %v1480_v33  ;;  %v1370_v38 = vadd.f32 %v1369_v58, %v3295_v0 }
 0x27b   : > { %v1706_v29 = vadd.f32 %v1705_v2, %v1593_v36 }
 0x27d   : > { %v1766_v1 = vadd.f32 %v1765_v27, %v1706_v29  ;;  %v1805_v18 = vmul.f32 %v1706_v29, %v1706_v29  ;;  %2011 = vst [vmem:[%s3245_s30 + $0xe1] sm:$0xff] %v1706_v29 }
 0x27e   : > { %v1482_v56 = vpop.f32.mrf.mxu2  ;;  %v1708_v11 = vpop.f32.mrf.mxu0 }
 0x27f   : > { %v1836_v53 = vadd.f32 %v1835_v40, %v1805_v18  ;;  %v1483_v31 = vadd.f32 %v1482_v56, %v1370_v38 }
 0x280   : > { %v1372_v52 = vpop.f32.mrf.mxu1  ;;  %v1595_v63 = vpop.f32.mrf.mxu3 }
 0x281   : > { %v1596_v60 = vadd.f32 %v1595_v63, %v1483_v31  ;;  %v1373_v7 = vadd.f32 %v1372_v52, %v3318_v26 }
 0x283   : > { %v1709_v48 = vadd.f32 %v1708_v11, %v1596_v60 }
 0x285   : > { %v1767_v55 = vadd.f32 %v1766_v1, %v1709_v48  ;;  %v1806_v22 = vmul.f32 %v1709_v48, %v1709_v48  ;;  %2012 = vst [vmem:[%s3245_s30 + $0xf1] sm:$0xff] %v1709_v48 }
 0x286   : > { %v1485_v50 = vpop.f32.mrf.mxu2  ;;  %v1711_v41 = vpop.f32.mrf.mxu0 }
 0x287   : > { %v1837_v0 = vadd.f32 %v1836_v53, %v1806_v22  ;;  %v1486_v24 = vadd.f32 %v1485_v50, %v1373_v7 }
 0x288   : > { %v1375_v17 = vpop.f32.mrf.mxu1  ;;  %v1598_v54 = vpop.f32.mrf.mxu3 }
 0x289   : > { %v1599_v6 = vadd.f32 %v1598_v54, %v1486_v24  ;;  %v1376_v23 = vadd.f32 %v1375_v17, %v3341_v13 }
 0x28b   : > { %v1712_v59 = vadd.f32 %v1711_v41, %v1599_v6 }
 0x28d   : > { %v1768_v39 = vadd.f32 %v1767_v55, %v1712_v59  ;;  %v1807_v34 = vmul.f32 %v1712_v59, %v1712_v59  ;;  %2013 = vst [vmem:[%s3245_s30 + $0xf9] sm:$0xff] %v1712_v59 }
 0x28e   : > { %v1488_v19 = vpop.f32.mrf.mxu2  ;;  %v1714_v16 = vpop.f32.mrf.mxu0 }
 0x28f   : > { %v1838_v26 = vadd.f32 %v1837_v0, %v1807_v34  ;;  %v1489_v45 = vadd.f32 %v1488_v19, %v1376_v23 }
 0x290   : > { %v1378_v46 = vpop.f32.mrf.mxu1  ;;  %v1601_v21 = vpop.f32.mrf.mxu3 }
 0x291   : > { %v1602_v14 = vadd.f32 %v1601_v21, %v1489_v45  ;;  %v1379_v10 = vadd.f32 %v1378_v46, %v3364_v25 }
 0x293   : > { %v1715_v15 = vadd.f32 %v1714_v16, %v1602_v14 }
 0x295   : > { %v1769_v37 = vadd.f32 %v1768_v39, %v1715_v15  ;;  %v1808_v61 = vmul.f32 %v1715_v15, %v1715_v15  ;;  %2014 = vst [vmem:[%s3245_s30 + $0x109] sm:$0xff] %v1715_v15 }
 0x296   : > { %v1491_v44 = vpop.f32.mrf.mxu2  ;;  %v1717_v5 = vpop.f32.mrf.mxu0 }
 0x297   : > { %v1839_v13 = vadd.f32 %v1838_v26, %v1808_v61  ;;  %v1492_v32 = vadd.f32 %v1491_v44, %v1379_v10 }
 0x298   : > { %v1381_v4 = vpop.f32.mrf.mxu1  ;;  %v1604_v57 = vpop.f32.mrf.mxu3 }
 0x299   : > { %v1605_v30 = vadd.f32 %v1604_v57, %v1492_v32  ;;  %v1382_v47 = vadd.f32 %v1381_v4, %v3373_v43 }
 0x29b   : > { %v1718_v27 = vadd.f32 %v1717_v5, %v1605_v30 }
 0x29d   : > { %v1770_v8 = vadd.f32 %v1769_v37, %v1718_v27  ;;  %v1809_v2 = vmul.f32 %v1718_v27, %v1718_v27  ;;  %2015 = vst [vmem:[%s3245_s30 + $0x111] sm:$0xff] %v1718_v27 }
 0x29e   : > { %v1494_v40 = vpop.f32.mrf.mxu2  ;;  %v1720_v33 = vpop.f32.mrf.mxu0 }
 0x29f   : > { %v1840_v25 = vadd.f32 %v1839_v13, %v1809_v2  ;;  %v1495_v58 = vadd.f32 %v1494_v40, %v1382_v47 }
 0x2a0   : > { %v1384_v51 = vpop.f32.mrf.mxu1  ;;  %v1607_v36 = vpop.f32.mrf.mxu3 }
 0x2a1   : > { %v1608_v29 = vadd.f32 %v1607_v36, %v1495_v58  ;;  %v1385_v1 = vadd.f32 %v1384_v51, %v3380_v62 }
 0x2a3   : > { %v1721_v38 = vadd.f32 %v1720_v33, %v1608_v29 }
 0x2a5   : > { %v1771_v18 = vadd.f32 %v1770_v8, %v1721_v38  ;;  %v1810_v56 = vmul.f32 %v1721_v38, %v1721_v38  ;;  %2016 = vst [vmem:[%s3245_s30 + $0x121] sm:$0xff] %v1721_v38 }
 0x2a6   : > { %v1497_v11 = vpop.f32.mrf.mxu2  ;;  %v1723_v53 = vpop.f32.mrf.mxu0 }
 0x2a7   : > { %v1841_v43 = vadd.f32 %v1840_v25, %v1810_v56  ;;  %v1498_v31 = vadd.f32 %v1497_v11, %v1385_v1 }
 0x2a8   : > { %v1387_v52 = vpop.f32.mrf.mxu1  ;;  %v1610_v63 = vpop.f32.mrf.mxu3 }
 0x2a9   : > { %v1611_v60 = vadd.f32 %v1610_v63, %v1498_v31  ;;  %v1388_v7 = vadd.f32 %v1387_v52, %v3387_v12 }
 0x2ab   : > { %v1724_v48 = vadd.f32 %v1723_v53, %v1611_v60 }
 0x2ad   : > { %v1772_v55 = vadd.f32 %v1771_v18, %v1724_v48  ;;  %v1811_v22 = vmul.f32 %v1724_v48, %v1724_v48  ;;  %2017 = vst [vmem:[%s3245_s30 + $0x129] sm:$0xff] %v1724_v48 }
 0x2ae   : > { %v1500_v50 = vpop.f32.mrf.mxu2  ;;  %v1726_v41 = vpop.f32.mrf.mxu0 }
 0x2af   : > { %v1842_v62 = vadd.f32 %v1841_v43, %v1811_v22  ;;  %v1501_v0 = vadd.f32 %v1500_v50, %v1388_v7 }
 0x2b0   : > { %v1390_v24 = vpop.f32.mrf.mxu1  ;;  %v1613_v17 = vpop.f32.mrf.mxu3 }
 0x2b1   : > { %v1614_v54 = vadd.f32 %v1613_v17, %v1501_v0  ;;  %v1391_v59 = vadd.f32 %v1390_v24, %v3394_v49 }
 0x2b3   : > { %v1727_v6 = vadd.f32 %v1726_v41, %v1614_v54 }
 0x2b5   : > { %v1773_v23 = vadd.f32 %v1772_v55, %v1727_v6  ;;  %v1812_v39 = vmul.f32 %v1727_v6, %v1727_v6  ;;  %2018 = vst [vmem:[%s3245_s30 + $0x139] sm:$0xff] %v1727_v6 }
 0x2b6   : > { %v1503_v34 = vpop.f32.mrf.mxu2  ;;  %v1729_v19 = vpop.f32.mrf.mxu0 }
 0x2b7   : > { %v1843_v12 = vadd.f32 %v1842_v62, %v1812_v39  ;;  %v1504_v16 = vadd.f32 %v1503_v34, %v1391_v59 }
 0x2b8   : > { %v1393_v26 = vpop.f32.mrf.mxu1  ;;  %v1616_v45 = vpop.f32.mrf.mxu3 }
 0x2b9   : > { %v1617_v46 = vadd.f32 %v1616_v45, %v1504_v16  ;;  %v1394_v14 = vadd.f32 %v1393_v26, %v3401_v20 }
 0x2bb   : > { %v1730_v21 = vadd.f32 %v1729_v19, %v1617_v46 }
 0x2bd   : > { %v1774_v15 = vadd.f32 %v1773_v23, %v1730_v21  ;;  %v1813_v10 = vmul.f32 %v1730_v21, %v1730_v21  ;;  %2019 = vst [vmem:[%s3245_s30 + $0x141] sm:$0xff] %v1730_v21 }
 0x2be   : > { %v1506_v37 = vpop.f32.mrf.mxu2  ;;  %v1732_v61 = vpop.f32.mrf.mxu0 }
 0x2bf   : > { %v1844_v49 = vadd.f32 %v1843_v12, %v1813_v10  ;;  %v1507_v44 = vadd.f32 %v1506_v37, %v1394_v14 }
 0x2c0   : > { %v1396_v5 = vpop.f32.mrf.mxu1  ;;  %v1619_v13 = vpop.f32.mrf.mxu3 }
 0x2c1   : > { %v1620_v32 = vadd.f32 %v1619_v13, %v1507_v44  ;;  %v1397_v57 = vadd.f32 %v1396_v5, %v3408_v28 }
 0x2c3   : > { %v1733_v4 = vadd.f32 %v1732_v61, %v1620_v32 }
 0x2c5   : > { %v1775_v30 = vadd.f32 %v1774_v15, %v1733_v4  ;;  %v1814_v27 = vmul.f32 %v1733_v4, %v1733_v4  ;;  %2020 = vst [vmem:[%s3245_s30 + $0x151] sm:$0xff] %v1733_v4 }
 0x2c6   : > { %v1509_v47 = vpop.f32.mrf.mxu2  ;;  %v1735_v8 = vpop.f32.mrf.mxu0 }
 0x2c7   : > { %v1845_v20 = vadd.f32 %v1844_v49, %v1814_v27  ;;  %v1510_v2 = vadd.f32 %v1509_v47, %v1397_v57 }
 0x2c8   : > { %v1399_v40 = vpop.f32.mrf.mxu1  ;;  %v1622_v33 = vpop.f32.mrf.mxu3 }
 0x2c9   : > { %v1623_v25 = vadd.f32 %v1622_v33, %v1510_v2  ;;  %v1400_v51 = vadd.f32 %v1399_v40, %v3415_v35 }
 0x2cb   : > { %v1736_v58 = vadd.f32 %v1735_v8, %v1623_v25 }
 0x2cd   : > { %v1776_v36 = vadd.f32 %v1775_v30, %v1736_v58  ;;  %v1815_v29 = vmul.f32 %v1736_v58, %v1736_v58  ;;  %2021 = vst [vmem:[%s3245_s30 + $0x159] sm:$0xff] %v1736_v58 }
 0x2ce   : > { %v1512_v38 = vpop.f32.mrf.mxu2  ;;  %v1738_v1 = vpop.f32.mrf.mxu0 }
 0x2cf   : > { %v1846_v28 = vadd.f32 %v1845_v20, %v1815_v29  ;;  %v1513_v18 = vadd.f32 %v1512_v38, %v1400_v51 }
 0x2d0   : > { %v1402_v56 = vpop.f32.mrf.mxu1  ;;  %v1625_v11 = vpop.f32.mrf.mxu3 }
 0x2d1   : > { %v1626_v53 = vadd.f32 %v1625_v11, %v1513_v18  ;;  %v1403_v31 = vadd.f32 %v1402_v56, %v3422_v3 }
 0x2d3   : > { %v1739_v43 = vadd.f32 %v1738_v1, %v1626_v53 }
 0x2d5   : > { %v1777_v52 = vadd.f32 %v1776_v36, %v1739_v43  ;;  %v1816_v63 = vmul.f32 %v1739_v43, %v1739_v43  ;;  %2022 = vst [vmem:[%s3245_s30 + $0x169] sm:$0xff] %v1739_v43 }
 0x2d6   : > { %v1515_v60 = vpop.f32.mrf.mxu2  ;;  %v1741_v48 = vpop.f32.mrf.mxu0 }
 0x2d7   : > { %v1847_v35 = vadd.f32 %v1846_v28, %v1816_v63  ;;  %v1516_v7 = vadd.f32 %v1515_v60, %v1403_v31 }
 0x2d8   : > { %v1405_v55 = vpop.f32.mrf.mxu1  ;;  %v1628_v22 = vpop.f32.mrf.mxu3 }
 0x2d9   : > { %v1629_v50 = vadd.f32 %v1628_v22, %v1516_v7  ;;  %v1406_v62 = vadd.f32 %v1405_v55, %v3429_v42 }
 0x2db   : > { %v1742_v41 = vadd.f32 %v1741_v48, %v1629_v50 }
 0x2dd   : > { %v1778_v0 = vadd.f32 %v1777_v52, %v1742_v41  ;;  %v1817_v24 = vmul.f32 %v1742_v41, %v1742_v41  ;;  %2023 = vst [vmem:[%s3245_s30 + $0x171] sm:$0xff] %v1742_v41 }
 0x2de   : > { %v1518_v17 = vpop.f32.mrf.mxu2  ;;  %v1744_v54 = vpop.f32.mrf.mxu0 }
 0x2df   : > { %v1848_v3 = vadd.f32 %v1847_v35, %v1817_v24  ;;  %v1519_v6 = vadd.f32 %v1518_v17, %v1406_v62 }
 0x2e0   : > { %v1631_v59 = vpop.f32.mrf.mxu3  ;;  %v1408_v39 = vpop.f32.mrf.mxu1 }
 0x2e1   : > { %v1632_v23 = vadd.f32 %v1631_v59, %v1519_v6  ;;  %v1409_v19 = vadd.f32 %v1408_v39, %v3436_v9 }
 0x2e3   : > { %v1745_v34 = vadd.f32 %v1744_v54, %v1632_v23 }
 0x2e5   : > { %v1779_v12 = vadd.f32 %v1778_v0, %v1745_v34  ;;  %v1818_v16 = vmul.f32 %v1745_v34, %v1745_v34  ;;  %2024 = vst [vmem:[%s3245_s30 + $0x181] sm:$0xff] %v1745_v34 }
 0x2e6   : > { %v1521_v26 = vpop.f32.mrf.mxu2  ;;  %v1747_v21 = vpop.f32.mrf.mxu0 }
 0x2e7   : > { %v1849_v45 = vadd.f32 %v1848_v3, %v1818_v16  ;;  %v1522_v42 = vadd.f32 %v1521_v26, %v1409_v19 }
 0x2e8   : > { %v1634_v46 = vpop.f32.mrf.mxu3 }
 0x2e9   : > { %v1635_v14 = vadd.f32 %v1634_v46, %v1522_v42 }
 0x2eb   : > { %v1748_v15 = vadd.f32 %v1747_v21, %v1635_v14 }
 0x2ed   : > { %v1780_v10 = vadd.f32 %v1779_v12, %v1748_v15  ;;  %v1819_v37 = vmul.f32 %v1748_v15, %v1748_v15  ;;  %2025 = vst [vmem:[%s3245_s30 + $0x189] sm:$0xff] %v1748_v15 }
 0x2ef   : > { %v1781_v61 = vrot.slane %v1780_v10, 4  ;;  %v1850_v49 = vadd.f32 %v1849_v45, %v1819_v37 }
 0x2f1   : > { %v1782_v44 = vadd.f32 %v1781_v61, %v1780_v10  ;;  %v1851_v5 = vrot.slane %v1850_v49, 4 }
 0x2f3   : > { %v1783_v13 = vrot.slane %v1782_v44, 2  ;;  %v1852_v9 = vadd.f32 %v1851_v5, %v1850_v49 }
 0x2f5   : > { %v1784_v32 = vadd.f32 %v1783_v13, %v1782_v44  ;;  %v1853_v4 = vrot.slane %v1852_v9, 2 }
 0x2f7   : > { %v1785_v57 = vrot.slane %v1784_v32, 1  ;;  %v1854_v30 = vadd.f32 %v1853_v4, %v1852_v9 }
 0x2f9   : > { %v1855_v27 = vrot.slane %v1854_v30, 1  ;;  %v1786_v47 = vadd.f32 %v1785_v57, %v1784_v32 }
 0x2fb   : > { %v1856_v8 = vadd.f32 %v1855_v27, %v1854_v30 }
 0x2fd   : > { %v1894_v20 = vsel %vm1893_vm2, %v1786_v47, %v1856_v8 }
 0x2fe   : > { %1895 = vst [vmem:[%s181_s5] sm:$0x3] %v1894_v20 }
 0x2ff PF: > { %s14_s12 = sadd.s32 1, %s2120_s12  }
 0x300   : > { %p11_p4 = scmp.ge.s32.totalorder %s14_s12, 4  }
 0x302   :  { %13 = sbr.rel (!%p11_p4) target bundleno = 1 (0x1), region = 73 }

// kernel: double_conv.4
= control target key start
LH: loop header
LB: loop body
LE: loop exit
PB: predicated region body
PF: predicated region fallthrough
CT: control target
= control target key end

     0   :  { %s2611_s18 = smov 0   ;;  %s4219_s0 = inlined_call_operand.vmem [shape: f32[2,18,18,128], index: 0, kind: input, shape index: {}]   ;;  %s4220_s1 = inlined_call_operand.vmem [shape: f32[1152,128], index: 1, kind: input, shape index: {}]   ;;  %s4221_s2 = inlined_call_operand.vmem [shape: f32[1,128], index: 2, kind: input, shape index: {}]   ;;  %s4222_s3 = inlined_call_operand.vmem [shape: f32[1,128], index: 3, kind: input, shape index: {}]   ;;  %s4223_s4 = inlined_call_operand.vmem [shape: f32[2,16,16,128], index: 4, kind: output, shape index: {0}]   ;;  %s4224_s5 = inlined_call_operand.vmem [shape: f32[2,2,128], index: 5, kind: output, shape index: {1}]  }
   0x1 LB: > { %s2406_s19 = sadd.s32 4294967295, %s2578_s18   ;;  %p2410_p0 = scmp.ge.s32.totalorder %s2578_s18, 1  ;;  %s2578_s18 = sphi %s2611_s18, %s16_s18  }
   0x2   : > { %p190_p1 = scmp.lt.s32.totalorder %s2578_s18, 3 }
   0x4   : > { %p191_p2 = pnand %p2410_p0, %p190_p1 }
   0x6   : > { %194 = sbr.rel (%p191_p2) target bundleno = 767 (0x2ff), region = 36 }
   0xb   : > { %v251_v0 = vld [vmem:[%s4220_s1 + $0x78] sm:$0xff]  ;;  %v250_v1 = vld [vmem:[%s4220_s1 + $0x70] sm:$0xff]  ;;  %v249_v2 = vld [vmem:[%s4220_s1 + $0x68] sm:$0xff]  ;;  %p222_p3 = scmp.lt.s32.totalorder %s2406_s19, 1  ;;  %v624_v14 = vlaneseq  ;;  %v4225_v59 = vmov 0.0   ;;  %vm898_vm2 = vcmask 1046528  }
   0xc   : > { %2510 = vmatpush.msra.mxu1 %v251_v0  ;;  %2511 = vmatpush.msra.mxu2 %v251_v0  ;;  %v248_v3 = vld [vmem:[%s4220_s1 + $0x60] sm:$0xff]  ;;  %v247_v4 = vld [vmem:[%s4220_s1 + $0x58] sm:$0xff]  ;;  %v246_v5 = vld [vmem:[%s4220_s1 + $0x50] sm:$0xff]  ;;  %vm1011_vm4 = vcmask 1045504   ;;  %vm2317_vm5 = vcmask 1040384  }
   0xd   : > { %2512 = vmatpush.msra.mxu3 %v251_v0  ;;  %1158 = vmatpush.msra.mxu0 %v251_v0  ;;  %s4460_s19 = smov (!%p222_p3, %s2406_s19), 1  ;;  %v245_v6 = vld [vmem:[%s4220_s1 + $0x48] sm:$0xff]  ;;  %v244_v7 = vld [vmem:[%s4220_s1 + $0x40] sm:$0xff]  ;;  %v243_v8 = vld [vmem:[%s4220_s1 + $0x38] sm:$0xff]  ;;  %v2681_v21 = vshrl.u32 %v624_v14, 7 }
   0xe   : > { %2513 = vmatpush.msra.mxu1 %v250_v1  ;;  %2514 = vmatpush.msra.mxu2 %v250_v1  ;;  %s2558_s9 = smul.u32 432, %s4460_s19  ;;  %v242_v9 = vld [vmem:[%s4220_s1 + $0x30] sm:$0xff]  ;;  %v2660_v10 = vld [vmem:[%s4221_s2] ss:$0 sm:$0xff]  ;;  %v241_v13 = vld [vmem:[%s4220_s1 + $0x28] sm:$0xff]  ;;  %s2414_s11 = sshll.u32 %s4460_s19, 1 }
   0xf   : > { %2515 = vmatpush.msra.mxu3 %v250_v1  ;;  %1159 = vmatpush.msra.mxu0 %v250_v1  ;;  %v240_v16 = vld [vmem:[%s4220_s1 + $0x20] sm:$0xff]  ;;  %v239_v20 = vld [vmem:[%s4220_s1 + $0x18] sm:$0xff]  ;;  %v238_v23 = vld [vmem:[%s4220_s1 + $0x10] sm:$0xff]  ;;  %vm682_vm0 = vcmp.eq.s32.totalorder %v2681_v21, 0  ;;  %s235_s14 = scalar_lea.vmem %s4224_s5, %s2414_s11 }
  0x10   : > { %2516 = vmatpush.msra.mxu1 %v249_v2  ;;  %2517 = vmatpush.msra.mxu2 %v249_v2  ;;  %s2652_s16 = scalar_lea.vmem %s4219_s0, %s2558_s9  ;;  %v2675_v18 = vld [vmem:[%s4222_s3] ss:$0 sm:$0xff]  ;;  %v237_v28 = vld [vmem:[%s4220_s1 + $0x8] sm:$0xff]  ;;  %vm2708_vm1 = vmneg %vm682_vm0 }
  0x11   : > { %2518 = vmatpush.msra.mxu3 %v249_v2  ;;  %1160 = vmatpush.msra.mxu0 %v249_v2  ;;  %v396_v11 = vld [vmem:[%s2652_s16 + $0x60] sm:$0xff]  ;;  %v397_v26 = vld [vmem:[%s2652_s16 + $0x68] sm:$0xff]  ;;  %v283_v37 = vld [vmem:[%s4220_s1 + $0x178] sm:$0xff] }
  0x12   : > { %2519 = vmatpush.msra.mxu1 %v248_v3  ;;  %2520 = vmatpush.msra.mxu2 %v248_v3  ;;  %v408_v12 = vld [vmem:[%s2652_s16 + $0xc0] sm:$0xff]  ;;  %v453_v17 = vmul.f32 %v2660_v10, %v396_v11  ;;  %v409_v27 = vld [vmem:[%s2652_s16 + $0xc8] sm:$0xff]  ;;  %v454_v34 = vmul.f32 %v2660_v10, %v397_v26  ;;  %v267_v40 = vld [vmem:[%s4220_s1 + $0xf8] sm:$0xff] }
  0x13   : > { %2521 = vmatpush.msra.mxu3 %v248_v3  ;;  %1161 = vmatpush.msra.mxu0 %v248_v3  ;;  %v420_v15 = vld [vmem:[%s2652_s16 + $0x120] sm:$0xff]  ;;  %v465_v19 = vmul.f32 %v2660_v10, %v408_v12  ;;  %v421_v30 = vld [vmem:[%s2652_s16 + $0x128] sm:$0xff]  ;;  %v466_v35 = vmul.f32 %v2660_v10, %v409_v27  ;;  %v299_v41 = vld [vmem:[%s4220_s1 + $0x1f8] sm:$0xff] }
  0x14   : > { %2522 = vmatpush.msra.mxu1 %v247_v4  ;;  %2523 = vmatpush.msra.mxu2 %v247_v4  ;;  %v477_v22 = vmul.f32 %v2660_v10, %v420_v15  ;;  %v510_v24 = vadd.f32 %v2675_v18, %v453_v17  ;;  %v236_v31 = vld [vmem:[%s4220_s1] sm:$0xff]  ;;  %v478_v39 = vmul.f32 %v2660_v10, %v421_v30  ;;  %v282_v42 = vld [vmem:[%s4220_s1 + $0x170] sm:$0xff]  ;;  %v399_v46 = vld [vmem:[%s2652_s16 + $0x78] sm:$0xff] }
  0x15   : > { %2524 = vmatpush.msra.mxu3 %v247_v4  ;;  %1162 = vmatpush.msra.mxu0 %v247_v4  ;;  %v522_v25 = vadd.f32 %v2675_v18, %v465_v19  ;;  %v511_v43 = vadd.f32 %v2675_v18, %v454_v34  ;;  %v523_v44 = vadd.f32 %v2675_v18, %v466_v35  ;;  %v266_v45 = vld [vmem:[%s4220_s1 + $0xf0] sm:$0xff]  ;;  %v411_v47 = vld [vmem:[%s2652_s16 + $0xd8] sm:$0xff]  ;;  %v281_v49 = vld [vmem:[%s4220_s1 + $0x168] sm:$0xff] }
  0x16   : > { %2525 = vmatpush.msra.mxu1 %v246_v5  ;;  %2526 = vmatpush.msra.mxu2 %v246_v5  ;;  %v534_v29 = vadd.f32 %v2675_v18, %v477_v22  ;;  %v2700_v32 = vmax.f32 %v510_v24, 0.0  ;;  %v298_v48 = vld [vmem:[%s4220_s1 + $0x1f0] sm:$0xff]  ;;  %v535_v50 = vadd.f32 %v2675_v18, %v478_v39  ;;  %v265_v51 = vld [vmem:[%s4220_s1 + $0xe8] sm:$0xff]  ;;  %v423_v52 = vld [vmem:[%s2652_s16 + $0x138] sm:$0xff]  ;;  %v456_v57 = vmul.f32 %v2660_v10, %v399_v46 }
  0x17   : > { %2527 = vmatpush.msra.mxu3 %v246_v5  ;;  %1163 = vmatpush.msra.mxu0 %v246_v5  ;;  %v2702_v33 = vmax.f32 %v522_v25, 0.0  ;;  %v2754_v53 = vmax.f32 %v511_v43, 0.0  ;;  %v2756_v54 = vmax.f32 %v523_v44, 0.0  ;;  %v297_v55 = vld [vmem:[%s4220_s1 + $0x1e8] sm:$0xff]  ;;  %v315_v56 = vld [vmem:[%s4220_s1 + $0x278] sm:$0xff]  ;;  %v468_v58 = vmul.f32 %v2660_v10, %v411_v47  ;;  %v280_v61 = vld [vmem:[%s4220_s1 + $0x160] sm:$0xff] }
  0x18   : > { %2528 = vmatpush.msra.mxu1 %v245_v6  ;;  %2529 = vmatpush.msra.mxu2 %v245_v6  ;;  %4294 = vst [vmem:[#allocation2_spill] sm:$0xff] %v2700_v32  ;;  %v2715_v38 = vmax.f32 %v534_v29, 0.0  ;;  %v2767_v60 = vmax.f32 %v535_v50, 0.0  ;;  %v296_v62 = vld [vmem:[%s4220_s1 + $0x1e0] sm:$0xff]  ;;  %v480_v63 = vmul.f32 %v2660_v10, %v423_v52  ;;  %v314_v0 = vld [vmem:[%s4220_s1 + $0x270] sm:$0xff]  ;;  %v387_v1 = vld [vmem:[%s2652_s16 + $0x18] sm:$0xff]  ;;  %v513_v2 = vadd.f32 %v2675_v18, %v456_v57 }
  0x19   : > { %2530 = vmatpush.msra.mxu3 %v245_v6  ;;  %1164 = vmatpush.msra.mxu0 %v245_v6  ;;  %4295 = vst [vmem:[#allocation3_spill] sm:$0xff] %v2702_v33  ;;  %v525_v3 = vadd.f32 %v2675_v18, %v468_v58  ;;  %v264_v4 = vld [vmem:[%s4220_s1 + $0xe0] sm:$0xff]  ;;  %v279_v5 = vld [vmem:[%s4220_s1 + $0x158] sm:$0xff]  ;;  %v444_v14 = vmul.f32 %v2660_v10, %v387_v1  ;;  %v294_v15 = vld [vmem:[%s4220_s1 + $0x1d0] sm:$0xff] }
  0x1a   : > { %2531 = vmatpush.msra.mxu1 %v244_v7  ;;  %2532 = vmatpush.msra.mxu2 %v244_v7  ;;  %4298 = vst [vmem:[#allocation4_spill] sm:$0xff] %v2715_v38  ;;  %v400_v6 = vld [vmem:[%s2652_s16 + $0x80] sm:$0xff]  ;;  %v537_v11 = vadd.f32 %v2675_v18, %v480_v63  ;;  %v263_v12 = vld [vmem:[%s4220_s1 + $0xd8] sm:$0xff]  ;;  %v2811_v17 = vmax.f32 %v513_v2, 0.0  ;;  %v262_v24 = vld [vmem:[%s4220_s1 + $0xd0] sm:$0xff] }
  0x1b   : > { %2533 = vmatpush.msra.mxu3 %v244_v7  ;;  %1165 = vmatpush.msra.mxu0 %v244_v7  ;;  %4299 = vst [vmem:[#allocation5_spill] sm:$0xff] %v2754_v53  ;;  %v295_v7 = vld [vmem:[%s4220_s1 + $0x1d8] sm:$0xff]  ;;  %v2813_v19 = vmax.f32 %v525_v3, 0.0  ;;  %v457_v22 = vmul.f32 %v2660_v10, %v400_v6  ;;  %v277_v26 = vld [vmem:[%s4220_s1 + $0x148] sm:$0xff]  ;;  %v501_v27 = vadd.f32 %v2675_v18, %v444_v14  ;;  %v276_v39 = vld [vmem:[%s4220_s1 + $0x140] sm:$0xff] }
  0x1c   : > { %2534 = vmatpush.msra.mxu1 %v243_v8  ;;  %2535 = vmatpush.msra.mxu2 %v243_v8  ;;  %4300 = vst [vmem:[#allocation6_spill] sm:$0xff] %v2756_v54  ;;  %v2824_v25 = vmax.f32 %v537_v11, 0.0  ;;  %v293_v29 = vld [vmem:[%s4220_s1 + $0x1c8] sm:$0xff]  ;;  %v311_v30 = vld [vmem:[%s4220_s1 + $0x258] sm:$0xff]  ;;  %v414_v43 = vld [vmem:[%s2652_s16 + $0xf0] sm:$0xff] }
  0x1d   : > { %2536 = vmatpush.msra.mxu3 %v243_v8  ;;  %1166 = vmatpush.msra.mxu0 %v243_v8  ;;  %4301 = vst [vmem:[#allocation7_spill] sm:$0xff] %v2767_v60  ;;  %v313_v8 = vld [vmem:[%s4220_s1 + $0x268] sm:$0xff]  ;;  %v514_v34 = vadd.f32 %v2675_v18, %v457_v22  ;;  %v2863_v44 = vmax.f32 %v501_v27, 0.0  ;;  %v260_v46 = vld [vmem:[%s4220_s1 + $0xc0] sm:$0xff]  ;;  %v275_v47 = vld [vmem:[%s4220_s1 + $0x138] sm:$0xff] }
  0x1e   : > { %2537 = vmatpush.msra.mxu1 %v242_v9  ;;  %2538 = vmatpush.msra.mxu2 %v242_v9  ;;  %4302 = vst [vmem:[#allocation8_spill] sm:$0xff] %v2811_v17  ;;  %v291_v50 = vld [vmem:[%s4220_s1 + $0x1b8] sm:$0xff]  ;;  %v309_v57 = vld [vmem:[%s4220_s1 + $0x248] sm:$0xff]  ;;  %v290_v1 = vld [vmem:[%s4220_s1 + $0x1b0] sm:$0xff] }
  0x1f   : > { %2539 = vmatpush.msra.mxu3 %v242_v9  ;;  %1167 = vmatpush.msra.mxu0 %v242_v9  ;;  %v412_v9 = vld [vmem:[%s2652_s16 + $0xe0] sm:$0xff]  ;;  %4303 = vst [vmem:[#allocation9_spill] sm:$0xff] %v2813_v19  ;;  %v259_v58 = vld [vmem:[%s4220_s1 + $0xb8] sm:$0xff]  ;;  %v390_v3 = vld [vmem:[%s2652_s16 + $0x30] sm:$0xff] }
  0x20   : > { %2540 = vmatpush.msra.mxu1 %v241_v13  ;;  %2541 = vmatpush.msra.mxu2 %v241_v13  ;;  %4304 = vst [vmem:[#allocation10_spill] sm:$0xff] %v2824_v25  ;;  %v308_v2 = vld [vmem:[%s4220_s1 + $0x240] sm:$0xff]  ;;  %v403_v6 = vld [vmem:[%s2652_s16 + $0x98] sm:$0xff]  ;;  %v289_v11 = vld [vmem:[%s4220_s1 + $0x1a8] sm:$0xff] }
  0x21   : > { %2542 = vmatpush.msra.mxu3 %v241_v13  ;;  %1168 = vmatpush.msra.mxu0 %v241_v13  ;;  %v278_v13 = vld [vmem:[%s4220_s1 + $0x150] sm:$0xff]  ;;  %v427_v22 = vld [vmem:[%s2652_s16 + $0x158] sm:$0xff]  ;;  %v460_v27 = vmul.f32 %v2660_v10, %v403_v6  ;;  %v253_v6 = vld [vmem:[%s4220_s1 + $0x88] sm:$0xff] }
  0x22   : > { %2543 = vmatpush.msra.mxu1 %v240_v16  ;;  %2544 = vmatpush.msra.mxu2 %v240_v16 }
  0x23   : > { %2545 = vmatpush.msra.mxu3 %v240_v16  ;;  %1169 = vmatpush.msra.mxu0 %v240_v16  ;;  %v424_v16 = vld [vmem:[%s2652_s16 + $0x140] sm:$0xff] }
  0x24   : > { %2546 = vmatpush.msra.mxu1 %v239_v20  ;;  %2547 = vmatpush.msra.mxu2 %v239_v20 }
  0x25   : > { %2548 = vmatpush.msra.mxu3 %v239_v20  ;;  %1170 = vmatpush.msra.mxu0 %v239_v20  ;;  %v312_v20 = vld [vmem:[%s4220_s1 + $0x260] sm:$0xff] }
  0x26   : > { %2549 = vmatpush.msra.mxu1 %v238_v23  ;;  %2550 = vmatpush.msra.mxu2 %v238_v23 }
  0x27   : > { %2551 = vmatpush.msra.mxu3 %v238_v23  ;;  %1171 = vmatpush.msra.mxu0 %v238_v23  ;;  %v469_v23 = vmul.f32 %v2660_v10, %v412_v9  ;;  %v415_v9 = vld [vmem:[%s2652_s16 + $0xf8] sm:$0xff] }
  0x28   : > { %2552 = vmatpush.msra.mxu1 %v237_v28  ;;  %2553 = vmatpush.msra.mxu2 %v237_v28 }
  0x29   : > { %2554 = vmatpush.msra.mxu3 %v237_v28  ;;  %1172 = vmatpush.msra.mxu0 %v237_v28  ;;  %v481_v28 = vmul.f32 %v2660_v10, %v424_v16  ;;  %v526_v35 = vadd.f32 %v2675_v18, %v469_v23  ;;  %v257_v16 = vld [vmem:[%s4220_s1 + $0xa8] sm:$0xff]  ;;  %v288_v23 = vld [vmem:[%s4220_s1 + $0x1a0] sm:$0xff] }
  0x2a   : > { %2555 = vmatpush.msra.mxu1 %v236_v31  ;;  %2556 = vmatpush.msra.mxu2 %v236_v31 }
  0x2b   : > { %2422 = vmatmul.msk.f32.vlgmr.msra.gmra.mxu1 %vm2708_vm1, %v2700_v32  ;;  %2430 = vmatmul.msk.f32.vlgmr.msra.gmra.mxu2 %vm2708_vm1, %v2702_v33  ;;  %v2879_v52 = vmax.f32 %v526_v35, 0.0  ;;  %v484_v35 = vmul.f32 %v2660_v10, %v427_v22  ;;  %v406_v22 = vld [vmem:[%s2652_s16 + $0xb0] sm:$0xff] }
  0x2c   : > { %1384 = vmatpush.msrb.mxu2 %v283_v37  ;;  %2557 = vmatpush.msra.mxu3 %v236_v31  ;;  %v261_v37 = vld [vmem:[%s4220_s1 + $0xc8] sm:$0xff] }
  0x2d   : > { %2438 = vmatmul.msk.f32.vlgmr.msra.gmra.mxu3 %vm2708_vm1, %v2715_v38  ;;  %1271 = vmatpush.msrb.mxu1 %v267_v40  ;;  %v402_v40 = vld [vmem:[%s2652_s16 + $0x90] sm:$0xff]  ;;  %4306 = vst [vmem:[#allocation12_spill] sm:$0xff] %v2879_v52 }
  0x2e   : > { %1497 = vmatpush.msrb.mxu3 %v299_v41  ;;  %1385 = vmatpush.msrb.mxu2 %v282_v42  ;;  %v292_v41 = vld [vmem:[%s4220_s1 + $0x1c0] sm:$0xff]  ;;  %v310_v42 = vld [vmem:[%s4220_s1 + $0x250] sm:$0xff] }
  0x2f   : > { %1272 = vmatpush.msrb.mxu1 %v266_v45  ;;  %1173 = vmatpush.msra.mxu0 %v236_v31  ;;  %v388_v31 = vld [vmem:[%s2652_s16 + $0x20] sm:$0xff]  ;;  %v538_v45 = vadd.f32 %v2675_v18, %v481_v28  ;;  %v472_v28 = vmul.f32 %v2660_v10, %v415_v9 }
  0x30   : > { %1498 = vmatpush.msrb.mxu3 %v298_v48  ;;  %1386 = vmatpush.msrb.mxu2 %v281_v49  ;;  %v445_v48 = vmul.f32 %v2660_v10, %v388_v31  ;;  %v426_v49 = vld [vmem:[%s2652_s16 + $0x150] sm:$0xff] }
  0x31   : > { %1174 = vmatmul.f32.vlgmr.msra.gmra.mxu0 %v4225_v59  ;;  %1273 = vmatpush.msrb.mxu1 %v265_v51  ;;  %v2877_v51 = vmax.f32 %v514_v34, 0.0  ;;  %v483_v63 = vmul.f32 %v2660_v10, %v426_v49  ;;  %v286_v49 = vld [vmem:[%s4220_s1 + $0x190] sm:$0xff] }
  0x32   : > { %1499 = vmatpush.msrb.mxu3 %v297_v55  ;;  %1610 = vmatpush.msrb.mxu0 %v315_v56  ;;  %v459_v55 = vmul.f32 %v2660_v10, %v402_v40  ;;  %v471_v56 = vmul.f32 %v2660_v10, %v414_v43  ;;  %v391_v40 = vld [vmem:[%s2652_s16 + $0x38] sm:$0xff]  ;;  %v529_v43 = vadd.f32 %v2675_v18, %v472_v28  ;;  %v418_v28 = vld [vmem:[%s2652_s16 + $0x110] sm:$0xff] }
  0x33   : > { %1201 = vmatmul.f32.gmra.mxu1 %v2754_v53  ;;  %1225 = vmatmul.f32.gmra.mxu2 %v2756_v54  ;;  %4305 = vst [vmem:[#allocation11_spill] sm:$0xff] %v2877_v51  ;;  %v540_v14 = vadd.f32 %v2675_v18, %v483_v63  ;;  %v429_v63 = vld [vmem:[%s2652_s16 + $0x168] sm:$0xff] }
  0x34   : > { %1387 = vmatpush.msrb.mxu2 %v280_v61  ;;  %1500 = vmatpush.msrb.mxu3 %v296_v62  ;;  %v2892_v61 = vmax.f32 %v538_v45, 0.0  ;;  %v502_v62 = vadd.f32 %v2675_v18, %v445_v48  ;;  %v405_v45 = vld [vmem:[%s2652_s16 + $0xa8] sm:$0xff]  ;;  %v486_v9 = vmul.f32 %v2660_v10, %v429_v63 }
  0x35   : > { %1249 = vmatmul.f32.gmra.mxu3 %v2767_v60  ;;  %1611 = vmatpush.msrb.mxu0 %v314_v0  ;;  %v274_v0 = vld [vmem:[%s4220_s1 + $0x130] sm:$0xff]  ;;  %v2952_v31 = vmax.f32 %v540_v14, 0.0  ;;  %v417_v48 = vld [vmem:[%s2652_s16 + $0x108] sm:$0xff] }
  0x36   : > { %1274 = vmatpush.msrb.mxu1 %v264_v4  ;;  %1388 = vmatpush.msrb.mxu2 %v279_v5  ;;  %4307 = vst [vmem:[#allocation13_spill] sm:$0xff] %v2892_v61  ;;  %v516_v4 = vadd.f32 %v2675_v18, %v459_v55  ;;  %v528_v5 = vadd.f32 %v2675_v18, %v471_v56  ;;  %v393_v14 = vld [vmem:[%s2652_s16 + $0x48] sm:$0xff] }
  0x37   : > { %1501 = vmatpush.msrb.mxu3 %v295_v7  ;;  %1612 = vmatpush.msrb.mxu0 %v313_v8  ;;  %v258_v7 = vld [vmem:[%s4220_s1 + $0xb0] sm:$0xff]  ;;  %v273_v8 = vld [vmem:[%s4220_s1 + $0x128] sm:$0xff]  ;;  %4310 = vst [vmem:[#allocation16_spill] sm:$0xff] %v2952_v31  ;;  %v541_v56 = vadd.f32 %v2675_v18, %v484_v35  ;;  %v543_v35 = vadd.f32 %v2675_v18, %v486_v9 }
  0x38   : > { %1275 = vmatpush.msrb.mxu1 %v263_v12  ;;  %1389 = vmatpush.msrb.mxu2 %v278_v13  ;;  %v307_v12 = vld [vmem:[%s4220_s1 + $0x238] sm:$0xff]  ;;  %v2925_v13 = vmax.f32 %v502_v62, 0.0  ;;  %v269_v62 = vld [vmem:[%s4220_s1 + $0x108] sm:$0xff] }
  0x39   : > { %1177 = vmatmul.f32.gmra.mxu0 %v4225_v59  ;;  %1502 = vmatpush.msrb.mxu3 %v294_v15  ;;  %v447_v15 = vmul.f32 %v2660_v10, %v390_v3  ;;  %v462_v3 = vmul.f32 %v2660_v10, %v405_v45  ;;  %v475_v45 = vmul.f32 %v2660_v10, %v418_v28  ;;  %v389_v9 = vld [vmem:[%s2652_s16 + $0x28] sm:$0x3]  ;;  %v3134_v28 = vadd.s32 16, %v2681_v21 }
  0x3a   : > { %1613 = vmatpush.msrb.mxu0 %v312_v20  ;;  %1276 = vmatpush.msrb.mxu1 %v262_v24  ;;  %v272_v20 = vld [vmem:[%s4220_s1 + $0x120] sm:$0xff]  ;;  %v2939_v24 = vmax.f32 %v516_v4, 0.0  ;;  %v474_v4 = vmul.f32 %v2660_v10, %v417_v48 }
  0x3b   : > { %2424 = vmatmul.msk.f32.gmra.mxu1 %vm2708_vm1, %v2811_v17  ;;  %2432 = vmatmul.msk.f32.gmra.mxu2 %vm2708_vm1, %v2813_v19  ;;  %v504_v34 = vadd.f32 %v2675_v18, %v447_v15  ;;  %v302_v15 = vld [vmem:[%s4220_s1 + $0x210] sm:$0xff]  ;;  %vm741_vm3 = vcmp.eq.s32.totalorder %v3134_v28, 17 }
  0x3c   : > { %1390 = vmatpush.msrb.mxu2 %v277_v26  ;;  %1503 = vmatpush.msrb.mxu3 %v293_v29  ;;  %4308 = vst [vmem:[#allocation14_spill] sm:$0xff] %v2939_v24  ;;  %v2941_v26 = vmax.f32 %v528_v5, 0.0  ;;  %v306_v29 = vld [vmem:[%s4220_s1 + $0x230] sm:$0xff]  ;;  %v303_v5 = vld [vmem:[%s4220_s1 + $0x218] sm:$0xff] }
  0x3d   : > { %2440 = vmatmul.msk.f32.gmra.mxu3 %vm2708_vm1, %v2824_v25  ;;  %1614 = vmatpush.msrb.mxu0 %v311_v30  ;;  %v256_v30 = vld [vmem:[%s4220_s1 + $0xa0] sm:$0xff]  ;;  %v2991_v55 = vmax.f32 %v504_v34, 0.0 }
  0x3e   : > { %1277 = vmatpush.msrb.mxu1 %v261_v37  ;;  %1391 = vmatpush.msrb.mxu2 %v276_v39  ;;  %4309 = vst [vmem:[#allocation15_spill] sm:$0xff] %v2941_v26  ;;  %v271_v37 = vld [vmem:[%s4220_s1 + $0x118] sm:$0xff] }
  0x3f   : > { %1504 = vmatpush.msrb.mxu3 %v292_v41  ;;  %1615 = vmatpush.msrb.mxu0 %v310_v42  ;;  %v287_v39 = vld [vmem:[%s4220_s1 + $0x198] sm:$0xff]  ;;  %v305_v41 = vld [vmem:[%s4220_s1 + $0x228] sm:$0xff]  ;;  %v517_v42 = vadd.f32 %v2675_v18, %v460_v27 }
  0x40   : > { %1278 = vmatpush.msrb.mxu1 %v260_v46  ;;  %1392 = vmatpush.msrb.mxu2 %v275_v47  ;;  %v255_v46 = vld [vmem:[%s4220_s1 + $0x98] sm:$0xff]  ;;  %v270_v47 = vld [vmem:[%s4220_s1 + $0x110] sm:$0xff] }
  0x41   : > { %2416 = vmatmul.msk.f32.gmra.mxu0 %vm2708_vm1, %v2863_v44  ;;  %1505 = vmatpush.msrb.mxu3 %v291_v50  ;;  %v304_v50 = vld [vmem:[%s4220_s1 + $0x220] sm:$0xff]  ;;  %v347_v27 = vld [vmem:[%s4220_s1 + $0x378] sm:$0xff] }
  0x42   : > { %1616 = vmatpush.msrb.mxu0 %v309_v57  ;;  %1279 = vmatpush.msrb.mxu1 %v259_v58  ;;  %v448_v57 = vmul.f32 %v2660_v10, %v391_v40  ;;  %v254_v58 = vld [vmem:[%s4220_s1 + $0x90] sm:$0xff] }
  0x43   : > { %1207 = vmatmul.f32.gmra.mxu1 %v2877_v51  ;;  %1231 = vmatmul.f32.gmra.mxu2 %v2879_v52  ;;  %v430_v40 = vld [vmem:[%s2652_s16 + $0x170] sm:$0xff] }
  0x44   : > { %1393 = vmatpush.msrb.mxu2 %v274_v0  ;;  %1506 = vmatpush.msrb.mxu3 %v290_v1  ;;  %v285_v0 = vld [vmem:[%s4220_s1 + $0x188] sm:$0xff]  ;;  %v3005_v1 = vmax.f32 %v517_v42, 0.0 }
  0x45   : > { %1255 = vmatmul.f32.gmra.mxu3 %v2892_v61  ;;  %1617 = vmatpush.msrb.mxu0 %v308_v2  ;;  %v3007_v2 = vmax.f32 %v529_v43, 0.0  ;;  %v463_v43 = vmul.f32 %v2660_v10, %v406_v22  ;;  %v3127_v22 = vrot.slane %v4225_v59, 2 }
  0x46   : > { %1280 = vmatpush.msrb.mxu1 %v258_v7  ;;  %1394 = vmatpush.msrb.mxu2 %v273_v8  ;;  %4311 = vst [vmem:[#allocation17_spill] sm:$0xff] %v3005_v1  ;;  %v3020_v7 = vmax.f32 %v541_v56, 0.0  ;;  %v505_v8 = vadd.f32 %v2675_v18, %v448_v57  ;;  %v394_v56 = vld [vmem:[%s2652_s16 + $0x50] sm:$0xff] }
  0x47   : > { %1507 = vmatpush.msrb.mxu3 %v289_v11  ;;  %1618 = vmatpush.msrb.mxu0 %v307_v12  ;;  %4312 = vst [vmem:[#allocation18_spill] sm:$0xff] %v3007_v2  ;;  %v268_v11 = vld [vmem:[%s4220_s1 + $0x100] sm:$0xff]  ;;  %v520_v57 = vadd.f32 %v2675_v18, %v463_v43 }
  0x48   : > { %1281 = vmatpush.msrb.mxu1 %v257_v16  ;;  %1395 = vmatpush.msrb.mxu2 %v272_v20  ;;  %4313 = vst [vmem:[#allocation19_spill] sm:$0xff] %v3020_v7  ;;  %v284_v12 = vld [vmem:[%s4220_s1 + $0x180] sm:$0xff]  ;;  %v519_v16 = vadd.f32 %v2675_v18, %v462_v3  ;;  %v531_v20 = vadd.f32 %v2675_v18, %v474_v4  ;;  %v3053_v34 = vmax.f32 %v505_v8, 0.0  ;;  %v362_v4 = vld [vmem:[%s4220_s1 + $0x3f0] sm:$0xff] }
  0x49   : > { %1183 = vmatmul.f32.gmra.mxu0 %v2925_v13  ;;  %1508 = vmatpush.msrb.mxu3 %v288_v23  ;;  %v252_v23 = vld [vmem:[%s4220_s1 + $0x80] sm:$0xff]  ;;  %v451_v3 = vmul.f32 %v2660_v10, %v394_v56  ;;  %4321 = vst [vmem:[#allocation27_spill] sm:$0xff] %v3127_v22  ;;  %v377_v56 = vld [vmem:[%s4220_s1 + $0x468] sm:$0xff] }
  0x4a   : > { %1619 = vmatpush.msrb.mxu0 %v306_v29  ;;  %1282 = vmatpush.msrb.mxu1 %v256_v30  ;;  %v301_v29 = vld [vmem:[%s4220_s1 + $0x208] sm:$0xff]  ;;  %v363_v30 = vld [vmem:[%s4220_s1 + $0x3f8] sm:$0xff]  ;;  %v3063_v42 = vmax.f32 %v531_v20, 0.0  ;;  %v3124_v20 = vrot.slane %v4225_v59, 1 }
  0x4b   : > { %2426 = vmatmul.msk.f32.gmra.mxu1 %vm2708_vm1, %v2939_v24  ;;  %2434 = vmatmul.msk.f32.gmra.mxu2 %vm2708_vm1, %v2941_v26 }
  0x4c   : > { %1396 = vmatpush.msrb.mxu2 %v271_v37  ;;  %1509 = vmatpush.msrb.mxu3 %v287_v39  ;;  %v450_v37 = vmul.f32 %v2660_v10, %v393_v14  ;;  %v331_v39 = vld [vmem:[%s4220_s1 + $0x2f8] sm:$0xff]  ;;  %4315 = vst [vmem:[#allocation21_spill] sm:$0xff] %v3063_v42  ;;  %v446_v14 = vmul.f32 %v2660_v10, %v389_v9 }
  0x4d   : > { %2442 = vmatmul.msk.f32.gmra.mxu3 %vm2708_vm1, %v2952_v31  ;;  %1620 = vmatpush.msrb.mxu0 %v305_v41  ;;  %v3061_v41 = vmax.f32 %v519_v16, 0.0  ;;  %v378_v16 = vld [vmem:[%s4220_s1 + $0x470] sm:$0xff]  ;;  %4320 = vst [vmem:[#allocation26_spill] sm:$0xff] %v3124_v20 }
  0x4e   : > { %1283 = vmatpush.msrb.mxu1 %v255_v46  ;;  %1397 = vmatpush.msrb.mxu2 %v270_v47  ;;  %v300_v46 = vld [vmem:[%s4220_s1 + $0x200] sm:$0xff]  ;;  %v3071_v47 = vmax.f32 %v543_v35, 0.0  ;;  %v507_v48 = vadd.f32 %v2675_v18, %v450_v37  ;;  %v345_v37 = vld [vmem:[%s4220_s1 + $0x368] sm:$0xff] }
  0x4f   : > { %1510 = vmatpush.msrb.mxu3 %v286_v49  ;;  %1621 = vmatpush.msrb.mxu0 %v304_v50  ;;  %4314 = vst [vmem:[#allocation20_spill] sm:$0xff] %v3061_v41  ;;  %v487_v49 = vmul.f32 %v2660_v10, %v430_v40  ;;  %v379_v50 = vld [vmem:[%s4220_s1 + $0x478] sm:$0xff]  ;;  %v329_v40 = vld [vmem:[%s4220_s1 + $0x2e8] sm:$0xff] }
  0x50   : > { %1284 = vmatpush.msrb.mxu1 %v254_v58  ;;  %1398 = vmatpush.msrb.mxu2 %v269_v62  ;;  %4316 = vst [vmem:[#allocation22_spill] sm:$0xff] %v3071_v47  ;;  %v532_v58 = vadd.f32 %v2675_v18, %v475_v45  ;;  %v346_v62 = vld [vmem:[%s4220_s1 + $0x370] sm:$0xff]  ;;  %v3093_v63 = vmax.f32 %v507_v48, 0.0 }
  0x51   : > { %2418 = vmatmul.msk.f32.gmra.mxu0 %vm2708_vm1, %v2991_v55  ;;  %1511 = vmatpush.msrb.mxu3 %v285_v0  ;;  %v544_v0 = vadd.f32 %v2675_v18, %v487_v49 }
  0x52   : > { %1622 = vmatpush.msrb.mxu0 %v303_v5  ;;  %1285 = vmatpush.msrb.mxu1 %v253_v6  ;;  %v330_v5 = vld [vmem:[%s4220_s1 + $0x2f0] sm:$0xff]  ;;  %v3103_v6 = vmax.f32 %v520_v57, 0.0  ;;  %v3105_v8 = vmax.f32 %v532_v58, 0.0  ;;  %v802_v58 = vsel %vm682_vm0, 0.0, %v2991_v55 }
  0x53   : > { %1213 = vmatmul.f32.gmra.mxu1 %v3005_v1  ;;  %1237 = vmatmul.f32.gmra.mxu2 %v3007_v2 }
  0x54   : > { %1399 = vmatpush.msrb.mxu2 %v268_v11  ;;  %1512 = vmatpush.msrb.mxu3 %v284_v12  ;;  %4317 = vst [vmem:[#allocation23_spill] sm:$0xff] %v3103_v6  ;;  %v3111_v11 = vmax.f32 %v544_v0, 0.0  ;;  %v508_v12 = vadd.f32 %v2675_v18, %v451_v3  ;;  %v909_v3 = vrot.slane %v802_v58, 1 }
  0x55   : > { %1261 = vmatmul.f32.gmra.mxu3 %v3020_v7  ;;  %1623 = vmatpush.msrb.mxu0 %v302_v15  ;;  %4318 = vst [vmem:[#allocation24_spill] sm:$0xff] %v3105_v8 }
  0x56   : > { %1286 = vmatpush.msrb.mxu1 %v252_v23  ;;  %1836 = vmatpush.msra.mxu2 %v347_v27  ;;  %v3118_v15 = vmax.f32 %v508_v12, 0.0  ;;  %v799_v23 = vsel %vm682_vm0, 0.0, %v2863_v44  ;;  %v503_v27 = vadd.f32 %v2675_v18, %v446_v14  ;;  %v360_v12 = vld [vmem:[%s4220_s1 + $0x3e0] sm:$0xff] }
  0x57   : > { %1624 = vmatpush.msrb.mxu0 %v301_v29  ;;  %1949 = vmatpush.msra.mxu3 %v363_v30  ;;  %v904_v29 = vrot.slane %v799_v23, 1  ;;  %v905_v30 = vrot.slane %v2925_v13, 1  ;;  %v1017_v49 = vrot.slane %v799_v23, 2  ;;  %v328_v14 = vld [vmem:[%s4220_s1 + $0x2e0] sm:$0xff] }
  0x58   : > { %1723 = vmatpush.msra.mxu1 %v331_v39  ;;  %1837 = vmatpush.msra.mxu2 %v346_v62  ;;  %4319 = vst [vmem:[#allocation25_spill] sm:$0xff] %v3118_v15  ;;  %v557_v35 = vmax.f32 %v503_v27, 0.0  ;;  %v361_v39 = vld [vmem:[%s4220_s1 + $0x3e8] sm:$0xff] }
  0x59   : > { %1189 = vmatmul.f32.gmra.mxu0 %v3053_v34  ;;  %1950 = vmatpush.msra.mxu3 %v362_v4  ;;  %v906_v43 = vsel %vm898_vm2, %v904_v29, %v905_v30  ;;  %v395_v29 = vld [vmem:[%s2652_s16 + $0x58] sm:$0x3] }
  0x5a   : > { %1625 = vmatpush.msrb.mxu0 %v300_v46  ;;  %1724 = vmatpush.msra.mxu1 %v330_v5  ;;  %v801_v45 = vsel %vm741_vm3, 0.0, %v557_v35  ;;  %v392_v46 = vld [vmem:[%s2652_s16 + $0x40] sm:$0x3]  ;;  %v452_v35 = vmul.f32 %v2660_v10, %v395_v29  ;;  %v375_v29 = vld [vmem:[%s4220_s1 + $0x458] sm:$0xff] }
  0x5b   : > { %2428 = vmatmul.msk.f32.gmra.mxu1 %vm2708_vm1, %v3061_v41  ;;  %2436 = vmatmul.msk.f32.gmra.mxu2 %vm2708_vm1, %v3063_v42  ;;  %v907_v48 = vrot.slane %v801_v45, 1  ;;  %v344_v5 = vld [vmem:[%s4220_s1 + $0x360] sm:$0xff]  ;;  %v1020_v9 = vrot.slane %v801_v45, 2  ;;  %v805_v45 = vsel %vm682_vm0, 0.0, %v3093_v63 }
  0x5c   : > { %2062 = vmatpush.msra.mxu0 %v379_v50  ;;  %1838 = vmatpush.msra.mxu2 %v345_v37  ;;  %v1018_v50 = vrot.slane %v2925_v13, 2  ;;  %v1022_v37 = vrot.slane %v802_v58, 2  ;;  %v359_v58 = vld [vmem:[%s4220_s1 + $0x3d8] sm:$0xff] }
  0x5d   : > { %2444 = vmatmul.msk.f32.gmra.mxu3 %vm2708_vm1, %v3071_v47  ;;  %1725 = vmatpush.msra.mxu1 %v329_v40  ;;  %v908_v57 = vsel %vm898_vm2, %v905_v30, %v907_v48  ;;  %v376_v40 = vld [vmem:[%s4220_s1 + $0x460] sm:$0xff] }
  0x5e   : > { %2063 = vmatpush.msra.mxu0 %v378_v16  ;;  %1951 = vmatpush.msra.mxu3 %v361_v39  ;;  %v3171_v0 = vsel %vm1011_vm4, %v1017_v49, %v1018_v50  ;;  %v3193_v27 = vsel %vm1011_vm4, %v1018_v50, %v1020_v9  ;;  %v1023_v39 = vrot.slane %v3053_v34, 2  ;;  %v915_v49 = vrot.slane %v3118_v15, 1 }
  0x5f   : > { %1839 = vmatpush.msra.mxu2 %v344_v5  ;;  %1726 = vmatpush.msra.mxu1 %v328_v14  ;;  %v398_v5 = vld [vmem:[%s2652_s16 + $0x70] sm:$0x3]  ;;  %v1027_v14 = vrot.slane %v805_v45, 2 }
  0x60   : > { %2064 = vmatpush.msra.mxu0 %v377_v56  ;;  %1952 = vmatpush.msra.mxu3 %v360_v12  ;;  %v3212_v48 = vsel %vm1011_vm4, %v1022_v37, %v1023_v39  ;;  %v343_v56 = vld [vmem:[%s4220_s1 + $0x358] sm:$0xff]  ;;  %v455_v12 = vmul.f32 %v2660_v10, %v398_v5 }
  0x61   : > { %2420 = vmatmul.msk.f32.gmra.mxu0 %vm2708_vm1, %v3093_v63  ;;  %1840 = vmatpush.msra.mxu2 %v343_v56 }
  0x62   : > { %2065 = vmatpush.msra.mxu0 %v376_v40  ;;  %1953 = vmatpush.msra.mxu3 %v359_v58  ;;  %v512_v37 = vadd.f32 %v2675_v18, %v455_v12 }
  0x63   : > { %1219 = vmatmul.f32.gmra.mxu1 %v3103_v6  ;;  %1243 = vmatmul.f32.gmra.mxu2 %v3105_v8 }
  0x64   : > { %2066 = vmatpush.msra.mxu0 %v375_v29 }
  0x65   : > { %1267 = vmatmul.f32.gmra.mxu3 %v3111_v11 }
  0x69   : > { %1195 = vmatmul.f32.gmra.mxu0 %v3118_v15 }
  0x6b   : > { %1287 = vmatmul.f32.vlgmr.msrb.gmra.mxu1 %v3124_v20  ;;  %1400 = vmatmul.f32.vlgmr.msrb.gmra.mxu2 %v3127_v22 }
  0x6d   : > { %2446 = vmatmul.msk.f32.vlgmr.msrb.gmra.mxu3 %vm2708_vm1, %v2863_v44  ;;  %v449_v44 = vmul.f32 %v2660_v10, %v392_v46  ;;  %v509_v46 = vadd.f32 %v2675_v18, %v452_v35  ;;  %v808_v35 = vsel %vm682_vm0, 0.0, %v2700_v32 }
  0x6e   : > { %v919_v40 = vrot.slane %v808_v35, 1  ;;  %v1032_v12 = vrot.slane %v808_v35, 2 }
  0x6f   : > { %v506_v62 = vadd.f32 %v2675_v18, %v449_v44  ;;  %v914_v44 = vrot.slane %v805_v45, 1  ;;  %v563_v50 = vmax.f32 %v509_v46, 0.0  ;;  %v920_v45 = vrot.slane %v2754_v53, 1 }
  0x70   : > { %v566_v46 = vmax.f32 %v512_v37, 0.0  ;;  %v811_v37 = vsel %vm682_vm0, 0.0, %v2811_v17 }
  0x71   : > { %1626 = vmatmul.f32.vlgmr.msrb.gmra.mxu0 %v906_v43  ;;  %v560_v4 = vmax.f32 %v506_v62, 0.0  ;;  %v3228_v62 = vsel %vm898_vm2, %v914_v44, %v915_v49  ;;  %v342_v44 = vld [vmem:[%s4220_s1 + $0x350] sm:$0xff]  ;;  %v3272_v56 = vsel %vm898_vm2, %v919_v40, %v920_v45 }
  0x72   : > { %4322 = vst [vmem:[#allocation28_spill] sm:$0xff] %v3228_v62  ;;  %1841 = vmatpush.msra.mxu2 %v342_v44  ;;  %v810_v58 = vsel %vm741_vm3, 0.0, %v566_v46  ;;  %v924_v44 = vrot.slane %v811_v37, 1 }
  0x73   : > { %1290 = vmatmul.f32.gmra.mxu1 %v3124_v20  ;;  %1403 = vmatmul.f32.gmra.mxu2 %v3127_v22  ;;  %v804_v23 = vsel %vm741_vm3, 0.0, %v560_v4  ;;  %4325 = vst [vmem:[#allocation31_spill] sm:$0xff] %v3272_v56  ;;  %v922_v5 = vrot.slane %v810_v58, 1  ;;  %v404_v22 = vld [vmem:[%s2652_s16 + $0xa0] sm:$0x3]  ;;  %v1037_v20 = vrot.slane %v811_v37, 2 }
  0x74   : > { %v912_v30 = vrot.slane %v804_v23, 1 }
  0x75   : > { %1516 = vmatmul.f32.gmra.mxu3 %v2925_v13  ;;  %v910_v13 = vrot.slane %v3053_v34, 1  ;;  %v3293_v29 = vsel %vm898_vm2, %v920_v45, %v922_v5 }
  0x76   : > { %4327 = vst [vmem:[#allocation33_spill] sm:$0xff] %v3293_v29 }
  0x77   : > { %v3188_v16 = vsel %vm898_vm2, %v909_v3, %v910_v13  ;;  %v327_v3 = vld [vmem:[%s4220_s1 + $0x2d8] sm:$0xff] }
  0x78   : > { %1727 = vmatpush.msra.mxu1 %v327_v3 }
  0x79   : > { %1629 = vmatmul.f32.gmra.mxu0 %v908_v57 }
  0x7b   : > { %1293 = vmatmul.f32.gmra.mxu1 %v906_v43  ;;  %1406 = vmatmul.f32.gmra.mxu2 %v3171_v0  ;;  %v3205_v43 = vsel %vm898_vm2, %v910_v13, %v912_v30  ;;  %v807_v13 = vsel %vm741_vm3, 0.0, %v563_v50  ;;  %v358_v50 = vld [vmem:[%s4220_s1 + $0x3d0] sm:$0xff] }
  0x7c   : > { %v917_v9 = vrot.slane %v807_v13, 1  ;;  %1954 = vmatpush.msra.mxu3 %v358_v50  ;;  %v341_v50 = vld [vmem:[%s4220_s1 + $0x348] sm:$0xff] }
  0x7d   : > { %2448 = vmatmul.msk.f32.gmra.mxu3 %vm2708_vm1, %v2991_v55  ;;  %1842 = vmatpush.msra.mxu2 %v341_v50 }
  0x7e   : > { %v3249_v30 = vsel %vm898_vm2, %v915_v49, %v917_v9  ;;  %v1030_v49 = vrot.slane %v807_v13, 2  ;;  %v401_v13 = vld [vmem:[%s2652_s16 + $0x88] sm:$0x3] }
  0x7f   : > { %4323 = vst [vmem:[#allocation29_spill] sm:$0xff] %v3249_v30  ;;  %v458_v9 = vmul.f32 %v2660_v10, %v401_v13  ;;  %v357_v13 = vld [vmem:[%s4220_s1 + $0x3c8] sm:$0xff] }
  0x80   : > { %1955 = vmatpush.msra.mxu3 %v357_v13  ;;  %v461_v13 = vmul.f32 %v2660_v10, %v404_v22  ;;  %v814_v10 = vsel %vm682_vm0, 0.0, %v2939_v24 }
  0x81   : > { %1632 = vmatmul.f32.gmra.mxu0 %v3188_v16  ;;  %v515_v40 = vadd.f32 %v2675_v18, %v458_v9 }
  0x82   : > { %v518_v22 = vadd.f32 %v2675_v18, %v461_v13  ;;  %v340_v18 = vld [vmem:[%s4220_s1 + $0x340] sm:$0xff] }
  0x83   : > { %1296 = vmatmul.f32.gmra.mxu1 %v908_v57  ;;  %1409 = vmatmul.f32.gmra.mxu2 %v3193_v27  ;;  %v1025_v57 = vrot.slane %v804_v23, 2  ;;  %v1028_v23 = vrot.slane %v3118_v15, 2  ;;  %v569_v45 = vmax.f32 %v515_v40, 0.0 }
  0x84   : > { %1843 = vmatpush.msra.mxu2 %v340_v18 }
  0x85   : > { %1522 = vmatmul.f32.gmra.mxu3 %v3053_v34  ;;  %v3236_v4 = vsel %vm1011_vm4, %v1023_v39, %v1025_v57  ;;  %v3256_v39 = vsel %vm1011_vm4, %v1027_v14, %v1028_v23  ;;  %v326_v57 = vld [vmem:[%s4220_s1 + $0x2d0] sm:$0xff]  ;;  %v3280_v3 = vsel %vm1011_vm4, %v1028_v23, %v1030_v49  ;;  %v1033_v14 = vrot.slane %v2754_v53, 2 }
  0x86   : > { %4324 = vst [vmem:[#allocation30_spill] sm:$0xff] %v3256_v39  ;;  %1728 = vmatpush.msra.mxu1 %v326_v57  ;;  %v374_v23 = vld [vmem:[%s4220_s1 + $0x450] sm:$0xff]  ;;  %v925_v49 = vrot.slane %v2877_v51, 1  ;;  %v1035_v57 = vrot.slane %v810_v58, 2  ;;  %v325_v58 = vld [vmem:[%s4220_s1 + $0x2c8] sm:$0xff] }
  0x87   : > { %4326 = vst [vmem:[#allocation32_spill] sm:$0xff] %v3280_v3  ;;  %2067 = vmatpush.msra.mxu0 %v374_v23  ;;  %v3302_v35 = vsel %vm1011_vm4, %v1032_v12, %v1033_v14  ;;  %v813_v23 = vsel %vm741_vm3, 0.0, %v569_v45  ;;  %v1038_v45 = vrot.slane %v2877_v51, 2 }
  0x88   : > { %4328 = vst [vmem:[#allocation34_spill] sm:$0xff] %v3302_v35  ;;  %v3322_v12 = vsel %vm898_vm2, %v924_v44, %v925_v49  ;;  %1729 = vmatpush.msra.mxu1 %v325_v58  ;;  %v3334_v59 = vsel %vm1011_vm4, %v1033_v14, %v1035_v57  ;;  %v927_v44 = vrot.slane %v813_v23, 1  ;;  %v373_v14 = vld [vmem:[%s4220_s1 + $0x448] sm:$0xff]  ;;  %v1040_v13 = vrot.slane %v813_v23, 2  ;;  %v324_v23 = vld [vmem:[%s4220_s1 + $0x2c0] sm:$0xff] }
  0x89   : > { %1635 = vmatmul.f32.gmra.mxu0 %v3205_v43  ;;  %4329 = vst [vmem:[#allocation35_spill] sm:$0xff] %v3322_v12 }
  0x8a   : > { %4331 = vst [vmem:[#allocation37_spill] sm:$0xff] %v3334_v59  ;;  %2068 = vmatpush.msra.mxu0 %v373_v14  ;;  %1730 = vmatpush.msra.mxu1 %v324_v23  ;;  %v1042_v23 = vrot.slane %v814_v10, 2 }
  0x8b   : > { %1299 = vmatmul.f32.gmra.mxu1 %v3188_v16  ;;  %1412 = vmatmul.f32.gmra.mxu2 %v3212_v48 }
  0x8d   : > { %2450 = vmatmul.msk.f32.gmra.mxu3 %vm2708_vm1, %v3093_v63 }
  0x91   : > { %1638 = vmatmul.f32.gmra.mxu0 %v3228_v62 }
  0x93   : > { %1302 = vmatmul.f32.gmra.mxu1 %v3205_v43  ;;  %1415 = vmatmul.f32.gmra.mxu2 %v3236_v4 }
  0x95   : > { %1528 = vmatmul.f32.gmra.mxu3 %v3118_v15  ;;  %v1053_v15 = vrot.slane %v2756_v54, 2 }
  0x99   : > { %1641 = vmatmul.f32.gmra.mxu0 %v3249_v30 }
  0x9b   : > { %1305 = vmatmul.f32.gmra.mxu1 %v3228_v62  ;;  %1418 = vmatmul.f32.gmra.mxu2 %v3256_v39  ;;  %v945_v39 = vrot.slane %v2879_v52, 1  ;;  %v416_v62 = vld [vmem:[%s2652_s16 + $0x100] sm:$0x3] }
  0x9d   : > { %2452 = vmatmul.msk.f32.gmra.mxu3 %vm2708_vm1, %v2700_v32 }
  0xa1   : > { %1644 = vmatmul.f32.gmra.mxu0 %v3272_v56 }
  0xa3   : > { %1308 = vmatmul.f32.gmra.mxu1 %v3249_v30  ;;  %1421 = vmatmul.f32.gmra.mxu2 %v3280_v3  ;;  %v1048_v30 = vrot.slane %v3103_v6, 2 }
  0xa5   : > { %1534 = vmatmul.f32.gmra.mxu3 %v2754_v53 }
  0xa8   : > { %v3299_v46 = vpop.f32.mrf.mxu1 }
  0xa9   : > { %1647 = vmatmul.f32.gmra.mxu0 %v3293_v29 }
  0xab   : > { %1311 = vmatmul.f32.gmra.mxu1 %v3272_v56  ;;  %1424 = vmatmul.f32.gmra.mxu2 %v3302_v35 }
  0xad   : > { %2454 = vmatmul.msk.f32.gmra.mxu3 %vm2708_vm1, %v2811_v17  ;;  %v3362_v17 = vsel %vm1011_vm4, %v1037_v20, %v1038_v45  ;;  %v356_v20 = vld [vmem:[%s4220_s1 + $0x3c0] sm:$0xff] }
  0xae   : > { %v3317_v5 = vpop.f32.mrf.mxu2  ;;  %v3319_v9 = vpop.f32.mrf.mxu0  ;;  %4334 = vst [vmem:[#allocation40_spill] sm:$0xff] %v3362_v17  ;;  %1956 = vmatpush.msra.mxu3 %v356_v20 }
  0xb0   : > { %v3329_v40 = vpop.f32.mrf.mxu1  ;;  %v3331_v50 = vpop.f32.mrf.mxu3 }
  0xb1   : > { %4330 = vst [vmem:[#allocation36_spill] sm:$0xff] %v3331_v50  ;;  %1650 = vmatmul.f32.gmra.mxu0 %v3322_v12  ;;  %v3351_v50 = vsel %vm898_vm2, %v925_v49, %v927_v44  ;;  %v930_v49 = vrot.slane %v3005_v1, 1  ;;  %v572_v44 = vmax.f32 %v518_v22, 0.0 }
  0xb2   : > { %4332 = vst [vmem:[#allocation38_spill] sm:$0xff] %v3351_v50 }
  0xb3   : > { %1314 = vmatmul.f32.gmra.mxu1 %v3293_v29  ;;  %1427 = vmatmul.f32.gmra.mxu2 %v3334_v59  ;;  %v929_v59 = vrot.slane %v814_v10, 1  ;;  %v816_v18 = vsel %vm741_vm3, 0.0, %v572_v44  ;;  %v407_v29 = vld [vmem:[%s2652_s16 + $0xb8] sm:$0x3]  ;;  %v3403_v44 = vld [vmem:[%s4221_s2] ss:$0 sm:$0xff] }
  0xb4   : > { %v464_v20 = vmul.f32 %v3403_v44, %v407_v29  ;;  %v817_v29 = vsel %vm682_vm0, 0.0, %v3061_v41  ;;  %v3424_v10 = vld [vmem:[%s4222_s3] ss:$0 sm:$0xff]  ;;  %v1045_v32 = vrot.slane %v816_v18, 2 }
  0xb5   : > { %1540 = vmatmul.f32.gmra.mxu3 %v2877_v51  ;;  %v3382_v22 = vsel %vm898_vm2, %v929_v59, %v930_v49  ;;  %v932_v59 = vrot.slane %v816_v18, 1 }
  0xb6   : > { %v3346_v57 = vpop.f32.mrf.mxu2  ;;  %v3348_v58 = vpop.f32.mrf.mxu0  ;;  %4336 = vst [vmem:[#allocation42_spill] sm:$0xff] %v3382_v22 }
  0xb8   : > { %v3357_v37 = vpop.f32.mrf.mxu1  ;;  %v3359_v51 = vpop.f32.mrf.mxu3 }
  0xb9   : > { %4333 = vst [vmem:[#allocation39_spill] sm:$0xff] %v3359_v51  ;;  %1653 = vmatmul.f32.gmra.mxu0 %v3351_v50 }
  0xbb   : > { %1317 = vmatmul.f32.gmra.mxu1 %v3322_v12  ;;  %1430 = vmatmul.f32.gmra.mxu2 %v3362_v17  ;;  %v3394_v12 = vsel %vm1011_vm4, %v1038_v45, %v1040_v13  ;;  %v372_v45 = vld [vmem:[%s4220_s1 + $0x440] sm:$0xff] }
  0xbc   : > { %4338 = vst [vmem:[#allocation44_spill] sm:$0xff] %v3394_v12  ;;  %2069 = vmatpush.msra.mxu0 %v372_v45 }
  0xbd   : > { %2456 = vmatmul.msk.f32.gmra.mxu3 %vm2708_vm1, %v2939_v24 }
  0xbe   : > { %v3377_v14 = vpop.f32.mrf.mxu2  ;;  %v3379_v51 = vpop.f32.mrf.mxu0 }
  0xbf   : > { %4335 = vst [vmem:[#allocation41_spill] sm:$0xff] %v3377_v14 }
  0xc0   : > { %v3389_v24 = vpop.f32.mrf.mxu1  ;;  %v3391_v17 = vpop.f32.mrf.mxu3 }
  0xc1   : > { %4337 = vst [vmem:[#allocation43_spill] sm:$0xff] %v3391_v17  ;;  %1656 = vmatmul.f32.gmra.mxu0 %v3382_v22  ;;  %v1043_v17 = vrot.slane %v3005_v1, 2 }
  0xc3   : > { %1320 = vmatmul.f32.gmra.mxu1 %v3351_v50  ;;  %1433 = vmatmul.f32.gmra.mxu2 %v3394_v12  ;;  %v3416_v12 = vsel %vm898_vm2, %v930_v49, %v932_v59  ;;  %v3432_v56 = vsel %vm1011_vm4, %v1042_v23, %v1043_v17  ;;  %v934_v49 = vrot.slane %v817_v29, 1  ;;  %v935_v59 = vrot.slane %v3103_v6, 1  ;;  %v355_v23 = vld [vmem:[%s4220_s1 + $0x3b8] sm:$0xff] }
  0xc4   : > { %4340 = vst [vmem:[#allocation46_spill] sm:$0xff] %v3416_v12  ;;  %1957 = vmatpush.msra.mxu3 %v355_v23  ;;  %v3464_v3 = vsel %vm1011_vm4, %v1043_v17, %v1045_v32  ;;  %v1047_v23 = vrot.slane %v817_v29, 2  ;;  %v371_v32 = vld [vmem:[%s4220_s1 + $0x438] sm:$0xff] }
  0xc5   : > { %1546 = vmatmul.f32.gmra.mxu3 %v3005_v1  ;;  %v521_v1 = vadd.f32 %v3424_v10, %v464_v20  ;;  %4342 = vst [vmem:[#allocation48_spill] sm:$0xff] %v3432_v56  ;;  %v339_v20 = vld [vmem:[%s4220_s1 + $0x338] sm:$0xff]  ;;  %2070 = vmatpush.msra.mxu0 %v371_v32 }
  0xc6   : > { %v3411_v13 = vpop.f32.mrf.mxu2  ;;  %v3413_v50 = vpop.f32.mrf.mxu0  ;;  %1844 = vmatpush.msra.mxu2 %v339_v20  ;;  %v323_v20 = vld [vmem:[%s4220_s1 + $0x2b8] sm:$0xff]  ;;  %4346 = vst [vmem:[#allocation52_spill] sm:$0xff] %v3464_v3 }
  0xc7   : > { %4339 = vst [vmem:[#allocation45_spill] sm:$0xff] %v3411_v13  ;;  %v575_v45 = vmax.f32 %v521_v1, 0.0  ;;  %v3452_v1 = vsel %vm898_vm2, %v934_v49, %v935_v59  ;;  %1731 = vmatpush.msra.mxu1 %v323_v20 }
  0xc8   : > { %v3427_v53 = vpop.f32.mrf.mxu1  ;;  %v3429_v35 = vpop.f32.mrf.mxu3  ;;  %4344 = vst [vmem:[#allocation50_spill] sm:$0xff] %v3452_v1 }
  0xc9   : > { %4341 = vst [vmem:[#allocation47_spill] sm:$0xff] %v3429_v35  ;;  %1659 = vmatmul.f32.gmra.mxu0 %v3416_v12  ;;  %v819_v18 = vsel %vm741_vm3, 0.0, %v575_v45 }
  0xca   : > { %v937_v49 = vrot.slane %v819_v18, 1  ;;  %v1050_v32 = vrot.slane %v819_v18, 2 }
  0xcb   : > { %1323 = vmatmul.f32.gmra.mxu1 %v3382_v22  ;;  %1436 = vmatmul.f32.gmra.mxu2 %v3432_v56 }
  0xcc   : > { %v3524_v13 = vsel %vm1011_vm4, %v1048_v30, %v1050_v32 }
  0xcd   : > { %2458 = vmatmul.msk.f32.gmra.mxu3 %vm2708_vm1, %v3061_v41  ;;  %4354 = vst [vmem:[#allocation60_spill] sm:$0xff] %v3524_v13 }
  0xce   : > { %v3447_v35 = vpop.f32.mrf.mxu2  ;;  %v3449_v22 = vpop.f32.mrf.mxu0 }
  0xcf   : > { %4343 = vst [vmem:[#allocation49_spill] sm:$0xff] %v3447_v35  ;;  %v410_v35 = vld [vmem:[%s2652_s16 + $0xd0] sm:$0x3] }
  0xd0   : > { %v3459_v41 = vpop.f32.mrf.mxu1  ;;  %v3461_v56 = vpop.f32.mrf.mxu3  ;;  %v467_v45 = vmul.f32 %v3403_v44, %v410_v35  ;;  %v820_v35 = vsel %vm682_vm0, 0.0, %v2702_v33 }
  0xd1   : > { %4345 = vst [vmem:[#allocation51_spill] sm:$0xff] %v3461_v56  ;;  %1662 = vmatmul.f32.gmra.mxu0 %v3452_v1  ;;  %v3481_v56 = vsel %vm898_vm2, %v935_v59, %v937_v49  ;;  %v940_v59 = vrot.slane %v2756_v54, 1 }
  0xd2   : > { %4348 = vst [vmem:[#allocation54_spill] sm:$0xff] %v3481_v56  ;;  %v524_v29 = vadd.f32 %v3424_v10, %v467_v45  ;;  %v338_v45 = vld [vmem:[%s4220_s1 + $0x330] sm:$0xff] }
  0xd3   : > { %1326 = vmatmul.f32.gmra.mxu1 %v3416_v12  ;;  %1439 = vmatmul.f32.gmra.mxu2 %v3464_v3  ;;  %v3492_v12 = vsel %vm1011_vm4, %v1047_v23, %v1048_v30  ;;  %v354_v23 = vld [vmem:[%s4220_s1 + $0x3b0] sm:$0xff] }
  0xd4   : > { %4350 = vst [vmem:[#allocation56_spill] sm:$0xff] %v3492_v12  ;;  %v578_v49 = vmax.f32 %v524_v29, 0.0  ;;  %1845 = vmatpush.msra.mxu2 %v338_v45  ;;  %1958 = vmatpush.msra.mxu3 %v354_v23  ;;  %v322_v45 = vld [vmem:[%s4220_s1 + $0x2b0] sm:$0xff]  ;;  %v1052_v23 = vrot.slane %v820_v35, 2 }
  0xd5   : > { %1552 = vmatmul.f32.gmra.mxu3 %v3103_v6  ;;  %1732 = vmatpush.msra.mxu1 %v322_v45  ;;  %v370_v30 = vld [vmem:[%s4220_s1 + $0x430] sm:$0xff] }
  0xd6   : > { %v3476_v17 = vpop.f32.mrf.mxu2  ;;  %v3478_v20 = vpop.f32.mrf.mxu0  ;;  %v822_v18 = vsel %vm741_vm3, 0.0, %v578_v49  ;;  %2071 = vmatpush.msra.mxu0 %v370_v30  ;;  %v353_v30 = vld [vmem:[%s4220_s1 + $0x3a8] sm:$0xff] }
  0xd7   : > { %4347 = vst [vmem:[#allocation53_spill] sm:$0xff] %v3476_v17  ;;  %v939_v17 = vrot.slane %v820_v35, 1  ;;  %1959 = vmatpush.msra.mxu3 %v353_v30 }
  0xd8   : > { %v3487_v3 = vpop.f32.mrf.mxu1  ;;  %v3489_v6 = vpop.f32.mrf.mxu3 }
  0xd9   : > { %4349 = vst [vmem:[#allocation55_spill] sm:$0xff] %v3489_v6  ;;  %1665 = vmatmul.f32.gmra.mxu0 %v3481_v56  ;;  %v3512_v29 = vsel %vm898_vm2, %v939_v17, %v940_v59  ;;  %v942_v17 = vrot.slane %v822_v18, 1 }
  0xda   : > { %4352 = vst [vmem:[#allocation58_spill] sm:$0xff] %v3512_v29 }
  0xdb   : > { %1329 = vmatmul.f32.gmra.mxu1 %v3452_v1  ;;  %1442 = vmatmul.f32.gmra.mxu2 %v3492_v12 }
  0xdd   : > { %2460 = vmatmul.msk.f32.gmra.mxu3 %vm2708_vm1, %v2702_v33 }
  0xde   : > { %v3507_v6 = vpop.f32.mrf.mxu2  ;;  %v3509_v1 = vpop.f32.mrf.mxu0 }
  0xdf   : > { %4351 = vst [vmem:[#allocation57_spill] sm:$0xff] %v3507_v6  ;;  %v413_v6 = vld [vmem:[%s2652_s16 + $0xe8] sm:$0x3] }
  0xe0   : > { %v3519_v33 = vpop.f32.mrf.mxu1  ;;  %v3521_v12 = vpop.f32.mrf.mxu3  ;;  %v470_v49 = vmul.f32 %v3403_v44, %v413_v6  ;;  %v823_v6 = vsel %vm682_vm0, 0.0, %v2813_v19 }
  0xe1   : > { %4353 = vst [vmem:[#allocation59_spill] sm:$0xff] %v3521_v12  ;;  %1668 = vmatmul.f32.gmra.mxu0 %v3512_v29  ;;  %v3541_v12 = vsel %vm898_vm2, %v940_v59, %v942_v17  ;;  %v337_v17 = vld [vmem:[%s4220_s1 + $0x328] sm:$0xff] }
  0xe2   : > { %v527_v35 = vadd.f32 %v3424_v10, %v470_v49  ;;  %v1055_v49 = vrot.slane %v822_v18, 2  ;;  %1846 = vmatpush.msra.mxu2 %v337_v17 }
  0xe3   : > { %1332 = vmatmul.f32.gmra.mxu1 %v3481_v56  ;;  %1445 = vmatmul.f32.gmra.mxu2 %v3524_v13  ;;  %v3550_v56 = vsel %vm1011_vm4, %v1052_v23, %v1053_v15 }
  0xe4   : > { %4357 = vst [vmem:[#allocation63_spill] sm:$0xff] %v3550_v56  ;;  %v581_v59 = vmax.f32 %v527_v35, 0.0 }
  0xe5   : > { %1558 = vmatmul.f32.gmra.mxu3 %v2756_v54 }
  0xe6   : > { %v3536_v32 = vpop.f32.mrf.mxu2  ;;  %v3538_v45 = vpop.f32.mrf.mxu0  ;;  %v825_v18 = vsel %vm741_vm3, 0.0, %v581_v59  ;;  %v1057_v59 = vrot.slane %v823_v6, 2 }
  0xe7   : > { %4355 = vst [vmem:[#allocation61_spill] sm:$0xff] %v3536_v32  ;;  %v944_v32 = vrot.slane %v823_v6, 1 }
  0xe8   : > { %v3547_v13 = vpop.f32.mrf.mxu3  ;;  %v1288_v54 = vpop.f32.mrf.mxu1 }
  0xe9   : > { %4356 = vst [vmem:[#allocation62_spill] sm:$0xff] %v3547_v13  ;;  %1671 = vmatmul.f32.gmra.mxu0 %v3541_v12  ;;  %v1289_v23 = vadd.f32 %v1288_v54, %v3319_v9  ;;  %v3567_v35 = vsel %vm898_vm2, %v944_v32, %v945_v39  ;;  %v321_v54 = vld [vmem:[%s4220_s1 + $0x2a8] sm:$0xff]  ;;  %v947_v32 = vrot.slane %v825_v18, 1 }
  0xea   : > { %1733 = vmatpush.msra.mxu1 %v321_v54 }
  0xeb   : > { %1335 = vmatmul.f32.gmra.mxu1 %v3512_v29  ;;  %1448 = vmatmul.f32.gmra.mxu2 %v3550_v56 }
  0xed   : > { %2462 = vmatmul.msk.f32.gmra.mxu3 %vm2708_vm1, %v2813_v19  ;;  %v3575_v19 = vsel %vm1011_vm4, %v1053_v15, %v1055_v49 }
  0xee   : > { %v1401_v13 = vpop.f32.mrf.mxu2  ;;  %v1627_v56 = vpop.f32.mrf.mxu0 }
  0xef   : > { %v1402_v29 = vadd.f32 %v1401_v13, %v1289_v23  ;;  %v473_v13 = vmul.f32 %v3403_v44, %v416_v62  ;;  %v1058_v23 = vrot.slane %v2879_v52, 2  ;;  %v826_v62 = vsel %vm682_vm0, 0.0, %v2941_v26 }
  0xf0   : > { %v1291_v9 = vpop.f32.mrf.mxu1  ;;  %v1514_v17 = vpop.f32.mrf.mxu3 }
  0xf1   : > { %v1515_v14 = vadd.f32 %v1514_v17, %v1402_v29  ;;  %1674 = vmatmul.f32.gmra.mxu0 %v3567_v35  ;;  %v1292_v15 = vadd.f32 %v1291_v9, %v3348_v58  ;;  %v369_v29 = vld [vmem:[%s4220_s1 + $0x428] sm:$0xff]  ;;  %v530_v6 = vadd.f32 %v3424_v10, %v473_v13  ;;  %v3598_v17 = vsel %vm1011_vm4, %v1057_v59, %v1058_v23  ;;  %v336_v13 = vld [vmem:[%s4220_s1 + $0x320] sm:$0xff] }
  0xf2   : > { %2072 = vmatpush.msra.mxu0 %v369_v29  ;;  %v1060_v59 = vrot.slane %v825_v18, 2  ;;  %1847 = vmatpush.msra.mxu2 %v336_v13 }
  0xf3   : > { %v3579_v30 = vadd.f32 %v1627_v56, %v1515_v14  ;;  %1338 = vmatmul.f32.gmra.mxu1 %v3541_v12  ;;  %1451 = vmatmul.f32.gmra.mxu2 %v3575_v19  ;;  %v3591_v14 = vsel %vm898_vm2, %v945_v39, %v947_v32  ;;  %v950_v39 = vrot.slane %v3007_v2, 1 }
  0xf4   : > { %v3625_v13 = vsel %vm1011_vm4, %v1058_v23, %v1060_v59  ;;  %v368_v59 = vld [vmem:[%s4220_s1 + $0x420] sm:$0xff] }
  0xf5   : > { %4358 = vst [vmem:[#allocation64_spill] sm:$0xff] %v3579_v30  ;;  %1564 = vmatmul.f32.gmra.mxu3 %v2879_v52  ;;  %v949_v52 = vrot.slane %v826_v62, 1  ;;  %2073 = vmatpush.msra.mxu0 %v368_v59 }
  0xf6   : > { %v1404_v49 = vpop.f32.mrf.mxu2  ;;  %v1630_v56 = vpop.f32.mrf.mxu0 }
  0xf7   : > { %v1405_v54 = vadd.f32 %v1404_v49, %v1292_v15  ;;  %v584_v15 = vmax.f32 %v530_v6, 0.0 }
  0xf8   : > { %v1294_v58 = vpop.f32.mrf.mxu1  ;;  %v1517_v9 = vpop.f32.mrf.mxu3 }
  0xf9   : > { %v1518_v30 = vadd.f32 %v1517_v9, %v1405_v54  ;;  %1677 = vmatmul.f32.gmra.mxu0 %v3591_v14  ;;  %v1295_v29 = vadd.f32 %v1294_v58, %v3379_v51  ;;  %v3617_v54 = vsel %vm898_vm2, %v949_v52, %v950_v39  ;;  %v828_v18 = vsel %vm741_vm3, 0.0, %v584_v15  ;;  %v320_v51 = vld [vmem:[%s4220_s1 + $0x2a0] sm:$0xff] }
  0xfa   : > { %1734 = vmatpush.msra.mxu1 %v320_v51  ;;  %v952_v52 = vrot.slane %v828_v18, 1 }
  0xfb   : > { %v3602_v32 = vadd.f32 %v1630_v56, %v1518_v30  ;;  %1341 = vmatmul.f32.gmra.mxu1 %v3567_v35  ;;  %1454 = vmatmul.f32.gmra.mxu2 %v3598_v17  ;;  %v352_v30 = vld [vmem:[%s4220_s1 + $0x3a0] sm:$0xff] }
  0xfc   : > { %1960 = vmatpush.msra.mxu3 %v352_v30 }
  0xfd   : > { %4359 = vst [vmem:[#allocation65_spill] sm:$0xff] %v3602_v32  ;;  %2464 = vmatmul.msk.f32.gmra.mxu3 %vm2708_vm1, %v2941_v26  ;;  %v419_v32 = vld [vmem:[%s2652_s16 + $0x118] sm:$0x3] }
  0xfe   : > { %v1407_v49 = vpop.f32.mrf.mxu2  ;;  %v1633_v56 = vpop.f32.mrf.mxu0  ;;  %v476_v15 = vmul.f32 %v3403_v44, %v419_v32 }
  0xff   : > { %v1408_v6 = vadd.f32 %v1407_v49, %v1295_v29  ;;  %v1062_v29 = vrot.slane %v826_v62, 2  ;;  %v1063_v49 = vrot.slane %v3007_v2, 2  ;;  %v829_v62 = vsel %vm682_vm0, 0.0, %v3063_v42 }
 0x100   : > { %v1297_v58 = vpop.f32.mrf.mxu1  ;;  %v1520_v9 = vpop.f32.mrf.mxu3  ;;  %v533_v32 = vadd.f32 %v3424_v10, %v476_v15  ;;  %v335_v15 = vld [vmem:[%s4220_s1 + $0x318] sm:$0xff] }
 0x101   : > { %v1521_v26 = vadd.f32 %v1520_v9, %v1408_v6  ;;  %1680 = vmatmul.f32.gmra.mxu0 %v3617_v54  ;;  %v1298_v23 = vadd.f32 %v1297_v58, %v3413_v50  ;;  %v3648_v9 = vsel %vm1011_vm4, %v1062_v29, %v1063_v49  ;;  %v1065_v29 = vrot.slane %v828_v18, 2  ;;  %1848 = vmatpush.msra.mxu2 %v335_v15 }
 0x103   : > { %v3629_v30 = vadd.f32 %v1633_v56, %v1521_v26  ;;  %1344 = vmatmul.f32.gmra.mxu1 %v3591_v14  ;;  %1457 = vmatmul.f32.gmra.mxu2 %v3625_v13  ;;  %v3641_v56 = vsel %vm898_vm2, %v950_v39, %v952_v52  ;;  %v955_v39 = vrot.slane %v3105_v8, 1  ;;  %v3675_v15 = vsel %vm1011_vm4, %v1063_v49, %v1065_v29  ;;  %v367_v29 = vld [vmem:[%s4220_s1 + $0x418] sm:$0xff] }
 0x104   : > { %2074 = vmatpush.msra.mxu0 %v367_v29 }
 0x105   : > { %4360 = vst [vmem:[#allocation66_spill] sm:$0xff] %v3629_v30  ;;  %1570 = vmatmul.f32.gmra.mxu3 %v3007_v2  ;;  %v954_v2 = vrot.slane %v829_v62, 1 }
 0x106   : > { %v1410_v6 = vpop.f32.mrf.mxu2  ;;  %v1636_v26 = vpop.f32.mrf.mxu0 }
 0x107   : > { %v1411_v51 = vadd.f32 %v1410_v6, %v1298_v23  ;;  %v587_v23 = vmax.f32 %v533_v32, 0.0 }
 0x108   : > { %v1300_v50 = vpop.f32.mrf.mxu1  ;;  %v1523_v58 = vpop.f32.mrf.mxu3 }
 0x109   : > { %v1524_v30 = vadd.f32 %v1523_v58, %v1411_v51  ;;  %1683 = vmatmul.f32.gmra.mxu0 %v3641_v56  ;;  %v1301_v59 = vadd.f32 %v1300_v50, %v3449_v22  ;;  %v3667_v51 = vsel %vm898_vm2, %v954_v2, %v955_v39  ;;  %v831_v18 = vsel %vm741_vm3, 0.0, %v587_v23  ;;  %v319_v22 = vld [vmem:[%s4220_s1 + $0x298] sm:$0xff] }
 0x10a   : > { %1735 = vmatpush.msra.mxu1 %v319_v22  ;;  %v957_v2 = vrot.slane %v831_v18, 1 }
 0x10b   : > { %v3652_v52 = vadd.f32 %v1636_v26, %v1524_v30  ;;  %1347 = vmatmul.f32.gmra.mxu1 %v3617_v54  ;;  %1460 = vmatmul.f32.gmra.mxu2 %v3648_v9  ;;  %v351_v30 = vld [vmem:[%s4220_s1 + $0x398] sm:$0xff] }
 0x10c   : > { %1961 = vmatpush.msra.mxu3 %v351_v30 }
 0x10d   : > { %4361 = vst [vmem:[#allocation67_spill] sm:$0xff] %v3652_v52  ;;  %2466 = vmatmul.msk.f32.gmra.mxu3 %vm2708_vm1, %v3063_v42  ;;  %v422_v52 = vld [vmem:[%s2652_s16 + $0x130] sm:$0x3] }
 0x10e   : > { %v1413_v6 = vpop.f32.mrf.mxu2  ;;  %v1639_v26 = vpop.f32.mrf.mxu0  ;;  %v479_v23 = vmul.f32 %v3403_v44, %v422_v52 }
 0x10f   : > { %v1414_v32 = vadd.f32 %v1413_v6, %v1301_v59  ;;  %v1067_v59 = vrot.slane %v829_v62, 2  ;;  %v1068_v6 = vrot.slane %v3105_v8, 2  ;;  %v832_v62 = vsel %vm682_vm0, 0.0, %v2715_v38 }
 0x110   : > { %v1303_v50 = vpop.f32.mrf.mxu1  ;;  %v1526_v58 = vpop.f32.mrf.mxu3  ;;  %v536_v52 = vadd.f32 %v3424_v10, %v479_v23  ;;  %v334_v23 = vld [vmem:[%s4220_s1 + $0x310] sm:$0xff] }
 0x111   : > { %v1527_v42 = vadd.f32 %v1526_v58, %v1414_v32  ;;  %1686 = vmatmul.f32.gmra.mxu0 %v3667_v51  ;;  %v1304_v49 = vadd.f32 %v1303_v50, %v3478_v20  ;;  %v3698_v58 = vsel %vm1011_vm4, %v1067_v59, %v1068_v6  ;;  %v1070_v59 = vrot.slane %v831_v18, 2  ;;  %1849 = vmatpush.msra.mxu2 %v334_v23 }
 0x113   : > { %v3679_v30 = vadd.f32 %v1639_v26, %v1527_v42  ;;  %1350 = vmatmul.f32.gmra.mxu1 %v3641_v56  ;;  %1463 = vmatmul.f32.gmra.mxu2 %v3675_v15  ;;  %v3691_v26 = vsel %vm898_vm2, %v955_v39, %v957_v2  ;;  %v960_v39 = vrot.slane %v2767_v60, 1  ;;  %v3725_v23 = vsel %vm1011_vm4, %v1068_v6, %v1070_v59  ;;  %v366_v59 = vld [vmem:[%s4220_s1 + $0x410] sm:$0xff] }
 0x114   : > { %2075 = vmatpush.msra.mxu0 %v366_v59 }
 0x115   : > { %4362 = vst [vmem:[#allocation68_spill] sm:$0xff] %v3679_v30  ;;  %1576 = vmatmul.f32.gmra.mxu3 %v3105_v8  ;;  %v959_v8 = vrot.slane %v832_v62, 1 }
 0x116   : > { %v1416_v32 = vpop.f32.mrf.mxu2  ;;  %v1642_v42 = vpop.f32.mrf.mxu0 }
 0x117   : > { %v1417_v22 = vadd.f32 %v1416_v32, %v1304_v49  ;;  %v590_v49 = vmax.f32 %v536_v52, 0.0 }
 0x118   : > { %v1306_v20 = vpop.f32.mrf.mxu1  ;;  %v1529_v50 = vpop.f32.mrf.mxu3 }
 0x119   : > { %v1530_v30 = vadd.f32 %v1529_v50, %v1417_v22  ;;  %1689 = vmatmul.f32.gmra.mxu0 %v3691_v26  ;;  %v1307_v29 = vadd.f32 %v1306_v20, %v3509_v1  ;;  %v3717_v22 = vsel %vm898_vm2, %v959_v8, %v960_v39  ;;  %v834_v18 = vsel %vm741_vm3, 0.0, %v590_v49  ;;  %v318_v1 = vld [vmem:[%s4220_s1 + $0x290] sm:$0xff] }
 0x11a   : > { %1736 = vmatpush.msra.mxu1 %v318_v1  ;;  %v962_v8 = vrot.slane %v834_v18, 1 }
 0x11b   : > { %v3702_v2 = vadd.f32 %v1642_v42, %v1530_v30  ;;  %1353 = vmatmul.f32.gmra.mxu1 %v3667_v51  ;;  %1466 = vmatmul.f32.gmra.mxu2 %v3698_v58  ;;  %v350_v30 = vld [vmem:[%s4220_s1 + $0x390] sm:$0xff] }
 0x11c   : > { %1962 = vmatpush.msra.mxu3 %v350_v30 }
 0x11d   : > { %4363 = vst [vmem:[#allocation69_spill] sm:$0xff] %v3702_v2  ;;  %2468 = vmatmul.msk.f32.gmra.mxu3 %vm2708_vm1, %v2715_v38  ;;  %v425_v2 = vld [vmem:[%s2652_s16 + $0x148] sm:$0x3] }
 0x11e   : > { %v1419_v32 = vpop.f32.mrf.mxu2  ;;  %v1645_v42 = vpop.f32.mrf.mxu0  ;;  %v482_v49 = vmul.f32 %v3403_v44, %v425_v2 }
 0x11f   : > { %v1420_v52 = vadd.f32 %v1419_v32, %v1307_v29  ;;  %v1072_v29 = vrot.slane %v832_v62, 2  ;;  %v1073_v32 = vrot.slane %v2767_v60, 2  ;;  %v835_v62 = vsel %vm682_vm0, 0.0, %v2824_v25 }
 0x120   : > { %v1309_v20 = vpop.f32.mrf.mxu1  ;;  %v1532_v50 = vpop.f32.mrf.mxu3  ;;  %v539_v2 = vadd.f32 %v3424_v10, %v482_v49  ;;  %v333_v49 = vld [vmem:[%s4220_s1 + $0x308] sm:$0xff] }
 0x121   : > { %v1533_v38 = vadd.f32 %v1532_v50, %v1420_v52  ;;  %1692 = vmatmul.f32.gmra.mxu0 %v3717_v22  ;;  %v1310_v6 = vadd.f32 %v1309_v20, %v3538_v45  ;;  %v3748_v50 = vsel %vm1011_vm4, %v1072_v29, %v1073_v32  ;;  %v1075_v29 = vrot.slane %v834_v18, 2  ;;  %1850 = vmatpush.msra.mxu2 %v333_v49 }
 0x123   : > { %v3729_v30 = vadd.f32 %v1645_v42, %v1533_v38  ;;  %1356 = vmatmul.f32.gmra.mxu1 %v3691_v26  ;;  %1469 = vmatmul.f32.gmra.mxu2 %v3725_v23  ;;  %v3741_v42 = vsel %vm898_vm2, %v960_v39, %v962_v8  ;;  %v965_v39 = vrot.slane %v2892_v61, 1  ;;  %v3775_v49 = vsel %vm1011_vm4, %v1073_v32, %v1075_v29  ;;  %v365_v29 = vld [vmem:[%s4220_s1 + $0x408] sm:$0xff] }
 0x124   : > { %2076 = vmatpush.msra.mxu0 %v365_v29 }
 0x125   : > { %4364 = vst [vmem:[#allocation70_spill] sm:$0xff] %v3729_v30  ;;  %1582 = vmatmul.f32.gmra.mxu3 %v2767_v60  ;;  %v964_v60 = vrot.slane %v835_v62, 1 }
 0x126   : > { %v1422_v52 = vpop.f32.mrf.mxu2  ;;  %v1648_v38 = vpop.f32.mrf.mxu0 }
 0x127   : > { %v1423_v1 = vadd.f32 %v1422_v52, %v1310_v6  ;;  %v593_v6 = vmax.f32 %v539_v2, 0.0 }
 0x128   : > { %v1312_v45 = vpop.f32.mrf.mxu1  ;;  %v1535_v20 = vpop.f32.mrf.mxu3 }
 0x129   : > { %v1536_v30 = vadd.f32 %v1535_v20, %v1423_v1  ;;  %1695 = vmatmul.f32.gmra.mxu0 %v3741_v42  ;;  %v1313_v59 = vadd.f32 %v1312_v45, %v3299_v46  ;;  %v3767_v1 = vsel %vm898_vm2, %v964_v60, %v965_v39  ;;  %v837_v18 = vsel %vm741_vm3, 0.0, %v593_v6  ;;  %v317_v46 = vld [vmem:[%s4220_s1 + $0x288] sm:$0xff] }
 0x12a   : > { %1737 = vmatpush.msra.mxu1 %v317_v46  ;;  %v967_v60 = vrot.slane %v837_v18, 1 }
 0x12b   : > { %v3752_v8 = vadd.f32 %v1648_v38, %v1536_v30  ;;  %1359 = vmatmul.f32.gmra.mxu1 %v3717_v22  ;;  %1472 = vmatmul.f32.gmra.mxu2 %v3748_v50  ;;  %v349_v30 = vld [vmem:[%s4220_s1 + $0x388] sm:$0xff] }
 0x12c   : > { %1963 = vmatpush.msra.mxu3 %v349_v30 }
 0x12d   : > { %4365 = vst [vmem:[#allocation71_spill] sm:$0xff] %v3752_v8  ;;  %2470 = vmatmul.msk.f32.gmra.mxu3 %vm2708_vm1, %v2824_v25  ;;  %v428_v8 = vld [vmem:[%s2652_s16 + $0x160] sm:$0x3] }
 0x12e   : > { %v1425_v52 = vpop.f32.mrf.mxu2  ;;  %v1651_v38 = vpop.f32.mrf.mxu0  ;;  %v485_v6 = vmul.f32 %v3403_v44, %v428_v8 }
 0x12f   : > { %v1426_v2 = vadd.f32 %v1425_v52, %v1313_v59  ;;  %v1077_v59 = vrot.slane %v835_v62, 2  ;;  %v1078_v52 = vrot.slane %v2892_v61, 2  ;;  %v838_v62 = vsel %vm682_vm0, 0.0, %v2952_v31 }
 0x130   : > { %v1315_v45 = vpop.f32.mrf.mxu1  ;;  %v1538_v20 = vpop.f32.mrf.mxu3  ;;  %v542_v8 = vadd.f32 %v3424_v10, %v485_v6  ;;  %v332_v6 = vld [vmem:[%s4220_s1 + $0x300] sm:$0xff] }
 0x131   : > { %v1539_v25 = vadd.f32 %v1538_v20, %v1426_v2  ;;  %1698 = vmatmul.f32.gmra.mxu0 %v3767_v1  ;;  %v1316_v32 = vadd.f32 %v1315_v45, %v3329_v40  ;;  %v3798_v20 = vsel %vm1011_vm4, %v1077_v59, %v1078_v52  ;;  %v1080_v59 = vrot.slane %v837_v18, 2  ;;  %1851 = vmatpush.msra.mxu2 %v332_v6 }
 0x133   : > { %v3779_v30 = vadd.f32 %v1651_v38, %v1539_v25  ;;  %1362 = vmatmul.f32.gmra.mxu1 %v3741_v42  ;;  %1475 = vmatmul.f32.gmra.mxu2 %v3775_v49  ;;  %v3791_v38 = vsel %vm898_vm2, %v965_v39, %v967_v60  ;;  %v970_v39 = vrot.slane %v3020_v7, 1  ;;  %v3825_v6 = vsel %vm1011_vm4, %v1078_v52, %v1080_v59  ;;  %v364_v59 = vld [vmem:[%s4220_s1 + $0x400] sm:$0xff] }
 0x134   : > { %4367 = vst [vmem:[#allocation73_spill] sm:$0xff] %v3791_v38  ;;  %2077 = vmatpush.msra.mxu0 %v364_v59 }
 0x135   : > { %4366 = vst [vmem:[#allocation72_spill] sm:$0xff] %v3779_v30  ;;  %1588 = vmatmul.f32.gmra.mxu3 %v2892_v61  ;;  %v969_v61 = vrot.slane %v838_v62, 1 }
 0x136   : > { %v1428_v2 = vpop.f32.mrf.mxu2  ;;  %v1654_v25 = vpop.f32.mrf.mxu0  ;;  %4370 = vst [vmem:[#allocation76_spill] sm:$0xff] %v3825_v6 }
 0x137   : > { %v1429_v46 = vadd.f32 %v1428_v2, %v1316_v32  ;;  %v596_v32 = vmax.f32 %v542_v8, 0.0 }
 0x138   : > { %v1318_v40 = vpop.f32.mrf.mxu1  ;;  %v1541_v45 = vpop.f32.mrf.mxu3 }
 0x139   : > { %v1542_v30 = vadd.f32 %v1541_v45, %v1429_v46  ;;  %1701 = vmatmul.f32.gmra.mxu0 %v3791_v38  ;;  %v1319_v29 = vadd.f32 %v1318_v40, %v3357_v37  ;;  %v3817_v46 = vsel %vm898_vm2, %v969_v61, %v970_v39  ;;  %v840_v18 = vsel %vm741_vm3, 0.0, %v596_v32  ;;  %v316_v37 = vld [vmem:[%s4220_s1 + $0x280] sm:$0xff] }
 0x13a   : > { %4369 = vst [vmem:[#allocation75_spill] sm:$0xff] %v3817_v46  ;;  %1738 = vmatpush.msra.mxu1 %v316_v37  ;;  %v972_v61 = vrot.slane %v840_v18, 1 }
 0x13b   : > { %v3802_v60 = vadd.f32 %v1654_v25, %v1542_v30  ;;  %1365 = vmatmul.f32.gmra.mxu1 %v3767_v1  ;;  %1478 = vmatmul.f32.gmra.mxu2 %v3798_v20  ;;  %v348_v30 = vld [vmem:[%s4220_s1 + $0x380] sm:$0xff] }
 0x13c   : > { %1964 = vmatpush.msra.mxu3 %v348_v30 }
 0x13d   : > { %4368 = vst [vmem:[#allocation74_spill] sm:$0xff] %v3802_v60  ;;  %2472 = vmatmul.msk.f32.gmra.mxu3 %vm2708_vm1, %v2952_v31  ;;  %v431_v60 = vld [vmem:[%s2652_s16 + $0x178] sm:$0x3] }
 0x13e   : > { %v1431_v2 = vpop.f32.mrf.mxu2  ;;  %v1657_v25 = vpop.f32.mrf.mxu0  ;;  %v488_v32 = vmul.f32 %v3403_v44, %v431_v60 }
 0x13f   : > { %v1432_v8 = vadd.f32 %v1431_v2, %v1319_v29  ;;  %v1082_v29 = vrot.slane %v838_v62, 2  ;;  %v1083_v2 = vrot.slane %v3020_v7, 2  ;;  %v841_v62 = vsel %vm682_vm0, 0.0, %v3071_v47 }
 0x140   : > { %v1321_v40 = vpop.f32.mrf.mxu1  ;;  %v1544_v45 = vpop.f32.mrf.mxu3 }
 0x141   : > { %v1545_v31 = vadd.f32 %v1544_v45, %v1432_v8  ;;  %1704 = vmatmul.f32.gmra.mxu0 %v3817_v46  ;;  %v1322_v52 = vadd.f32 %v1321_v40, %v3389_v24  ;;  %v3841_v8 = vsel %vm898_vm2, %v970_v39, %v972_v61  ;;  %v545_v24 = vadd.f32 %v3424_v10, %v488_v32  ;;  %v432_v61 = vld [vmem:[%s2652_s16 + $0x180] sm:$0xff] }
 0x142   : > { %v3848_v45 = vsel %vm1011_vm4, %v1082_v29, %v1083_v2  ;;  %v975_v39 = vrot.slane %v3111_v11, 1 }
 0x143   : > { %v3829_v30 = vadd.f32 %v1657_v25, %v1545_v31  ;;  %1368 = vmatmul.f32.gmra.mxu1 %v3791_v38  ;;  %1481 = vmatmul.f32.gmra.mxu2 %v3825_v6  ;;  %4372 = vst [vmem:[#allocation78_spill] sm:$0xff] %v3848_v45  ;;  %v599_v32 = vmax.f32 %v545_v24, 0.0 }
 0x145   : > { %4371 = vst [vmem:[#allocation77_spill] sm:$0xff] %v3829_v30  ;;  %1594 = vmatmul.f32.gmra.mxu3 %v3020_v7  ;;  %v974_v7 = vrot.slane %v841_v62, 1  ;;  %v843_v24 = vsel %vm741_vm3, 0.0, %v599_v32 }
 0x146   : > { %v1434_v31 = vpop.f32.mrf.mxu2  ;;  %v1660_v25 = vpop.f32.mrf.mxu0 }
 0x147   : > { %v1435_v60 = vadd.f32 %v1434_v31, %v1322_v52  ;;  %v433_v52 = vld [vmem:[%s2652_s16 + $0x188] sm:$0xff]  ;;  %v1085_v31 = vrot.slane %v840_v18, 2 }
 0x148   : > { %v1324_v37 = vpop.f32.mrf.mxu1  ;;  %v1547_v40 = vpop.f32.mrf.mxu3 }
 0x149   : > { %v1548_v30 = vadd.f32 %v1547_v40, %v1435_v60  ;;  %1707 = vmatmul.f32.gmra.mxu0 %v3841_v8  ;;  %v1325_v29 = vadd.f32 %v1324_v37, %v3427_v53  ;;  %v489_v60 = vmul.f32 %v3403_v44, %v432_v61  ;;  %v3870_v53 = vsel %vm1011_vm4, %v1083_v2, %v1085_v31  ;;  %v434_v37 = vld [vmem:[%s2652_s16 + $0x190] sm:$0x3]  ;;  %s2509_s16 = sshll.u32 %s4460_s19, 8 }
 0x14a   : > { %v491_v32 = vmul.f32 %v3403_v44, %v434_v37  ;;  %v1088_v2 = vrot.slane %v3111_v11, 2  ;;  %s4074_s10 = scalar_lea.vmem %s4223_s4, %s2509_s16 }
 0x14b   : > { %v3853_v59 = vadd.f32 %v1660_v25, %v1548_v30  ;;  %1371 = vmatmul.f32.gmra.mxu1 %v3817_v46  ;;  %1484 = vmatmul.f32.gmra.mxu2 %v3848_v45  ;;  %v3864_v30 = vsel %vm898_vm2, %v974_v7, %v975_v39  ;;  %v490_v25 = vmul.f32 %v3403_v44, %v433_v52  ;;  %v977_v46 = vrot.slane %v843_v24, 1 }
 0x14c   : > { %v546_v61 = vadd.f32 %v3424_v10, %v489_v60  ;;  %v1087_v52 = vrot.slane %v841_v62, 2  ;;  %v548_v62 = vadd.f32 %v3424_v10, %v491_v32 }
 0x14d   : > { %4373 = vst [vmem:[#allocation79_spill] sm:$0xff] %v3853_v59  ;;  %2474 = vmatmul.msk.f32.gmra.mxu3 %vm2708_vm1, %v3071_v47  ;;  %v547_v7 = vadd.f32 %v3424_v10, %v490_v25  ;;  %v1090_v10 = vrot.slane %v843_v24, 2 }
 0x14e   : > { %v1437_v40 = vpop.f32.mrf.mxu2  ;;  %v1663_v6 = vpop.f32.mrf.mxu0  ;;  %v3898_v25 = vsel %vm1011_vm4, %v1087_v52, %v1088_v2  ;;  %v602_v21 = vmax.f32 %v548_v62, 0.0 }
 0x14f   : > { %v1438_v59 = vadd.f32 %v1437_v40, %v1325_v29  ;;  %v3919_v24 = vsel %vm1011_vm4, %v1088_v2, %v1090_v10 }
 0x150   : > { %v1327_v18 = vpop.f32.mrf.mxu1  ;;  %v1550_v45 = vpop.f32.mrf.mxu3 }
 0x151   : > { %v1551_v47 = vadd.f32 %v1550_v45, %v1438_v59  ;;  %1710 = vmatmul.f32.gmra.mxu0 %v3864_v30  ;;  %v1328_v45 = vadd.f32 %v1327_v18, %v3459_v41  ;;  %v3884_v59 = vmax.f32 %v546_v61, 0.0 }
 0x153   : > { %v3876_v38 = vadd.f32 %v1663_v6, %v1551_v47  ;;  %1374 = vmatmul.f32.gmra.mxu1 %v3841_v8  ;;  %1487 = vmatmul.f32.gmra.mxu2 %v3870_v53  ;;  %v3887_v47 = vsel %vm898_vm2, %v975_v39, %v977_v46  ;;  %v3889_v6 = vmax.f32 %v547_v7, 0.0  ;;  %v3894_v44 = vsel %vm682_vm0, 0.0, %v3884_v59 }
 0x154   : > { %v1127_v46 = vrot.slane %v3894_v44, 1 }
 0x155   : > { %1600 = vmatmul.f32.gmra.mxu3 %v3111_v11  ;;  %v1128_v39 = vrot.slane %v3889_v6, 1 }
 0x156   : > { %v1440_v31 = vpop.f32.mrf.mxu2  ;;  %v1666_v29 = vpop.f32.mrf.mxu0 }
 0x157   : > { %v1441_v60 = vadd.f32 %v1440_v31, %v1328_v45  ;;  %v3912_v52 = vsel %vm898_vm2, %v1127_v46, %v1128_v39  ;;  %v3916_v31 = vsel %vm741_vm3, 0.0, %v602_v21 }
 0x158   : > { %v1330_v41 = vpop.f32.mrf.mxu1  ;;  %v1553_v40 = vpop.f32.mrf.mxu3  ;;  %v1130_v62 = vrot.slane %v3916_v31, 1  ;;  %v1137_v36 = vrot.slane %v3916_v31, 2 }
 0x159   : > { %v1554_v18 = vadd.f32 %v1553_v40, %v1441_v60  ;;  %1713 = vmatmul.f32.gmra.mxu0 %v3887_v47  ;;  %v1331_v61 = vadd.f32 %v1330_v41, %v3487_v3 }
 0x15a   : > { %v3930_v2 = vsel %vm898_vm2, %v1128_v39, %v1130_v62 }
 0x15b   : > { %v3903_v37 = vadd.f32 %v1666_v29, %v1554_v18  ;;  %1377 = vmatmul.f32.gmra.mxu1 %v3864_v30  ;;  %1490 = vmatmul.f32.gmra.mxu2 %v3898_v25 }
 0x15d   : > { %2476 = vmatmul.msk.f32.gmra.mxu3 %vm2708_vm1, %v3884_v59 }
 0x15e   : > { %v1443_v7 = vpop.f32.mrf.mxu2  ;;  %v1669_v32 = vpop.f32.mrf.mxu0 }
 0x15f   : > { %v1444_v45 = vadd.f32 %v1443_v7, %v1331_v61 }
 0x160   : > { %v1333_v29 = vpop.f32.mrf.mxu1  ;;  %v1556_v60 = vpop.f32.mrf.mxu3 }
 0x161   : > { %v1557_v3 = vadd.f32 %v1556_v60, %v1444_v45  ;;  %1716 = vmatmul.f32.gmra.mxu0 %v3912_v52  ;;  %v1334_v28 = vadd.f32 %v1333_v29, %v3519_v33 }
 0x163   : > { %v3923_v41 = vadd.f32 %v1669_v32, %v1557_v3  ;;  %1380 = vmatmul.f32.gmra.mxu1 %v3887_v47  ;;  %1493 = vmatmul.f32.gmra.mxu2 %v3919_v24 }
 0x165   : > { %1606 = vmatmul.f32.gmra.mxu3 %v3889_v6 }
 0x166   : > { %v1446_v40 = vpop.f32.mrf.mxu2  ;;  %v1672_v18 = vpop.f32.mrf.mxu0 }
 0x167   : > { %v1447_v46 = vadd.f32 %v1446_v40, %v1334_v28 }
 0x168   : > { %v1336_v21 = vpop.f32.mrf.mxu1  ;;  %v1559_v10 = vpop.f32.mrf.mxu3 }
 0x169   : > { %v1560_v61 = vadd.f32 %v1559_v10, %v1447_v46  ;;  %1719 = vmatmul.f32.gmra.mxu0 %v3930_v2  ;;  %v1337_v33 = vadd.f32 %v1336_v21, %v3317_v5 }
 0x16b   : > { %v3933_v7 = vadd.f32 %v1672_v18, %v1560_v61  ;;  %1739 = vmatmul.f32.vlgmr.msra.gmra.mxu1 %v3171_v0  ;;  %2478 = vmatmul.msk.f32.vlgmr.msra.gmra.mxu2 %vm2708_vm1, %v2991_v55 }
 0x16d   : > { %1965 = vmatmul.f32.vlgmr.msra.gmra.mxu3 %v3188_v16 }
 0x16e   : > { %v1449_v39 = vpop.f32.mrf.mxu2  ;;  %v1675_v32 = vpop.f32.mrf.mxu0 }
 0x16f   : > { %v1450_v45 = vadd.f32 %v1449_v39, %v1337_v33 }
 0x170   : > { %v1339_v29 = vpop.f32.mrf.mxu1  ;;  %v1562_v60 = vpop.f32.mrf.mxu3 }
 0x171   : > { %v1563_v3 = vadd.f32 %v1562_v60, %v1450_v45  ;;  %2078 = vmatmul.f32.vlgmr.msra.gmra.mxu0 %v3212_v48  ;;  %v1340_v55 = vadd.f32 %v1339_v29, %v3346_v57  ;;  %v4375_v57 = vld [vmem:[#allocation28_spill] sm:$0xff]  ;;  %v4378_v29 = vld [vmem:[#allocation45_spill] sm:$0xff] }
 0x172   : > { %v4379_v60 = vld [vmem:[#allocation29_spill] sm:$0xff] }
 0x173   : > { %v3942_v62 = vadd.f32 %v1675_v32, %v1563_v3  ;;  %1742 = vmatmul.f32.gmra.mxu1 %v3193_v27  ;;  %1855 = vmatmul.f32.gmra.mxu2 %v3053_v34  ;;  %v4374_v34 = vld [vmem:[#allocation41_spill] sm:$0xff]  ;;  %v4376_v32 = vld [vmem:[#allocation30_spill] sm:$0xff] }
 0x175   : > { %1968 = vmatmul.f32.gmra.mxu3 %v3205_v43 }
 0x176   : > { %v1452_v0 = vpop.f32.mrf.mxu2  ;;  %v1678_v16 = vpop.f32.mrf.mxu0 }
 0x177   : > { %v1453_v5 = vadd.f32 %v1452_v0, %v1340_v55 }
 0x178   : > { %v1342_v28 = vpop.f32.mrf.mxu1  ;;  %v1565_v40 = vpop.f32.mrf.mxu3 }
 0x179   : > { %v1566_v18 = vadd.f32 %v1565_v40, %v1453_v5  ;;  %2081 = vmatmul.f32.gmra.mxu0 %v3236_v4  ;;  %v1343_v27 = vadd.f32 %v1342_v28, %v4374_v34  ;;  %v4380_v40 = vld [vmem:[#allocation32_spill] sm:$0xff]  ;;  %v4381_v34 = vld [vmem:[#allocation2_spill] sm:$0xff] }
 0x17b   : > { %v3949_v46 = vadd.f32 %v1678_v16, %v1566_v18  ;;  %1745 = vmatmul.f32.gmra.mxu1 %v3212_v48  ;;  %2480 = vmatmul.msk.f32.gmra.mxu2 %vm2708_vm1, %v3093_v63  ;;  %v4377_v48 = vld [vmem:[#allocation25_spill] sm:$0xff] }
 0x17d   : > { %1971 = vmatmul.f32.gmra.mxu3 %v4375_v57  ;;  %v4383_v57 = vld [vmem:[#allocation31_spill] sm:$0xff] }
 0x17e   : > { %v1455_v43 = vpop.f32.mrf.mxu2  ;;  %v1681_v21 = vpop.f32.mrf.mxu0 }
 0x17f   : > { %v1456_v10 = vadd.f32 %v1455_v43, %v1343_v27 }
 0x180   : > { %v1345_v61 = vpop.f32.mrf.mxu1  ;;  %v1568_v33 = vpop.f32.mrf.mxu3 }
 0x181   : > { %v1569_v39 = vadd.f32 %v1568_v33, %v1456_v10  ;;  %2084 = vmatmul.f32.gmra.mxu0 %v4376_v32  ;;  %v1346_v63 = vadd.f32 %v1345_v61, %v4378_v29 }
 0x183   : > { %v3958_v45 = vadd.f32 %v1681_v21, %v1569_v39  ;;  %1748 = vmatmul.f32.gmra.mxu1 %v3236_v4  ;;  %1861 = vmatmul.f32.gmra.mxu2 %v4377_v48  ;;  %v4382_v4 = vld [vmem:[#allocation49_spill] sm:$0xff]  ;;  %v4384_v48 = vld [vmem:[#allocation34_spill] sm:$0xff] }
 0x185   : > { %1974 = vmatmul.f32.gmra.mxu3 %v4379_v60 }
 0x186   : > { %v1458_v3 = vpop.f32.mrf.mxu2  ;;  %v1684_v55 = vpop.f32.mrf.mxu0 }
 0x187   : > { %v1459_v0 = vadd.f32 %v1458_v3, %v1346_v63  ;;  %v4386_v63 = vld [vmem:[#allocation53_spill] sm:$0xff] }
 0x188   : > { %v1348_v16 = vpop.f32.mrf.mxu1  ;;  %v1571_v5 = vpop.f32.mrf.mxu3  ;;  %v4387_v3 = vld [vmem:[#allocation33_spill] sm:$0xff] }
 0x189   : > { %v1572_v28 = vadd.f32 %v1571_v5, %v1459_v0  ;;  %2087 = vmatmul.f32.gmra.mxu0 %v4380_v40  ;;  %v1349_v27 = vadd.f32 %v1348_v16, %v4382_v4  ;;  %v4388_v4 = vld [vmem:[#allocation37_spill] sm:$0xff] }
 0x18b   : > { %v3965_v18 = vadd.f32 %v1684_v55, %v1572_v28  ;;  %1751 = vmatmul.f32.gmra.mxu1 %v4376_v32  ;;  %2482 = vmatmul.msk.f32.gmra.mxu2 %vm2708_vm1, %v4381_v34  ;;  %v4385_v32 = vld [vmem:[#allocation5_spill] sm:$0xff] }
 0x18d   : > { %1977 = vmatmul.f32.gmra.mxu3 %v4383_v57  ;;  %v4389_v57 = vld [vmem:[#allocation8_spill] sm:$0xff] }
 0x18e   : > { %v1461_v43 = vpop.f32.mrf.mxu2  ;;  %v1687_v21 = vpop.f32.mrf.mxu0 }
 0x18f   : > { %v1462_v10 = vadd.f32 %v1461_v43, %v1349_v27 }
 0x190   : > { %v1351_v61 = vpop.f32.mrf.mxu1  ;;  %v1574_v33 = vpop.f32.mrf.mxu3 }
 0x191   : > { %v1575_v39 = vadd.f32 %v1574_v33, %v1462_v10  ;;  %2090 = vmatmul.f32.gmra.mxu0 %v4384_v48  ;;  %v1352_v60 = vadd.f32 %v1351_v61, %v4386_v63 }
 0x193   : > { %v3974_v29 = vadd.f32 %v1687_v21, %v1575_v39  ;;  %1754 = vmatmul.f32.gmra.mxu1 %v4380_v40  ;;  %1867 = vmatmul.f32.gmra.mxu2 %v4385_v32  ;;  %v4390_v40 = vld [vmem:[#allocation57_spill] sm:$0xff]  ;;  %v4391_v21 = vld [vmem:[#allocation35_spill] sm:$0xff] }
 0x195   : > { %1980 = vmatmul.f32.gmra.mxu3 %v4387_v3 }
 0x196   : > { %v1464_v55 = vpop.f32.mrf.mxu2  ;;  %v1690_v0 = vpop.f32.mrf.mxu0 }
 0x197   : > { %v1465_v16 = vadd.f32 %v1464_v55, %v1352_v60  ;;  %v4392_v60 = vld [vmem:[#allocation40_spill] sm:$0xff]  ;;  %v4394_v55 = vld [vmem:[#allocation61_spill] sm:$0xff] }
 0x198   : > { %v1354_v5 = vpop.f32.mrf.mxu1  ;;  %v1577_v28 = vpop.f32.mrf.mxu3 }
 0x199   : > { %v1578_v34 = vadd.f32 %v1577_v28, %v1465_v16  ;;  %2093 = vmatmul.f32.gmra.mxu0 %v4388_v4  ;;  %v1355_v43 = vadd.f32 %v1354_v5, %v4390_v40  ;;  %v4395_v16 = vld [vmem:[#allocation38_spill] sm:$0xff] }
 0x19b   : > { %v3981_v27 = vadd.f32 %v1690_v0, %v1578_v34  ;;  %1757 = vmatmul.f32.gmra.mxu1 %v4384_v48  ;;  %2484 = vmatmul.msk.f32.gmra.mxu2 %vm2708_vm1, %v4389_v57  ;;  %v4393_v48 = vld [vmem:[#allocation11_spill] sm:$0xff] }
 0x19d   : > { %1983 = vmatmul.f32.gmra.mxu3 %v4391_v21  ;;  %v4396_v21 = vld [vmem:[#allocation44_spill] sm:$0xff] }
 0x19e   : > { %v1467_v10 = vpop.f32.mrf.mxu2  ;;  %v1693_v61 = vpop.f32.mrf.mxu0 }
 0x19f   : > { %v1468_v33 = vadd.f32 %v1467_v10, %v1355_v43 }
 0x1a0   : > { %v1357_v39 = vpop.f32.mrf.mxu1  ;;  %v1580_v32 = vpop.f32.mrf.mxu3 }
 0x1a1   : > { %v1581_v63 = vadd.f32 %v1580_v32, %v1468_v33  ;;  %2096 = vmatmul.f32.gmra.mxu0 %v4392_v60  ;;  %v1358_v0 = vadd.f32 %v1357_v39, %v4394_v55  ;;  %v4400_v39 = vld [vmem:[#allocation42_spill] sm:$0xff] }
 0x1a3   : > { %v3990_v3 = vadd.f32 %v1693_v61, %v1581_v63  ;;  %1760 = vmatmul.f32.gmra.mxu1 %v4388_v4  ;;  %1873 = vmatmul.f32.gmra.mxu2 %v4393_v48  ;;  %v4398_v61 = vld [vmem:[#allocation14_spill] sm:$0xff]  ;;  %v4399_v4 = vld [vmem:[#allocation36_spill] sm:$0xff] }
 0x1a5   : > { %1986 = vmatmul.f32.gmra.mxu3 %v4395_v16 }
 0x1a6   : > { %v1470_v5 = vpop.f32.mrf.mxu2  ;;  %v1696_v28 = vpop.f32.mrf.mxu0 }
 0x1a7   : > { %v1471_v34 = vadd.f32 %v1470_v5, %v1358_v0  ;;  %v4401_v5 = vld [vmem:[#allocation48_spill] sm:$0xff] }
 0x1a8   : > { %v1360_v57 = vpop.f32.mrf.mxu1  ;;  %v1583_v40 = vpop.f32.mrf.mxu3 }
 0x1a9   : > { %v1584_v43 = vadd.f32 %v1583_v40, %v1471_v34  ;;  %2099 = vmatmul.f32.gmra.mxu0 %v4396_v21  ;;  %v1361_v33 = vadd.f32 %v1360_v57, %v4399_v4  ;;  %v4404_v34 = vld [vmem:[#allocation39_spill] sm:$0xff] }
 0x1ab   : > { %v3997_v10 = vadd.f32 %v1696_v28, %v1584_v43  ;;  %1763 = vmatmul.f32.gmra.mxu1 %v4392_v60  ;;  %2486 = vmatmul.msk.f32.gmra.mxu2 %vm2708_vm1, %v4398_v61  ;;  %v4403_v60 = vld [vmem:[#allocation17_spill] sm:$0xff]  ;;  %v4405_v43 = vld [vmem:[#allocation46_spill] sm:$0xff] }
 0x1ad   : > { %4397 = vst [vmem:[#allocation41_spill] sm:$0xff] %v3997_v10  ;;  %1989 = vmatmul.f32.gmra.mxu3 %v4400_v39  ;;  %v4406_v10 = vld [vmem:[#allocation52_spill] sm:$0xff] }
 0x1ae   : > { %v1473_v32 = vpop.f32.mrf.mxu2  ;;  %v1699_v63 = vpop.f32.mrf.mxu0 }
 0x1af   : > { %v1474_v48 = vadd.f32 %v1473_v32, %v1361_v33 }
 0x1b0   : > { %v1363_v55 = vpop.f32.mrf.mxu1  ;;  %v1586_v0 = vpop.f32.mrf.mxu3 }
 0x1b1   : > { %v1587_v16 = vadd.f32 %v1586_v0, %v1474_v48  ;;  %2102 = vmatmul.f32.gmra.mxu0 %v4401_v5  ;;  %v1364_v40 = vadd.f32 %v1363_v55, %v4404_v34  ;;  %v4410_v0 = vld [vmem:[#allocation50_spill] sm:$0xff] }
 0x1b3   : > { %v4006_v28 = vadd.f32 %v1699_v63, %v1587_v16  ;;  %1766 = vmatmul.f32.gmra.mxu1 %v4396_v21  ;;  %1879 = vmatmul.f32.gmra.mxu2 %v4403_v60  ;;  %v4408_v63 = vld [vmem:[#allocation20_spill] sm:$0xff]  ;;  %v4409_v21 = vld [vmem:[#allocation43_spill] sm:$0xff] }
 0x1b5   : > { %4402 = vst [vmem:[#allocation28_spill] sm:$0xff] %v4006_v28  ;;  %1992 = vmatmul.f32.gmra.mxu3 %v4405_v43  ;;  %v4415_v28 = vld [vmem:[#allocation60_spill] sm:$0xff] }
 0x1b6   : > { %v1476_v57 = vpop.f32.mrf.mxu2  ;;  %v1702_v61 = vpop.f32.mrf.mxu0 }
 0x1b7   : > { %v1477_v4 = vadd.f32 %v1476_v57, %v1364_v40 }
 0x1b8   : > { %v1366_v39 = vpop.f32.mrf.mxu1  ;;  %v1589_v33 = vpop.f32.mrf.mxu3 }
 0x1b9   : > { %v1590_v32 = vadd.f32 %v1589_v33, %v1477_v4  ;;  %2105 = vmatmul.f32.gmra.mxu0 %v4406_v10  ;;  %v1367_v55 = vadd.f32 %v1366_v39, %v4409_v21  ;;  %v4411_v4 = vld [vmem:[#allocation56_spill] sm:$0xff]  ;;  %v4413_v33 = vld [vmem:[#allocation47_spill] sm:$0xff] }
 0x1bb   : > { %v4013_v48 = vadd.f32 %v1702_v61, %v1590_v32  ;;  %1769 = vmatmul.f32.gmra.mxu1 %v4401_v5  ;;  %2488 = vmatmul.msk.f32.gmra.mxu2 %vm2708_vm1, %v4408_v63  ;;  %v4412_v5 = vld [vmem:[#allocation23_spill] sm:$0xff]  ;;  %v4414_v63 = vld [vmem:[#allocation54_spill] sm:$0xff] }
 0x1bd   : > { %4407 = vst [vmem:[#allocation30_spill] sm:$0xff] %v4013_v48  ;;  %1995 = vmatmul.f32.gmra.mxu3 %v4410_v0 }
 0x1be   : > { %v1479_v16 = vpop.f32.mrf.mxu2  ;;  %v1705_v60 = vpop.f32.mrf.mxu0 }
 0x1bf   : > { %v1480_v34 = vadd.f32 %v1479_v16, %v1367_v55 }
 0x1c0   : > { %v1369_v40 = vpop.f32.mrf.mxu1  ;;  %v1592_v43 = vpop.f32.mrf.mxu3 }
 0x1c1   : > { %v1593_v57 = vadd.f32 %v1592_v43, %v1480_v34  ;;  %2108 = vmatmul.f32.gmra.mxu0 %v4411_v4  ;;  %v1370_v32 = vadd.f32 %v1369_v40, %v4413_v33  ;;  %v4418_v43 = vld [vmem:[#allocation58_spill] sm:$0xff] }
 0x1c3   : > { %v4022_v61 = vadd.f32 %v1705_v60, %v1593_v57  ;;  %1772 = vmatmul.f32.gmra.mxu1 %v4406_v10  ;;  %1885 = vmatmul.f32.gmra.mxu2 %v4412_v5  ;;  %v4416_v60 = vld [vmem:[#allocation3_spill] sm:$0xff] }
 0x1c4   : > { %v4417_v10 = vld [vmem:[#allocation51_spill] sm:$0xff] }
 0x1c5   : > { %1998 = vmatmul.f32.gmra.mxu3 %v4414_v63 }
 0x1c6   : > { %v1482_v39 = vpop.f32.mrf.mxu2  ;;  %v1708_v21 = vpop.f32.mrf.mxu0 }
 0x1c7   : > { %v1483_v0 = vadd.f32 %v1482_v39, %v1370_v32 }
 0x1c8   : > { %v1372_v48 = vpop.f32.mrf.mxu1  ;;  %v1595_v55 = vpop.f32.mrf.mxu3 }
 0x1c9   : > { %v1596_v16 = vadd.f32 %v1595_v55, %v1483_v0  ;;  %2111 = vmatmul.f32.gmra.mxu0 %v4415_v28  ;;  %v1373_v40 = vadd.f32 %v1372_v48, %v4417_v10  ;;  %v4419_v0 = vld [vmem:[#allocation63_spill] sm:$0xff] }
 0x1ca   : > { %v4421_v55 = vld [vmem:[#allocation55_spill] sm:$0xff] }
 0x1cb   : > { %v4029_v34 = vadd.f32 %v1708_v21, %v1596_v16  ;;  %1775 = vmatmul.f32.gmra.mxu1 %v4411_v4  ;;  %2490 = vmatmul.msk.f32.gmra.mxu2 %vm2708_vm1, %v4416_v60  ;;  %v4420_v4 = vld [vmem:[#allocation6_spill] sm:$0xff] }
 0x1cd   : > { %2001 = vmatmul.f32.gmra.mxu3 %v4418_v43 }
 0x1ce   : > { %v1485_v57 = vpop.f32.mrf.mxu2  ;;  %v1711_v5 = vpop.f32.mrf.mxu0 }
 0x1cf   : > { %v1486_v33 = vadd.f32 %v1485_v57, %v1373_v40 }
 0x1d0   : > { %v1375_v32 = vpop.f32.mrf.mxu1  ;;  %v1598_v63 = vpop.f32.mrf.mxu3 }
 0x1d1   : > { %v1599_v39 = vadd.f32 %v1598_v63, %v1486_v33  ;;  %2114 = vmatmul.f32.gmra.mxu0 %v4419_v0  ;;  %v1376_v16 = vadd.f32 %v1375_v32, %v4421_v55 }
 0x1d3   : > { %v4038_v21 = vadd.f32 %v1711_v5, %v1599_v39  ;;  %1778 = vmatmul.f32.gmra.mxu1 %v4415_v28  ;;  %1891 = vmatmul.f32.gmra.mxu2 %v4420_v4  ;;  %v4422_v5 = vld [vmem:[#allocation9_spill] sm:$0xff]  ;;  %v4423_v28 = vld [vmem:[#allocation59_spill] sm:$0xff] }
 0x1d5   : > { %2004 = vmatmul.f32.gmra.mxu3 %v3541_v12 }
 0x1d6   : > { %v1488_v48 = vpop.f32.mrf.mxu2  ;;  %v1714_v60 = vpop.f32.mrf.mxu0 }
 0x1d7   : > { %v1489_v10 = vadd.f32 %v1488_v48, %v1376_v16 }
 0x1d8   : > { %v1378_v43 = vpop.f32.mrf.mxu1  ;;  %v1601_v40 = vpop.f32.mrf.mxu3 }
 0x1d9   : > { %v1602_v57 = vadd.f32 %v1601_v40, %v1489_v10  ;;  %2117 = vmatmul.f32.gmra.mxu0 %v3575_v19  ;;  %v1379_v32 = vadd.f32 %v1378_v43, %v4423_v28 }
 0x1db   : > { %v4045_v33 = vadd.f32 %v1714_v60, %v1602_v57  ;;  %1781 = vmatmul.f32.gmra.mxu1 %v4419_v0  ;;  %2492 = vmatmul.msk.f32.gmra.mxu2 %vm2708_vm1, %v4422_v5  ;;  %v4424_v0 = vld [vmem:[#allocation12_spill] sm:$0xff]  ;;  %v4425_v60 = vld [vmem:[#allocation62_spill] sm:$0xff] }
 0x1dd   : > { %2007 = vmatmul.f32.gmra.mxu3 %v3567_v35 }
 0x1de   : > { %v1491_v12 = vpop.f32.mrf.mxu2  ;;  %v1717_v63 = vpop.f32.mrf.mxu0 }
 0x1df   : > { %v1492_v39 = vadd.f32 %v1491_v12, %v1379_v32  ;;  %v4427_v12 = vld [vmem:[#allocation64_spill] sm:$0xff] }
 0x1e0   : > { %v1381_v4 = vpop.f32.mrf.mxu1  ;;  %v1604_v55 = vpop.f32.mrf.mxu3 }
 0x1e1   : > { %v1605_v16 = vadd.f32 %v1604_v55, %v1492_v39  ;;  %2120 = vmatmul.f32.gmra.mxu0 %v3598_v17  ;;  %v1382_v10 = vadd.f32 %v1381_v4, %v4425_v60  ;;  %v4428_v60 = vld [vmem:[#allocation18_spill] sm:$0xff] }
 0x1e3   : > { %v4054_v48 = vadd.f32 %v1717_v63, %v1605_v16  ;;  %1784 = vmatmul.f32.gmra.mxu1 %v3575_v19  ;;  %1897 = vmatmul.f32.gmra.mxu2 %v4424_v0  ;;  %v4426_v19 = vld [vmem:[#allocation15_spill] sm:$0xff] }
 0x1e5   : > { %2010 = vmatmul.f32.gmra.mxu3 %v3591_v14 }
 0x1e6   : > { %v1494_v35 = vpop.f32.mrf.mxu2  ;;  %v1720_v43 = vpop.f32.mrf.mxu0 }
 0x1e7   : > { %v1495_v40 = vadd.f32 %v1494_v35, %v1382_v10 }
 0x1e8   : > { %v1607_v57 = vpop.f32.mrf.mxu3  ;;  %v1740_v5 = vpop.f32.mrf.mxu1 }
 0x1e9   : > { %v1608_v28 = vadd.f32 %v1607_v57, %v1495_v40  ;;  %2123 = vmatmul.f32.gmra.mxu0 %v3625_v13  ;;  %v1741_v63 = vadd.f32 %v1740_v5, %v4427_v12 }
 0x1eb   : > { %v4061_v32 = vadd.f32 %v1720_v43, %v1608_v28  ;;  %1787 = vmatmul.f32.gmra.mxu1 %v3598_v17  ;;  %2494 = vmatmul.msk.f32.gmra.mxu2 %vm2708_vm1, %v4426_v19 }
 0x1ed   : > { %2013 = vmatmul.f32.gmra.mxu3 %v3617_v54  ;;  %v4429_v54 = vld [vmem:[#allocation65_spill] sm:$0xff] }
 0x1ee   : > { %v1853_v14 = vpop.f32.mrf.mxu2  ;;  %v2079_v39 = vpop.f32.mrf.mxu0 }
 0x1ef   : > { %v1854_v4 = vadd.f32 %v1853_v14, %v1741_v63  ;;  %v4431_v63 = vld [vmem:[#allocation66_spill] sm:$0xff] }
 0x1f0   : > { %v1743_v55 = vpop.f32.mrf.mxu1  ;;  %v1966_v16 = vpop.f32.mrf.mxu3 }
 0x1f1   : > { %v1967_v0 = vadd.f32 %v1966_v16, %v1854_v4  ;;  %2126 = vmatmul.f32.gmra.mxu0 %v3648_v9  ;;  %v1744_v10 = vadd.f32 %v1743_v55, %v4429_v54 }
 0x1f3   : > { %v2080_v17 = vadd.f32 %v2079_v39, %v1967_v0  ;;  %1790 = vmatmul.f32.gmra.mxu1 %v3625_v13  ;;  %1903 = vmatmul.f32.gmra.mxu2 %v4428_v60  ;;  %v4430_v13 = vld [vmem:[#allocation21_spill] sm:$0xff] }
 0x1f5   : > { %2285 = vst [vmem:[%s4074_s10] sm:$0xff] %v2080_v17  ;;  %2016 = vmatmul.f32.gmra.mxu3 %v3641_v56  ;;  %v2213_v12 = vmul.f32 %v2080_v17, %v2080_v17 }
 0x1f6   : > { %v1856_v35 = vpop.f32.mrf.mxu2  ;;  %v2082_v43 = vpop.f32.mrf.mxu0 }
 0x1f7   : > { %v1857_v40 = vadd.f32 %v1856_v35, %v1744_v10  ;;  %v4432_v35 = vld [vmem:[#allocation24_spill] sm:$0xff] }
 0x1f8   : > { %v1746_v57 = vpop.f32.mrf.mxu1  ;;  %v1969_v5 = vpop.f32.mrf.mxu3 }
 0x1f9   : > { %v1970_v28 = vadd.f32 %v1969_v5, %v1857_v40  ;;  %2129 = vmatmul.f32.gmra.mxu0 %v3675_v15  ;;  %v1747_v14 = vadd.f32 %v1746_v57, %v4431_v63 }
 0x1fb   : > { %v2083_v19 = vadd.f32 %v2082_v43, %v1970_v28  ;;  %1793 = vmatmul.f32.gmra.mxu1 %v3648_v9  ;;  %2496 = vmatmul.msk.f32.gmra.mxu2 %vm2708_vm1, %v4430_v13 }
 0x1fd   : > { %v2175_v39 = vadd.f32 %v2083_v19, %v2080_v17  ;;  %v2214_v56 = vmul.f32 %v2083_v19, %v2083_v19  ;;  %2286 = vst [vmem:[%s4074_s10 + $0x8] sm:$0xff] %v2083_v19  ;;  %2019 = vmatmul.f32.gmra.mxu3 %v3667_v51  ;;  %v4433_v17 = vld [vmem:[#allocation67_spill] sm:$0xff] }
 0x1fe   : > { %v1859_v4 = vpop.f32.mrf.mxu2  ;;  %v2085_v55 = vpop.f32.mrf.mxu0 }
 0x1ff   : > { %v2245_v16 = vadd.f32 %v2214_v56, %v2213_v12  ;;  %v1860_v0 = vadd.f32 %v1859_v4, %v1747_v14  ;;  %v4434_v14 = vld [vmem:[#allocation4_spill] sm:$0xff] }
 0x200   : > { %v1749_v60 = vpop.f32.mrf.mxu1  ;;  %v1972_v54 = vpop.f32.mrf.mxu3 }
 0x201   : > { %v1973_v9 = vadd.f32 %v1972_v54, %v1860_v0  ;;  %2132 = vmatmul.f32.gmra.mxu0 %v3698_v58  ;;  %v1750_v43 = vadd.f32 %v1749_v60, %v4433_v17  ;;  %v4437_v17 = vld [vmem:[#allocation69_spill] sm:$0xff] }
 0x203   : > { %v2086_v10 = vadd.f32 %v2085_v55, %v1973_v9  ;;  %1796 = vmatmul.f32.gmra.mxu1 %v3675_v15  ;;  %1909 = vmatmul.f32.gmra.mxu2 %v4432_v35  ;;  %v4436_v35 = vld [vmem:[#allocation7_spill] sm:$0xff] }
 0x205   : > { %v2176_v40 = vadd.f32 %v2175_v39, %v2086_v10  ;;  %v2215_v57 = vmul.f32 %v2086_v10, %v2086_v10  ;;  %2287 = vst [vmem:[%s4074_s10 + $0x10] sm:$0xff] %v2086_v10  ;;  %2022 = vmatmul.f32.gmra.mxu3 %v3691_v26  ;;  %v4435_v39 = vld [vmem:[#allocation68_spill] sm:$0xff] }
 0x206   : > { %v1862_v51 = vpop.f32.mrf.mxu2  ;;  %v2088_v5 = vpop.f32.mrf.mxu0 }
 0x207   : > { %v2246_v28 = vadd.f32 %v2245_v16, %v2215_v57  ;;  %v1863_v19 = vadd.f32 %v1862_v51, %v1750_v43 }
 0x208   : > { %v1752_v13 = vpop.f32.mrf.mxu1  ;;  %v1975_v12 = vpop.f32.mrf.mxu3 }
 0x209   : > { %v1976_v63 = vadd.f32 %v1975_v12, %v1863_v19  ;;  %2135 = vmatmul.f32.gmra.mxu0 %v3725_v23  ;;  %v1753_v56 = vadd.f32 %v1752_v13, %v4435_v39 }
 0x20b   : > { %v2089_v15 = vadd.f32 %v2088_v5, %v1976_v63  ;;  %1799 = vmatmul.f32.gmra.mxu1 %v3698_v58  ;;  %2498 = vmatmul.msk.f32.gmra.mxu2 %vm2708_vm1, %v4434_v14  ;;  %v4438_v63 = vld [vmem:[#allocation10_spill] sm:$0xff] }
 0x20d   : > { %v2177_v4 = vadd.f32 %v2176_v40, %v2089_v15  ;;  %v2216_v26 = vmul.f32 %v2089_v15, %v2089_v15  ;;  %2288 = vst [vmem:[%s4074_s10 + $0x18] sm:$0xff] %v2089_v15  ;;  %2025 = vmatmul.f32.gmra.mxu3 %v3717_v22  ;;  %v4439_v15 = vld [vmem:[#allocation70_spill] sm:$0xff] }
 0x20e   : > { %v1865_v55 = vpop.f32.mrf.mxu2  ;;  %v2091_v16 = vpop.f32.mrf.mxu0 }
 0x20f   : > { %v2247_v0 = vadd.f32 %v2246_v28, %v2216_v26  ;;  %v1866_v60 = vadd.f32 %v1865_v55, %v1753_v56 }
 0x210   : > { %v1755_v54 = vpop.f32.mrf.mxu1  ;;  %v1978_v9 = vpop.f32.mrf.mxu3 }
 0x211   : > { %v1979_v10 = vadd.f32 %v1978_v9, %v1866_v60  ;;  %2138 = vmatmul.f32.gmra.mxu0 %v3748_v50  ;;  %v1756_v43 = vadd.f32 %v1755_v54, %v4437_v17  ;;  %v4440_v54 = vld [vmem:[#allocation13_spill] sm:$0xff]  ;;  %v4441_v9 = vld [vmem:[#allocation71_spill] sm:$0xff] }
 0x213   : > { %v2092_v58 = vadd.f32 %v2091_v16, %v1979_v10  ;;  %1802 = vmatmul.f32.gmra.mxu1 %v3725_v23  ;;  %1915 = vmatmul.f32.gmra.mxu2 %v4436_v35 }
 0x215   : > { %v2178_v40 = vadd.f32 %v2177_v4, %v2092_v58  ;;  %v2217_v57 = vmul.f32 %v2092_v58, %v2092_v58  ;;  %2289 = vst [vmem:[%s4074_s10 + $0x20] sm:$0xff] %v2092_v58  ;;  %2028 = vmatmul.f32.gmra.mxu3 %v3741_v42 }
 0x216   : > { %v1868_v22 = vpop.f32.mrf.mxu2  ;;  %v2094_v51 = vpop.f32.mrf.mxu0 }
 0x217   : > { %v2248_v5 = vadd.f32 %v2247_v0, %v2217_v57  ;;  %v1869_v28 = vadd.f32 %v1868_v22, %v1756_v43 }
 0x218   : > { %v1758_v19 = vpop.f32.mrf.mxu1  ;;  %v1981_v13 = vpop.f32.mrf.mxu3 }
 0x219   : > { %v1982_v12 = vadd.f32 %v1981_v13, %v1869_v28  ;;  %2141 = vmatmul.f32.gmra.mxu0 %v3775_v49  ;;  %v1759_v14 = vadd.f32 %v1758_v19, %v4439_v15  ;;  %v4443_v28 = vld [vmem:[#allocation76_spill] sm:$0xff]  ;;  %v4446_v15 = vld [vmem:[#allocation75_spill] sm:$0xff] }
 0x21a   : > { %v4444_v19 = vld [vmem:[#allocation16_spill] sm:$0xff] }
 0x21b   : > { %v2095_v23 = vadd.f32 %v2094_v51, %v1982_v12  ;;  %1805 = vmatmul.f32.gmra.mxu1 %v3748_v50  ;;  %2500 = vmatmul.msk.f32.gmra.mxu2 %vm2708_vm1, %v4438_v63  ;;  %v4445_v13 = vld [vmem:[#allocation72_spill] sm:$0xff] }
 0x21d   : > { %v2179_v39 = vadd.f32 %v2178_v40, %v2095_v23  ;;  %v2218_v42 = vmul.f32 %v2095_v23, %v2095_v23  ;;  %2290 = vst [vmem:[%s4074_s10 + $0x28] sm:$0xff] %v2095_v23  ;;  %2031 = vmatmul.f32.gmra.mxu3 %v3767_v1  ;;  %v4442_v1 = vld [vmem:[#allocation73_spill] sm:$0xff] }
 0x21e   : > { %v1871_v56 = vpop.f32.mrf.mxu2  ;;  %v2097_v4 = vpop.f32.mrf.mxu0 }
 0x21f   : > { %v2249_v26 = vadd.f32 %v2248_v5, %v2218_v42  ;;  %v1872_v55 = vadd.f32 %v1871_v56, %v1759_v14 }
 0x220   : > { %v1761_v16 = vpop.f32.mrf.mxu1  ;;  %v1984_v0 = vpop.f32.mrf.mxu3 }
 0x221   : > { %v1985_v60 = vadd.f32 %v1984_v0, %v1872_v55  ;;  %2144 = vmatmul.f32.gmra.mxu0 %v3798_v20  ;;  %v1762_v10 = vadd.f32 %v1761_v16, %v4441_v9  ;;  %v4448_v0 = vld [vmem:[#allocation19_spill] sm:$0xff] }
 0x223   : > { %v2098_v50 = vadd.f32 %v2097_v4, %v1985_v60  ;;  %1808 = vmatmul.f32.gmra.mxu1 %v3775_v49  ;;  %1921 = vmatmul.f32.gmra.mxu2 %v4440_v54  ;;  %v4449_v60 = vld [vmem:[#allocation74_spill] sm:$0xff] }
 0x225   : > { %v2180_v58 = vadd.f32 %v2179_v39, %v2098_v50  ;;  %v2219_v35 = vmul.f32 %v2098_v50, %v2098_v50  ;;  %2291 = vst [vmem:[%s4074_s10 + $0x30] sm:$0xff] %v2098_v50  ;;  %2034 = vmatmul.f32.gmra.mxu3 %v4442_v1 }
 0x226   : > { %v1874_v17 = vpop.f32.mrf.mxu2  ;;  %v2100_v43 = vpop.f32.mrf.mxu0 }
 0x227   : > { %v2250_v40 = vadd.f32 %v2249_v26, %v2219_v35  ;;  %v1875_v57 = vadd.f32 %v1874_v17, %v1762_v10 }
 0x228   : > { %v1764_v22 = vpop.f32.mrf.mxu1  ;;  %v1987_v51 = vpop.f32.mrf.mxu3 }
 0x229   : > { %v1988_v5 = vadd.f32 %v1987_v51, %v1875_v57  ;;  %2147 = vmatmul.f32.gmra.mxu0 %v4443_v28  ;;  %v1765_v12 = vadd.f32 %v1764_v22, %v4445_v13  ;;  %v4450_v22 = vld [vmem:[#allocation22_spill] sm:$0xff]  ;;  %v4451_v51 = vld [vmem:[#allocation77_spill] sm:$0xff] }
 0x22b   : > { %v2101_v49 = vadd.f32 %v2100_v43, %v1988_v5  ;;  %1811 = vmatmul.f32.gmra.mxu1 %v3798_v20  ;;  %2502 = vmatmul.msk.f32.gmra.mxu2 %vm2708_vm1, %v4444_v19  ;;  %v4447_v20 = vld [vmem:[#allocation78_spill] sm:$0xff] }
 0x22d   : > { %v2181_v23 = vadd.f32 %v2180_v58, %v2101_v49  ;;  %v2220_v63 = vmul.f32 %v2101_v49, %v2101_v49  ;;  %2292 = vst [vmem:[%s4074_s10 + $0x38] sm:$0xff] %v2101_v49  ;;  %2037 = vmatmul.f32.gmra.mxu3 %v4446_v15 }
 0x22e   : > { %v1877_v14 = vpop.f32.mrf.mxu2  ;;  %v2103_v39 = vpop.f32.mrf.mxu0 }
 0x22f   : > { %v2251_v42 = vadd.f32 %v2250_v40, %v2220_v63  ;;  %v1878_v56 = vadd.f32 %v1877_v14, %v1765_v12 }
 0x230   : > { %v1767_v4 = vpop.f32.mrf.mxu1  ;;  %v1990_v26 = vpop.f32.mrf.mxu3 }
 0x231   : > { %v1991_v55 = vadd.f32 %v1990_v26, %v1878_v56  ;;  %2150 = vmatmul.f32.gmra.mxu0 %v4447_v20  ;;  %v1768_v50 = vadd.f32 %v1767_v4, %v4449_v60 }
 0x233   : > { %v2104_v16 = vadd.f32 %v2103_v39, %v1991_v55  ;;  %1814 = vmatmul.f32.gmra.mxu1 %v4443_v28  ;;  %1927 = vmatmul.f32.gmra.mxu2 %v4448_v0  ;;  %v4452_v39 = vld [vmem:[#allocation79_spill] sm:$0xff] }
 0x235   : > { %v2182_v54 = vadd.f32 %v2181_v23, %v2104_v16  ;;  %v2221_v9 = vmul.f32 %v2104_v16, %v2104_v16  ;;  %2293 = vst [vmem:[%s4074_s10 + $0x40] sm:$0xff] %v2104_v16  ;;  %2040 = vmatmul.f32.gmra.mxu3 %v3841_v8 }
 0x236   : > { %v1880_v10 = vpop.f32.mrf.mxu2  ;;  %v2106_v58 = vpop.f32.mrf.mxu0 }
 0x237   : > { %v2252_v35 = vadd.f32 %v2251_v42, %v2221_v9  ;;  %v1881_v1 = vadd.f32 %v1880_v10, %v1768_v50 }
 0x238   : > { %v1770_v17 = vpop.f32.mrf.mxu1  ;;  %v1993_v43 = vpop.f32.mrf.mxu3 }
 0x239   : > { %v1994_v40 = vadd.f32 %v1993_v43, %v1881_v1  ;;  %2153 = vmatmul.f32.gmra.mxu0 %v3870_v53  ;;  %v1771_v5 = vadd.f32 %v1770_v17, %v4451_v51 }
 0x23b   : > { %v2107_v57 = vadd.f32 %v2106_v58, %v1994_v40  ;;  %1817 = vmatmul.f32.gmra.mxu1 %v4447_v20  ;;  %2504 = vmatmul.msk.f32.gmra.mxu2 %vm2708_vm1, %v4450_v22 }
 0x23d   : > { %v2183_v28 = vadd.f32 %v2182_v54, %v2107_v57  ;;  %v2222_v8 = vmul.f32 %v2107_v57, %v2107_v57  ;;  %2294 = vst [vmem:[%s4074_s10 + $0x48] sm:$0xff] %v2107_v57  ;;  %2043 = vmatmul.f32.gmra.mxu3 %v3864_v30 }
 0x23e   : > { %v1883_v49 = vpop.f32.mrf.mxu2  ;;  %v2109_v19 = vpop.f32.mrf.mxu0 }
 0x23f   : > { %v2253_v13 = vadd.f32 %v2252_v35, %v2222_v8  ;;  %v1884_v12 = vadd.f32 %v1883_v49, %v1771_v5 }
 0x240   : > { %v1773_v23 = vpop.f32.mrf.mxu1  ;;  %v1996_v63 = vpop.f32.mrf.mxu3 }
 0x241   : > { %v1997_v15 = vadd.f32 %v1996_v63, %v1884_v12  ;;  %2156 = vmatmul.f32.gmra.mxu0 %v3898_v25  ;;  %v1774_v42 = vadd.f32 %v1773_v23, %v4452_v39 }
 0x243   : > { %v2110_v14 = vadd.f32 %v2109_v19, %v1997_v15  ;;  %1820 = vmatmul.f32.gmra.mxu1 %v3870_v53  ;;  %1933 = vmatmul.f32.gmra.mxu2 %v3111_v11  ;;  %v1134_v53 = vrot.slane %v3894_v44, 2  ;;  %v1135_v11 = vrot.slane %v3889_v6, 2 }
 0x245   : > { %v2184_v56 = vadd.f32 %v2183_v28, %v2110_v14  ;;  %v2223_v4 = vmul.f32 %v2110_v14, %v2110_v14  ;;  %2295 = vst [vmem:[%s4074_s10 + $0x50] sm:$0xff] %v2110_v14  ;;  %2046 = vmatmul.f32.gmra.mxu3 %v3887_v47  ;;  %v1136_v44 = vsel %vm1011_vm4, %v1134_v53, %v1135_v11 }
 0x246   : > { %v1886_v30 = vpop.f32.mrf.mxu2  ;;  %v2112_v26 = vpop.f32.mrf.mxu0  ;;  %v1138_v51 = vsel %vm1011_vm4, %v1135_v11, %v1137_v36 }
 0x247   : > { %v2254_v55 = vadd.f32 %v2253_v13, %v2223_v4  ;;  %v1887_v20 = vadd.f32 %v1886_v30, %v1774_v42 }
 0x248   : > { %v1776_v16 = vpop.f32.mrf.mxu1  ;;  %v1999_v0 = vpop.f32.mrf.mxu3 }
 0x249   : > { %v2000_v60 = vadd.f32 %v1999_v0, %v1887_v20  ;;  %2159 = vmatmul.f32.gmra.mxu0 %v3919_v24  ;;  %v1777_v47 = vadd.f32 %v1776_v16, %v3876_v38 }
 0x24b   : > { %v2113_v50 = vadd.f32 %v2112_v26, %v2000_v60  ;;  %1823 = vmatmul.f32.gmra.mxu1 %v3898_v25  ;;  %2506 = vmatmul.msk.f32.gmra.mxu2 %vm2708_vm1, %v3884_v59 }
 0x24d   : > { %v2185_v54 = vadd.f32 %v2184_v56, %v2113_v50  ;;  %v2224_v9 = vmul.f32 %v2113_v50, %v2113_v50  ;;  %2296 = vst [vmem:[%s4074_s10 + $0x58] sm:$0xff] %v2113_v50  ;;  %2049 = vmatmul.f32.gmra.mxu3 %v3912_v52  ;;  %v4455_v56 = vld [vmem:[#allocation27_spill] sm:$0xff] }
 0x24e   : > { %v1889_v10 = vpop.f32.mrf.mxu2  ;;  %v2115_v58 = vpop.f32.mrf.mxu0 }
 0x24f   : > { %v2255_v35 = vadd.f32 %v2254_v55, %v2224_v9  ;;  %v1890_v1 = vadd.f32 %v1889_v10, %v1777_v47 }
 0x250   : > { %v1779_v17 = vpop.f32.mrf.mxu1  ;;  %v2002_v25 = vpop.f32.mrf.mxu3 }
 0x251   : > { %v2003_v43 = vadd.f32 %v2002_v25, %v1890_v1  ;;  %2162 = vmatmul.f32.gmra.mxu0 %v1136_v44  ;;  %v1780_v38 = vadd.f32 %v1779_v17, %v3903_v37 }
 0x253   : > { %v2116_v59 = vadd.f32 %v2115_v58, %v2003_v43  ;;  %1826 = vmatmul.f32.gmra.mxu1 %v3919_v24  ;;  %1939 = vmatmul.f32.gmra.mxu2 %v3889_v6  ;;  %v4453_v6 = vmov 0.0  }
 0x255   : > { %v2186_v52 = vadd.f32 %v2185_v54, %v2116_v59  ;;  %v2225_v40 = vmul.f32 %v2116_v59, %v2116_v59  ;;  %2297 = vst [vmem:[%s4074_s10 + $0x60] sm:$0xff] %v2116_v59  ;;  %2052 = vmatmul.f32.gmra.mxu3 %v3930_v2  ;;  %v4454_v2 = vld [vmem:[#allocation26_spill] sm:$0xff] }
 0x256   : > { %v1892_v57 = vpop.f32.mrf.mxu2  ;;  %v2118_v22 = vpop.f32.mrf.mxu0 }
 0x257   : > { %v2256_v5 = vadd.f32 %v2255_v35, %v2225_v40  ;;  %v1893_v28 = vadd.f32 %v1892_v57, %v1780_v38 }
 0x258   : > { %v1782_v31 = vpop.f32.mrf.mxu1  ;;  %v2005_v8 = vpop.f32.mrf.mxu3 }
 0x259   : > { %v2006_v49 = vadd.f32 %v2005_v8, %v1893_v28  ;;  %2165 = vmatmul.f32.gmra.mxu0 %v1138_v51  ;;  %v1783_v37 = vadd.f32 %v1782_v31, %v3923_v41 }
 0x25b   : > { %v2119_v24 = vadd.f32 %v2118_v22, %v2006_v49  ;;  %1829 = vmatmul.f32.gmra.mxu1 %v1136_v44  ;;  %1942 = vmatmul.f32.gmra.mxu2 %v4453_v6 }
 0x25d   : > { %v2187_v19 = vadd.f32 %v2186_v52, %v2119_v24  ;;  %v2226_v13 = vmul.f32 %v2119_v24, %v2119_v24  ;;  %2298 = vst [vmem:[%s4074_s10 + $0x68] sm:$0xff] %v2119_v24  ;;  %2055 = vmatmul.f32.gmra.mxu3 %v4454_v2 }
 0x25e   : > { %v1895_v12 = vpop.f32.mrf.mxu2  ;;  %v2121_v23 = vpop.f32.mrf.mxu0 }
 0x25f   : > { %v2257_v63 = vadd.f32 %v2256_v5, %v2226_v13  ;;  %v1896_v15 = vadd.f32 %v1895_v12, %v1783_v37 }
 0x260   : > { %v1785_v14 = vpop.f32.mrf.mxu1  ;;  %v2008_v39 = vpop.f32.mrf.mxu3 }
 0x261   : > { %v2009_v42 = vadd.f32 %v2008_v39, %v1896_v15  ;;  %2168 = vmatmul.f32.gmra.mxu0 %v4455_v56  ;;  %v1786_v41 = vadd.f32 %v1785_v14, %v3933_v7 }
 0x263   : > { %v2122_v4 = vadd.f32 %v2121_v23, %v2009_v42  ;;  %1832 = vmatmul.f32.gmra.mxu1 %v1138_v51  ;;  %1945 = vmatmul.f32.gmra.mxu2 %v4453_v6 }
 0x265   : > { %v2188_v30 = vadd.f32 %v2187_v19, %v2122_v4  ;;  %v2227_v26 = vmul.f32 %v2122_v4, %v2122_v4  ;;  %2299 = vst [vmem:[%s4074_s10 + $0x70] sm:$0xff] %v2122_v4  ;;  %2058 = vmatmul.f32.gmra.mxu3 %v4454_v2 }
 0x266   : > { %v1898_v55 = vpop.f32.mrf.mxu2  ;;  %v2124_v20 = vpop.f32.mrf.mxu0 }
 0x267   : > { %v2258_v16 = vadd.f32 %v2257_v63, %v2227_v26  ;;  %v1899_v0 = vadd.f32 %v1898_v55, %v1786_v41 }
 0x268   : > { %v1788_v60 = vpop.f32.mrf.mxu1  ;;  %v2011_v53 = vpop.f32.mrf.mxu3 }
 0x269   : > { %v2012_v11 = vadd.f32 %v2011_v53, %v1899_v0  ;;  %2171 = vmatmul.f32.gmra.mxu0 %v4455_v56  ;;  %v1789_v47 = vadd.f32 %v1788_v60, %v3942_v62 }
 0x26b   : > { %v2125_v50 = vadd.f32 %v2124_v20, %v2012_v11 }
 0x26d   : > { %v2189_v7 = vadd.f32 %v2188_v30, %v2125_v50  ;;  %v2228_v54 = vmul.f32 %v2125_v50, %v2125_v50  ;;  %2300 = vst [vmem:[%s4074_s10 + $0x78] sm:$0xff] %v2125_v50 }
 0x26e   : > { %v1901_v9 = vpop.f32.mrf.mxu2  ;;  %v2127_v10 = vpop.f32.mrf.mxu0 }
 0x26f   : > { %v2259_v58 = vadd.f32 %v2258_v16, %v2228_v54  ;;  %v1902_v44 = vadd.f32 %v1901_v9, %v1789_v47 }
 0x270   : > { %v1791_v35 = vpop.f32.mrf.mxu1  ;;  %v2014_v1 = vpop.f32.mrf.mxu3 }
 0x271   : > { %v2015_v17 = vadd.f32 %v2014_v1, %v1902_v44  ;;  %v1792_v43 = vadd.f32 %v1791_v35, %v3949_v46 }
 0x273   : > { %v2128_v25 = vadd.f32 %v2127_v10, %v2015_v17 }
 0x275   : > { %v2190_v36 = vadd.f32 %v2189_v7, %v2128_v25  ;;  %v2229_v59 = vmul.f32 %v2128_v25, %v2128_v25  ;;  %2301 = vst [vmem:[%s4074_s10 + $0x80] sm:$0xff] %v2128_v25 }
 0x276   : > { %v1904_v38 = vpop.f32.mrf.mxu2  ;;  %v2130_v52 = vpop.f32.mrf.mxu0 }
 0x277   : > { %v2260_v62 = vadd.f32 %v2259_v58, %v2229_v59  ;;  %v1905_v40 = vadd.f32 %v1904_v38, %v1792_v43 }
 0x278   : > { %v1794_v57 = vpop.f32.mrf.mxu1  ;;  %v2017_v22 = vpop.f32.mrf.mxu3 }
 0x279   : > { %v2018_v51 = vadd.f32 %v2017_v22, %v1905_v40  ;;  %v1795_v28 = vadd.f32 %v1794_v57, %v3958_v45 }
 0x27b   : > { %v2131_v5 = vadd.f32 %v2130_v52, %v2018_v51  ;;  %v4456_v51 = vld [vmem:[#allocation41_spill] sm:$0xff] }
 0x27d   : > { %v2191_v31 = vadd.f32 %v2190_v36, %v2131_v5  ;;  %v2230_v8 = vmul.f32 %v2131_v5, %v2131_v5  ;;  %2302 = vst [vmem:[%s4074_s10 + $0x88] sm:$0xff] %v2131_v5 }
 0x27e   : > { %v1907_v49 = vpop.f32.mrf.mxu2  ;;  %v2133_v24 = vpop.f32.mrf.mxu0 }
 0x27f   : > { %v2261_v46 = vadd.f32 %v2260_v62, %v2230_v8  ;;  %v1908_v6 = vadd.f32 %v1907_v49, %v1795_v28 }
 0x280   : > { %v1797_v37 = vpop.f32.mrf.mxu1  ;;  %v2020_v19 = vpop.f32.mrf.mxu3 }
 0x281   : > { %v2021_v13 = vadd.f32 %v2020_v19, %v1908_v6  ;;  %v1798_v12 = vadd.f32 %v1797_v37, %v3965_v18 }
 0x283   : > { %v2134_v2 = vadd.f32 %v2133_v24, %v2021_v13  ;;  %v4457_v13 = vld [vmem:[#allocation28_spill] sm:$0xff] }
 0x285   : > { %v2192_v23 = vadd.f32 %v2191_v31, %v2134_v2  ;;  %v2231_v63 = vmul.f32 %v2134_v2, %v2134_v2  ;;  %2303 = vst [vmem:[%s4074_s10 + $0x90] sm:$0xff] %v2134_v2 }
 0x286   : > { %v1910_v15 = vpop.f32.mrf.mxu2  ;;  %v2136_v14 = vpop.f32.mrf.mxu0 }
 0x287   : > { %v2262_v45 = vadd.f32 %v2261_v46, %v2231_v63  ;;  %v1911_v39 = vadd.f32 %v1910_v15, %v1798_v12 }
 0x288   : > { %v1800_v42 = vpop.f32.mrf.mxu1  ;;  %v2023_v56 = vpop.f32.mrf.mxu3 }
 0x289   : > { %v2024_v4 = vadd.f32 %v2023_v56, %v1911_v39  ;;  %v1801_v30 = vadd.f32 %v1800_v42, %v3974_v29 }
 0x28b   : > { %v2137_v41 = vadd.f32 %v2136_v14, %v2024_v4 }
 0x28d   : > { %v2193_v26 = vadd.f32 %v2192_v23, %v2137_v41  ;;  %v2232_v55 = vmul.f32 %v2137_v41, %v2137_v41  ;;  %2304 = vst [vmem:[%s4074_s10 + $0x98] sm:$0xff] %v2137_v41  ;;  %v4458_v41 = vld [vmem:[#allocation30_spill] sm:$0xff] }
 0x28e   : > { %v1913_v20 = vpop.f32.mrf.mxu2  ;;  %v2139_v16 = vpop.f32.mrf.mxu0 }
 0x28f   : > { %v2263_v18 = vadd.f32 %v2262_v45, %v2232_v55  ;;  %v1914_v0 = vadd.f32 %v1913_v20, %v1801_v30 }
 0x290   : > { %v1803_v60 = vpop.f32.mrf.mxu1  ;;  %v2026_v53 = vpop.f32.mrf.mxu3 }
 0x291   : > { %v2027_v11 = vadd.f32 %v2026_v53, %v1914_v0  ;;  %v1804_v47 = vadd.f32 %v1803_v60, %v3981_v27 }
 0x293   : > { %v2140_v50 = vadd.f32 %v2139_v16, %v2027_v11 }
 0x295   : > { %v2194_v7 = vadd.f32 %v2193_v26, %v2140_v50  ;;  %v2233_v54 = vmul.f32 %v2140_v50, %v2140_v50  ;;  %2305 = vst [vmem:[%s4074_s10 + $0xa0] sm:$0xff] %v2140_v50 }
 0x296   : > { %v1916_v9 = vpop.f32.mrf.mxu2  ;;  %v2142_v10 = vpop.f32.mrf.mxu0 }
 0x297   : > { %v2264_v29 = vadd.f32 %v2263_v18, %v2233_v54  ;;  %v1917_v58 = vadd.f32 %v1916_v9, %v1804_v47 }
 0x298   : > { %v1806_v44 = vpop.f32.mrf.mxu1  ;;  %v2029_v35 = vpop.f32.mrf.mxu3 }
 0x299   : > { %v2030_v1 = vadd.f32 %v2029_v35, %v1917_v58  ;;  %v1807_v25 = vadd.f32 %v1806_v44, %v3990_v3 }
 0x29b   : > { %v2143_v17 = vadd.f32 %v2142_v10, %v2030_v1 }
 0x29d   : > { %v2195_v43 = vadd.f32 %v2194_v7, %v2143_v17  ;;  %v2234_v36 = vmul.f32 %v2143_v17, %v2143_v17  ;;  %2306 = vst [vmem:[%s4074_s10 + $0xa8] sm:$0xff] %v2143_v17 }
 0x29e   : > { %v1919_v59 = vpop.f32.mrf.mxu2  ;;  %v2145_v38 = vpop.f32.mrf.mxu0 }
 0x29f   : > { %v2265_v27 = vadd.f32 %v2264_v29, %v2234_v36  ;;  %v1920_v52 = vadd.f32 %v1919_v59, %v1807_v25 }
 0x2a0   : > { %v1809_v62 = vpop.f32.mrf.mxu1  ;;  %v2032_v40 = vpop.f32.mrf.mxu3 }
 0x2a1   : > { %v2033_v57 = vadd.f32 %v2032_v40, %v1920_v52  ;;  %v1810_v5 = vadd.f32 %v1809_v62, %v4456_v51 }
 0x2a3   : > { %v2146_v22 = vadd.f32 %v2145_v38, %v2033_v57 }
 0x2a5   : > { %v2196_v28 = vadd.f32 %v2195_v43, %v2146_v22  ;;  %v2235_v31 = vmul.f32 %v2146_v22, %v2146_v22  ;;  %2307 = vst [vmem:[%s4074_s10 + $0xb0] sm:$0xff] %v2146_v22 }
 0x2a6   : > { %v1922_v8 = vpop.f32.mrf.mxu2  ;;  %v2148_v49 = vpop.f32.mrf.mxu0 }
 0x2a7   : > { %v2266_v3 = vadd.f32 %v2265_v27, %v2235_v31  ;;  %v1923_v24 = vadd.f32 %v1922_v8, %v1810_v5 }
 0x2a8   : > { %v1812_v46 = vpop.f32.mrf.mxu1  ;;  %v2035_v6 = vpop.f32.mrf.mxu3 }
 0x2a9   : > { %v2036_v37 = vadd.f32 %v2035_v6, %v1923_v24  ;;  %v1813_v2 = vadd.f32 %v1812_v46, %v4457_v13 }
 0x2ab   : > { %v2149_v19 = vadd.f32 %v2148_v49, %v2036_v37 }
 0x2ad   : > { %v2197_v12 = vadd.f32 %v2196_v28, %v2149_v19  ;;  %v2236_v23 = vmul.f32 %v2149_v19, %v2149_v19  ;;  %2308 = vst [vmem:[%s4074_s10 + $0xb8] sm:$0xff] %v2149_v19 }
 0x2ae   : > { %v1925_v63 = vpop.f32.mrf.mxu2  ;;  %v2151_v15 = vpop.f32.mrf.mxu0 }
 0x2af   : > { %v2267_v14 = vadd.f32 %v2266_v3, %v2236_v23  ;;  %v1926_v45 = vadd.f32 %v1925_v63, %v1813_v2 }
 0x2b0   : > { %v1815_v39 = vpop.f32.mrf.mxu1  ;;  %v2038_v42 = vpop.f32.mrf.mxu3 }
 0x2b1   : > { %v2039_v56 = vadd.f32 %v2038_v42, %v1926_v45  ;;  %v1816_v30 = vadd.f32 %v1815_v39, %v4458_v41 }
 0x2b3   : > { %v2152_v4 = vadd.f32 %v2151_v15, %v2039_v56 }
 0x2b5   : > { %v2198_v26 = vadd.f32 %v2197_v12, %v2152_v4  ;;  %v2237_v55 = vmul.f32 %v2152_v4, %v2152_v4  ;;  %2309 = vst [vmem:[%s4074_s10 + $0xc0] sm:$0xff] %v2152_v4 }
 0x2b6   : > { %v1928_v20 = vpop.f32.mrf.mxu2  ;;  %v2154_v16 = vpop.f32.mrf.mxu0 }
 0x2b7   : > { %v2268_v18 = vadd.f32 %v2267_v14, %v2237_v55  ;;  %v1929_v0 = vadd.f32 %v1928_v20, %v1816_v30 }
 0x2b8   : > { %v1818_v60 = vpop.f32.mrf.mxu1  ;;  %v2041_v53 = vpop.f32.mrf.mxu3 }
 0x2b9   : > { %v2042_v11 = vadd.f32 %v2041_v53, %v1929_v0  ;;  %v1819_v47 = vadd.f32 %v1818_v60, %v4022_v61 }
 0x2bb   : > { %v2155_v50 = vadd.f32 %v2154_v16, %v2042_v11 }
 0x2bd   : > { %v2199_v7 = vadd.f32 %v2198_v26, %v2155_v50  ;;  %v2238_v54 = vmul.f32 %v2155_v50, %v2155_v50  ;;  %2310 = vst [vmem:[%s4074_s10 + $0xc8] sm:$0xff] %v2155_v50 }
 0x2be   : > { %v1931_v9 = vpop.f32.mrf.mxu2  ;;  %v2157_v10 = vpop.f32.mrf.mxu0 }
 0x2bf   : > { %v2269_v29 = vadd.f32 %v2268_v18, %v2238_v54  ;;  %v1932_v58 = vadd.f32 %v1931_v9, %v1819_v47 }
 0x2c0   : > { %v1821_v44 = vpop.f32.mrf.mxu1  ;;  %v2044_v35 = vpop.f32.mrf.mxu3 }
 0x2c1   : > { %v2045_v1 = vadd.f32 %v2044_v35, %v1932_v58  ;;  %v1822_v25 = vadd.f32 %v1821_v44, %v4029_v34 }
 0x2c3   : > { %v2158_v17 = vadd.f32 %v2157_v10, %v2045_v1 }
 0x2c5   : > { %v2200_v43 = vadd.f32 %v2199_v7, %v2158_v17  ;;  %v2239_v36 = vmul.f32 %v2158_v17, %v2158_v17  ;;  %2311 = vst [vmem:[%s4074_s10 + $0xd0] sm:$0xff] %v2158_v17 }
 0x2c6   : > { %v1934_v59 = vpop.f32.mrf.mxu2  ;;  %v2160_v38 = vpop.f32.mrf.mxu0 }
 0x2c7   : > { %v2270_v61 = vadd.f32 %v2269_v29, %v2239_v36  ;;  %v1935_v27 = vadd.f32 %v1934_v59, %v1822_v25 }
 0x2c8   : > { %v1824_v52 = vpop.f32.mrf.mxu1  ;;  %v2047_v62 = vpop.f32.mrf.mxu3 }
 0x2c9   : > { %v2048_v40 = vadd.f32 %v2047_v62, %v1935_v27  ;;  %v1825_v22 = vadd.f32 %v1824_v52, %v4038_v21 }
 0x2cb   : > { %v2161_v57 = vadd.f32 %v2160_v38, %v2048_v40 }
 0x2cd   : > { %v2201_v51 = vadd.f32 %v2200_v43, %v2161_v57  ;;  %v2240_v5 = vmul.f32 %v2161_v57, %v2161_v57  ;;  %2312 = vst [vmem:[%s4074_s10 + $0xd8] sm:$0xff] %v2161_v57 }
 0x2ce   : > { %v1937_v28 = vpop.f32.mrf.mxu2  ;;  %v2163_v31 = vpop.f32.mrf.mxu0 }
 0x2cf   : > { %v2271_v34 = vadd.f32 %v2270_v61, %v2240_v5  ;;  %v1938_v8 = vadd.f32 %v1937_v28, %v1825_v22 }
 0x2d0   : > { %v1827_v49 = vpop.f32.mrf.mxu1  ;;  %v2050_v3 = vpop.f32.mrf.mxu3 }
 0x2d1   : > { %v2051_v24 = vadd.f32 %v2050_v3, %v1938_v8  ;;  %v1828_v6 = vadd.f32 %v1827_v49, %v4045_v33 }
 0x2d3   : > { %v2164_v46 = vadd.f32 %v2163_v31, %v2051_v24 }
 0x2d5   : > { %v2202_v37 = vadd.f32 %v2201_v51, %v2164_v46  ;;  %v2241_v19 = vmul.f32 %v2164_v46, %v2164_v46  ;;  %2313 = vst [vmem:[%s4074_s10 + $0xe0] sm:$0xff] %v2164_v46 }
 0x2d6   : > { %v1940_v13 = vpop.f32.mrf.mxu2  ;;  %v2166_v2 = vpop.f32.mrf.mxu0 }
 0x2d7   : > { %v2272_v21 = vadd.f32 %v2271_v34, %v2241_v19  ;;  %v1941_v12 = vadd.f32 %v1940_v13, %v1828_v6 }
 0x2d8   : > { %v1830_v23 = vpop.f32.mrf.mxu1  ;;  %v2053_v63 = vpop.f32.mrf.mxu3 }
 0x2d9   : > { %v2054_v15 = vadd.f32 %v2053_v63, %v1941_v12  ;;  %v1831_v45 = vadd.f32 %v1830_v23, %v4054_v48 }
 0x2db   : > { %v2167_v14 = vadd.f32 %v2166_v2, %v2054_v15 }
 0x2dd   : > { %v2203_v39 = vadd.f32 %v2202_v37, %v2167_v14  ;;  %v2242_v42 = vmul.f32 %v2167_v14, %v2167_v14  ;;  %2314 = vst [vmem:[%s4074_s10 + $0xe8] sm:$0xff] %v2167_v14 }
 0x2de   : > { %v1943_v56 = vpop.f32.mrf.mxu2  ;;  %v2169_v4 = vpop.f32.mrf.mxu0 }
 0x2df   : > { %v2273_v33 = vadd.f32 %v2272_v21, %v2242_v42  ;;  %v1944_v41 = vadd.f32 %v1943_v56, %v1831_v45 }
 0x2e0   : > { %v2056_v30 = vpop.f32.mrf.mxu3  ;;  %v1833_v55 = vpop.f32.mrf.mxu1 }
 0x2e1   : > { %v2057_v26 = vadd.f32 %v2056_v30, %v1944_v41  ;;  %v1834_v16 = vadd.f32 %v1833_v55, %v4061_v32 }
 0x2e3   : > { %v2170_v20 = vadd.f32 %v2169_v4, %v2057_v26 }
 0x2e5   : > { %v2204_v18 = vadd.f32 %v2203_v39, %v2170_v20  ;;  %v2243_v0 = vmul.f32 %v2170_v20, %v2170_v20  ;;  %2315 = vst [vmem:[%s4074_s10 + $0xf0] sm:$0xff] %v2170_v20 }
 0x2e6   : > { %v1946_v60 = vpop.f32.mrf.mxu2  ;;  %v2172_v50 = vpop.f32.mrf.mxu0 }
 0x2e7   : > { %v2274_v53 = vadd.f32 %v2273_v33, %v2243_v0  ;;  %v1947_v48 = vadd.f32 %v1946_v60, %v1834_v16 }
 0x2e8   : > { %v2059_v11 = vpop.f32.mrf.mxu3 }
 0x2e9   : > { %v2060_v47 = vadd.f32 %v2059_v11, %v1947_v48 }
 0x2eb   : > { %v2173_v7 = vadd.f32 %v2172_v50, %v2060_v47 }
 0x2ed   : > { %v2205_v54 = vadd.f32 %v2204_v18, %v2173_v7  ;;  %v2244_v9 = vmul.f32 %v2173_v7, %v2173_v7  ;;  %2316 = vst [vmem:[%s4074_s10 + $0xf8] sm:$0xff] %v2173_v7 }
 0x2ef   : > { %v2206_v10 = vrot.slane %v2205_v54, 4  ;;  %v2275_v29 = vadd.f32 %v2274_v53, %v2244_v9 }
 0x2f1   : > { %v2207_v58 = vadd.f32 %v2206_v10, %v2205_v54  ;;  %v2276_v44 = vrot.slane %v2275_v29, 4 }
 0x2f3   : > { %v2208_v35 = vrot.slane %v2207_v58, 2  ;;  %v2277_v32 = vadd.f32 %v2276_v44, %v2275_v29 }
 0x2f5   : > { %v2209_v1 = vadd.f32 %v2208_v35, %v2207_v58  ;;  %v2278_v17 = vrot.slane %v2277_v32, 2 }
 0x2f7   : > { %v2210_v25 = vrot.slane %v2209_v1, 1  ;;  %v2279_v43 = vadd.f32 %v2278_v17, %v2277_v32 }
 0x2f9   : > { %v2280_v36 = vrot.slane %v2279_v43, 1  ;;  %v2211_v59 = vadd.f32 %v2210_v25, %v2209_v1 }
 0x2fb   : > { %v2281_v38 = vadd.f32 %v2280_v36, %v2279_v43 }
 0x2fd   : > { %v2318_v61 = vsel %vm2317_vm5, %v2211_v59, %v2281_v38 }
 0x2fe   : > { %2319 = vst [vmem:[%s235_s14] sm:$0x3] %v2318_v61 }
 0x2ff PF: > { %s16_s18 = sadd.s32 1, %s2578_s18  }
 0x300   : > { %p13_p4 = scmp.ge.s32.totalorder %s16_s18, 4  }
 0x302   :  { %15 = sbr.rel (!%p13_p4) target bundleno = 1 (0x1), region = 80 }

</bundles_post_ra>
